<compile_context>
chip_gen: v5e
topology: v5e:2x2
jax: 0.10.0
libtpu: 0.0.40
codegen_flags: <defaults>
</compile_context>

<pallas_src>
import jax
import jax.numpy as jnp
from jax import lax
from jax.experimental import pallas as pl
from jax.experimental.pallas import tpu as pltpu

# ----------------------------- config --------------------------------------
B = 2           # batch
T = 8           # sequence length
V = 256         # vocab size
D = 32          # hidden size
H = 4           # attention heads
HD = D // H     # head dim
MLP = 4 * D     # MLP hidden (=128)
NLAYER = 2
NMODEL = 2      # [pos, neg]
M = B * T       # flattened tokens
LN_EPS = 1e-5


# ---------------------- fused dual-LM loss kernel ---------------------------
def _fused_lm_loss_kernel(
    tok_ref,                            # (M, 1) int32              (shared)
    wte_ref, wte_t_ref, wpe_ref,        # (V,D) bf16, (D,V) bf16, (M,D) f32
    ln1_g_ref, ln1_b_ref,               # (NLAYER, 1, D) f32
    w_qkv_ref, b_qkv_ref,               # (NLAYER, D, 3D) bf16, (NLAYER, 1, 3D) f32
    w_o_ref, b_o_ref,                   # (NLAYER, D, D) bf16,  (NLAYER, 1, D) f32
    ln2_g_ref, ln2_b_ref,               # (NLAYER, 1, D) f32
    w_fc_ref, b_fc_ref,                 # (NLAYER, D, MLP) bf16, (NLAYER, 1, MLP) f32
    w_proj_ref, b_proj_ref,             # (NLAYER, MLP, D) bf16, (NLAYER, 1, D) f32
    ln_f_g_ref, ln_f_b_ref,             # (1, D) f32
    loss_ref,                           # out: (B, 1) f32 — per-sequence mean CE
    attn_ref,                           # scratch: (M, D) f32
):
    # ---- embedding: one_hot(tokens) @ wte + wpe (all in VMEM) ----
    tok = tok_ref[...]                                          # (M, 1) int32
    vocab_ids = lax.broadcasted_iota(jnp.int32, (M, V), 1)
    one_hot = (vocab_ids == tok).astype(jnp.float32)            # (M, V), exact 0/1
    x = jnp.dot(one_hot.astype(jnp.bfloat16), wte_ref[...],
                preferred_element_type=jnp.float32)             # (M, D) f32
    x = x + wpe_ref[...]

    def layer_norm(h, g, b):                                    # g, b: (1, D)
        mu = jnp.mean(h, axis=-1, keepdims=True)
        var = jnp.mean((h - mu) ** 2, axis=-1, keepdims=True)
        return (h - mu) * lax.rsqrt(var + LN_EPS) * g + b

    def matmul_bias(a, w_bf16, bias):                           # bf16 MXU, f32 acc
        return jnp.dot(a.astype(jnp.bfloat16), w_bf16,
                       preferred_element_type=jnp.float32) + bias

    rows = lax.broadcasted_iota(jnp.int32, (T, T), 0)
    cols = lax.broadcasted_iota(jnp.int32, (T, T), 1)
    causal = rows >= cols
    scale = HD ** -0.5
    qkT_dims = (((1,), (1,)), ((), ()))                         # A @ B^T

    for l in range(NLAYER):
        # -------- attention block --------
        h = layer_norm(x, ln1_g_ref[l], ln1_b_ref[l])
        qkv = matmul_bias(h, w_qkv_ref[l], b_qkv_ref[l])        # (M, 3D)
        q = qkv[:, 0:D]
        k = qkv[:, D:2 * D]
        v = qkv[:, 2 * D:3 * D]
        # per-(batch, head) causal softmax attention — static slices, unrolled
        for bb in range(B):
            r0 = bb * T
            for hh in range(H):
                c0 = hh * HD
                q_bh = q[r0:r0 + T, c0:c0 + HD]                 # (T, HD) f32
                k_bh = k[r0:r0 + T, c0:c0 + HD]
                v_bh = v[r0:r0 + T, c0:c0 + HD]
                s = lax.dot_general(q_bh, k_bh, qkT_dims,
                                    preferred_element_type=jnp.float32) * scale
                s = jnp.where(causal, s, -1e30)
                s_max = jnp.max(s, axis=-1, keepdims=True)
                p = jnp.exp(s - s_max)
                p = p / jnp.sum(p, axis=-1, keepdims=True)
                o_bh = jnp.dot(p, v_bh, preferred_element_type=jnp.float32)
                attn_ref[r0:r0 + T, c0:c0 + HD] = o_bh
        x = x + matmul_bias(attn_ref[...], w_o_ref[l], b_o_ref[l])

        # -------- MLP block --------
        h = layer_norm(x, ln2_g_ref[l], ln2_b_ref[l])
        h = jax.nn.gelu(matmul_bias(h, w_fc_ref[l], b_fc_ref[l]),
                        approximate=True)                       # GPT-2 "gelu_new"
        x = x + matmul_bias(h, w_proj_ref[l], b_proj_ref[l])

    x = layer_norm(x, ln_f_g_ref[...], ln_f_b_ref[...])

    # ---- tied lm_head + per-token CE + per-sequence mean (logits stay in VMEM) ----
    logits = jnp.dot(x.astype(jnp.bfloat16), wte_t_ref[...],
                     preferred_element_type=jnp.float32)        # (M, V) f32
    l_max = jnp.max(logits, axis=-1, keepdims=True)
    lse = jnp.log(jnp.sum(jnp.exp(logits - l_max), axis=-1, keepdims=True)) + l_max
    picked = jnp.sum(one_hot * logits, axis=-1, keepdims=True)  # logits[target]
    loss_tok = lse - picked                                     # (M, 1): -log p[target]
    for bb in range(B):
        seq_mean = jnp.mean(loss_tok[bb * T:(bb + 1) * T, :], axis=0, keepdims=True)
        loss_ref[bb:bb + 1, :] = seq_mean                       # (1, 1)


# ----- wrapper: one launch for BOTH models (grid=(2,), parallel over models) -----
_ARG_ORDER = ("wte", "wte_t", "wpe",
              "ln1_g", "ln1_b", "w_qkv", "b_qkv", "w_o", "b_o",
              "ln2_g", "ln2_b", "w_fc", "b_fc", "w_proj", "b_proj",
              "ln_f_g", "ln_f_b")


def _model_spec(arr):
    # Full array minus the leading (size-NMODEL) model axis; model axis squeezed.
    nd = arr.ndim
    return pl.BlockSpec((None,) + arr.shape[1:],
                        lambda m, _nd=nd: (m,) + (0,) * (_nd - 1))


def fused_dual_lm_loss(packed, tokens_col):
    in_specs = [pl.BlockSpec((M, 1), lambda m: (0, 0))]           # shared tokens
    in_specs += [_model_spec(packed[k]) for k in _ARG_ORDER]
    return pl.pallas_call(
        _fused_lm_loss_kernel,
        out_shape=jax.ShapeDtypeStruct((NMODEL, B, 1), jnp.float32),
        grid=(NMODEL,),
        in_specs=in_specs,
        out_specs=pl.BlockSpec((None, B, 1), lambda m: (m, 0, 0)),
        scratch_shapes=[pltpu.VMEM((M, D), jnp.float32)],
        compiler_params=pltpu.CompilerParams(
            dimension_semantics=("parallel",)),                   # v7x: 1 model / TC
    )(tokens_col, *[packed[k] for k in _ARG_ORDER])


# ----------------------- final 2-class softmax kernel ------------------------
def _two_class_softmax_kernel(s_ref, o_ref):
    s = -s_ref[...]                              # label_probs = -1 * stacked scores
    mx = jnp.max(s, axis=-1, keepdims=True)
    e = jnp.exp(s - mx)
    o_ref[...] = e / jnp.sum(e, axis=-1, keepdims=True)


def two_class_softmax(scores):
    Bb, C = scores.shape
    return pl.pallas_call(
        _two_class_softmax_kernel,
        out_shape=jax.ShapeDtypeStruct((Bb, C), jnp.float32),
        grid=(1,),
        in_specs=[pl.BlockSpec((Bb, C), lambda i: (0, 0))],
        out_specs=pl.BlockSpec((Bb, C), lambda i: (0, 0)),
    )(scores)


# --------------------- GPT-2-style LM (synthetic params) --------------------
def init_model_params(seed):
    key = jax.random.PRNGKey(seed)
    keys = iter(jax.random.split(key, 2 + NLAYER * 4))
    nk = lambda: next(keys)
    nrm = lambda k, shape, s=0.02: s * jax.random.normal(k, shape, dtype=jnp.float32)
    params = {
        "wte": nrm(nk(), (V, D)),
        "wpe": nrm(nk(), (T, D), 0.01),
        "ln_f_g": jnp.ones((D,), jnp.float32),
        "ln_f_b": jnp.zeros((D,), jnp.float32),
        "layers": [],
    }
    for _ in range(NLAYER):
        params["layers"].append({
            "ln1_g": jnp.ones((D,), jnp.float32), "ln1_b": jnp.zeros((D,), jnp.float32),
            "w_qkv": nrm(nk(), (D, 3 * D)), "b_qkv": jnp.zeros((3 * D,), jnp.float32),
            "w_o": nrm(nk(), (D, D)), "b_o": jnp.zeros((D,), jnp.float32),
            "ln2_g": jnp.ones((D,), jnp.float32), "ln2_b": jnp.zeros((D,), jnp.float32),
            "w_fc": nrm(nk(), (D, MLP)), "b_fc": jnp.zeros((MLP,), jnp.float32),
            "w_proj": nrm(nk(), (MLP, D)), "b_proj": jnp.zeros((D,), jnp.float32),
        })
    return params


def pack_params(p_pos, p_neg):
    """Stack pos/neg parameters on a leading model axis, pre-transpose the tied
    lm_head, pre-tile wpe over batch, and cast matmul weights to bf16 (MXU
    operands); LN params / biases stay f32.  Done once outside the jitted forward."""
    models = (p_pos, p_neg)                       # model axis: 0 = pos, 1 = neg

    def stack(fn, dtype):
        return jnp.stack([jnp.asarray(fn(p)) for p in models], axis=0).astype(dtype)

    def stack_layers(key, shape, dtype):
        return jnp.stack(
            [jnp.stack([lyr[key].reshape(shape) for lyr in p["layers"]], axis=0)
             for p in models], axis=0).astype(dtype)

    packed = {
        "wte":    stack(lambda p: p["wte"], jnp.bfloat16),                 # (2, V, D)
        "wte_t":  stack(lambda p: p["wte"].T, jnp.bfloat16),               # (2, D, V)
        "wpe":    stack(lambda p: jnp.tile(p["wpe"], (B, 1)), jnp.float32),  # (2, M, D)
        "ln_f_g": stack(lambda p: p["ln_f_g"].reshape(1, D), jnp.float32),
        "ln_f_b": stack(lambda p: p["ln_f_b"].reshape(1, D), jnp.float32),
        "ln1_g":  stack_layers("ln1_g", (1, D), jnp.float32),
        "ln1_b":  stack_layers("ln1_b", (1, D), jnp.float32),
        "w_qkv":  stack_layers("w_qkv", (D, 3 * D), jnp.bfloat16),
        "b_qkv":  stack_layers("b_qkv", (1, 3 * D), jnp.float32),
        "w_o":    stack_layers("w_o", (D, D), jnp.bfloat16),
        "b_o":    stack_layers("b_o", (1, D), jnp.float32),
        "ln2_g":  stack_layers("ln2_g", (1, D), jnp.float32),
        "ln2_b":  stack_layers("ln2_b", (1, D), jnp.float32),
        "w_fc":   stack_layers("w_fc", (D, MLP), jnp.bfloat16),
        "b_fc":   stack_layers("b_fc", (1, MLP), jnp.float32),
        "w_proj": stack_layers("w_proj", (MLP, D), jnp.bfloat16),
        "b_proj": stack_layers("b_proj", (1, D), jnp.float32),
    }
    return packed


# --------------------- ClassificationModel.forward --------------------------
def classification_forward(packed, tokens):
    tokens_col = tokens.reshape(M, 1).astype(jnp.int32)
    losses = fused_dual_lm_loss(packed, tokens_col)     # (2, B, 1): [pos, neg]
    pos = losses[0, :, 0]                               # (B,)
    neg = losses[1, :, 0]                               # (B,)
    # torch.stack([neg, pos]).permute(1, 0) -> (B, 2), col0 = neg, col1 = pos
    scores = jnp.stack([neg, pos], axis=1)
    # softmax(-scores, dim=1); `.tolist()` omitted — returns a jnp array
    return two_class_softmax(scores)


# ------------------------------- main ----------------------------------------
if __name__ == "__main__":
    key = jax.random.PRNGKey(0)
    tensor_input = jax.random.randint(key, (B, T), 0, V, dtype=jnp.int32)

    params_pos = init_model_params(1)
    params_neg = init_model_params(2)
    packed = pack_params(params_pos, params_neg)        # one-time packing (outside jit)

    probs = jax.jit(classification_forward)(packed, tensor_input)
    probs = jax.block_until_ready(probs)

    assert probs.shape == (B, 2)
    assert bool(jnp.all(jnp.isfinite(probs)))
    # rows of a softmax must sum to 1
    assert bool(jnp.all(jnp.abs(jnp.sum(probs, axis=1) - 1.0) < 1e-5))
    print("KERNEL_OK")
</pallas_src>

<mosaic_0001>
module attributes {stable_mosaic.version = 11 : i64} {
  func.func @_fused_lm_loss_kernel(%arg0: i32, %arg1: memref<16x1xi32, #tpu.memory_space<vmem>>, %arg2: memref<1x256x32xbf16, #tpu.memory_space<vmem>>, %arg3: memref<1x32x256xbf16, #tpu.memory_space<vmem>>, %arg4: memref<1x16x32xf32, #tpu.memory_space<vmem>>, %arg5: memref<1x2x1x32xf32, #tpu.memory_space<vmem>>, %arg6: memref<1x2x1x32xf32, #tpu.memory_space<vmem>>, %arg7: memref<1x2x32x96xbf16, #tpu.memory_space<vmem>>, %arg8: memref<1x2x1x96xf32, #tpu.memory_space<vmem>>, %arg9: memref<1x2x32x32xbf16, #tpu.memory_space<vmem>>, %arg10: memref<1x2x1x32xf32, #tpu.memory_space<vmem>>, %arg11: memref<1x2x1x32xf32, #tpu.memory_space<vmem>>, %arg12: memref<1x2x1x32xf32, #tpu.memory_space<vmem>>, %arg13: memref<1x2x32x128xbf16, #tpu.memory_space<vmem>>, %arg14: memref<1x2x1x128xf32, #tpu.memory_space<vmem>>, %arg15: memref<1x2x128x32xbf16, #tpu.memory_space<vmem>>, %arg16: memref<1x2x1x32xf32, #tpu.memory_space<vmem>>, %arg17: memref<1x1x32xf32, #tpu.memory_space<vmem>>, %arg18: memref<1x1x32xf32, #tpu.memory_space<vmem>>, %arg19: memref<1x2x1xf32, #tpu.memory_space<vmem>>, %arg20: memref<16x32xf32, #tpu.memory_space<vmem>>) attributes {dimension_semantics = [#tpu.dimension_semantics<parallel>], iteration_bounds = array<i64: 2>, scalar_prefetch = 0 : i64, scratch_operands = 1 : i64, tpu.core_type = #tpu.core_type<tc>, window_params = [{pipeline_mode = #tpu.pipeline_mode<synchronous>, transform_indices = @transform_0, window_bounds = array<i64: 16, 1>}, {transform_indices = @transform_1, window_bounds = array<i64: 1, 256, 32>}, {transform_indices = @transform_2, window_bounds = array<i64: 1, 32, 256>}, {transform_indices = @transform_3, window_bounds = array<i64: 1, 16, 32>}, {transform_indices = @transform_4, window_bounds = array<i64: 1, 2, 1, 32>}, {transform_indices = @transform_5, window_bounds = array<i64: 1, 2, 1, 32>}, {transform_indices = @transform_6, window_bounds = array<i64: 1, 2, 32, 96>}, {transform_indices = @transform_7, window_bounds = array<i64: 1, 2, 1, 96>}, {transform_indices = @transform_8, window_bounds = array<i64: 1, 2, 32, 32>}, {transform_indices = @transform_9, window_bounds = array<i64: 1, 2, 1, 32>}, {transform_indices = @transform_10, window_bounds = array<i64: 1, 2, 1, 32>}, {transform_indices = @transform_11, window_bounds = array<i64: 1, 2, 1, 32>}, {transform_indices = @transform_12, window_bounds = array<i64: 1, 2, 32, 128>}, {transform_indices = @transform_13, window_bounds = array<i64: 1, 2, 1, 128>}, {transform_indices = @transform_14, window_bounds = array<i64: 1, 2, 128, 32>}, {transform_indices = @transform_15, window_bounds = array<i64: 1, 2, 1, 32>}, {transform_indices = @transform_16, window_bounds = array<i64: 1, 1, 32>}, {transform_indices = @transform_17, window_bounds = array<i64: 1, 1, 32>}, {transform_indices = @transform_18, window_bounds = array<i64: 1, 2, 1>}]} {
    %c0 = arith.constant 0 : index
    %c0_0 = arith.constant 0 : index
    %0 = vector.load %arg1[%c0, %c0_0] : memref<16x1xi32, #tpu.memory_space<vmem>>, vector<16x1xi32>
    %1 = tpu.iota {dimensions = array<i32: 1>} : vector<16x256xi32>
    %2 = vector.broadcast %0 : vector<16x1xi32> to vector<16x256xi32>
    %3 = arith.cmpi eq, %1, %2 : vector<16x256xi32>
    %4 = arith.extui %3 : vector<16x256xi1> to vector<16x256xi32>
    %5 = arith.sitofp %4 : vector<16x256xi32> to vector<16x256xf32>
    %6 = arith.truncf %5 : vector<16x256xf32> to vector<16x256xbf16>
    %c0_1 = arith.constant 0 : index
    %c0_2 = arith.constant 0 : index
    %c0_3 = arith.constant 0 : index
    %7 = vector.load %arg2[%c0_1, %c0_2, %c0_3] : memref<1x256x32xbf16, #tpu.memory_space<vmem>>, vector<1x256x32xbf16>
    %8 = vector.shape_cast %7 : vector<1x256x32xbf16> to vector<256x32xbf16>
    %cst = arith.constant dense<0.000000e+00> : vector<16x32xf32>
    %9 = tpu.matmul %6, %8, %cst {dimension_numbers = #tpu.dot_dimension_numbers<[1], [0], [0], [1], [0, 0, 1, 1], [], []>} : vector<16x256xbf16>, vector<256x32xbf16>, vector<16x32xf32> -> vector<16x32xf32>
    %c0_4 = arith.constant 0 : index
    %c0_5 = arith.constant 0 : index
    %c0_6 = arith.constant 0 : index
    %10 = vector.load %arg4[%c0_4, %c0_5, %c0_6] : memref<1x16x32xf32, #tpu.memory_space<vmem>>, vector<1x16x32xf32>
    %11 = vector.shape_cast %10 : vector<1x16x32xf32> to vector<16x32xf32>
    %12 = arith.addf %9, %11 : vector<16x32xf32>
    %13 = tpu.iota {dimensions = array<i32: 0>} : vector<8x8xi32>
    %14 = tpu.iota {dimensions = array<i32: 1>} : vector<8x8xi32>
    %15 = arith.cmpi sge, %13, %14 : vector<8x8xi32>
    %c0_7 = arith.constant 0 : index
    %c0_8 = arith.constant 0 : index
    %c0_9 = arith.constant 0 : index
    %c0_10 = arith.constant 0 : index
    %16 = vector.load %arg5[%c0_7, %c0_8, %c0_9, %c0_10] : memref<1x2x1x32xf32, #tpu.memory_space<vmem>>, vector<1x1x1x32xf32>
    %17 = vector.shape_cast %16 : vector<1x1x1x32xf32> to vector<1x32xf32>
    %c0_11 = arith.constant 0 : index
    %c0_12 = arith.constant 0 : index
    %c0_13 = arith.constant 0 : index
    %c0_14 = arith.constant 0 : index
    %18 = vector.load %arg6[%c0_11, %c0_12, %c0_13, %c0_14] : memref<1x2x1x32xf32, #tpu.memory_space<vmem>>, vector<1x1x1x32xf32>
    %19 = vector.shape_cast %18 : vector<1x1x1x32xf32> to vector<1x32xf32>
    %cst_15 = arith.constant dense<0.000000e+00> : vector<16xf32>
    %20 = vector.multi_reduction <add>, %12, %cst_15 [1] : vector<16x32xf32> to vector<16xf32>
    %21 = vector.shape_cast %20 : vector<16xf32> to vector<16x1xf32>
    %cst_16 = arith.constant 3.200000e+01 : f32
    %22 = vector.broadcast %cst_16 : f32 to vector<16x1xf32>
    %23 = arith.divf %21, %22 : vector<16x1xf32>
    %24 = vector.broadcast %23 : vector<16x1xf32> to vector<16x32xf32>
    %25 = arith.subf %12, %24 : vector<16x32xf32>
    %26 = arith.mulf %25, %25 : vector<16x32xf32>
    %cst_17 = arith.constant dense<0.000000e+00> : vector<16xf32>
    %27 = vector.multi_reduction <add>, %26, %cst_17 [1] : vector<16x32xf32> to vector<16xf32>
    %28 = vector.shape_cast %27 : vector<16xf32> to vector<16x1xf32>
    %cst_18 = arith.constant 3.200000e+01 : f32
    %29 = vector.broadcast %cst_18 : f32 to vector<16x1xf32>
    %30 = arith.divf %28, %29 : vector<16x1xf32>
    %31 = vector.broadcast %23 : vector<16x1xf32> to vector<16x32xf32>
    %32 = arith.subf %12, %31 : vector<16x32xf32>
    %cst_19 = arith.constant 9.99999974E-6 : f32
    %33 = vector.broadcast %cst_19 : f32 to vector<16x1xf32>
    %34 = arith.addf %30, %33 : vector<16x1xf32>
    %35 = math.rsqrt %34 : vector<16x1xf32>
    %36 = vector.broadcast %35 : vector<16x1xf32> to vector<16x32xf32>
    %37 = arith.mulf %32, %36 : vector<16x32xf32>
    %38 = vector.broadcast %17 : vector<1x32xf32> to vector<16x32xf32>
    %39 = arith.mulf %37, %38 : vector<16x32xf32>
    %40 = vector.broadcast %19 : vector<1x32xf32> to vector<16x32xf32>
    %41 = arith.addf %39, %40 : vector<16x32xf32>
    %c0_20 = arith.constant 0 : index
    %c0_21 = arith.constant 0 : index
    %c0_22 = arith.constant 0 : index
    %c0_23 = arith.constant 0 : index
    %42 = vector.load %arg7[%c0_20, %c0_21, %c0_22, %c0_23] : memref<1x2x32x96xbf16, #tpu.memory_space<vmem>>, vector<1x1x32x96xbf16>
    %43 = vector.shape_cast %42 : vector<1x1x32x96xbf16> to vector<32x96xbf16>
    %c0_24 = arith.constant 0 : index
    %c0_25 = arith.constant 0 : index
    %c0_26 = arith.constant 0 : index
    %c0_27 = arith.constant 0 : index
    %44 = vector.load %arg8[%c0_24, %c0_25, %c0_26, %c0_27] : memref<1x2x1x96xf32, #tpu.memory_space<vmem>>, vector<1x1x1x96xf32>
    %45 = vector.shape_cast %44 : vector<1x1x1x96xf32> to vector<1x96xf32>
    %46 = arith.truncf %41 : vector<16x32xf32> to vector<16x32xbf16>
    %cst_28 = arith.constant dense<0.000000e+00> : vector<16x96xf32>
    %47 = tpu.matmul %46, %43, %cst_28 {dimension_numbers = #tpu.dot_dimension_numbers<[1], [0], [0], [1], [0, 0, 1, 1], [], []>} : vector<16x32xbf16>, vector<32x96xbf16>, vector<16x96xf32> -> vector<16x96xf32>
    %48 = vector.broadcast %45 : vector<1x96xf32> to vector<16x96xf32>
    %49 = arith.addf %47, %48 : vector<16x96xf32>
    %50 = vector.extract_strided_slice %49 {offsets = [0, 0], sizes = [16, 32], strides = [1, 1]} : vector<16x96xf32> to vector<16x32xf32>
    %51 = vector.extract_strided_slice %49 {offsets = [0, 32], sizes = [16, 32], strides = [1, 1]} : vector<16x96xf32> to vector<16x32xf32>
    %52 = vector.extract_strided_slice %49 {offsets = [0, 64], sizes = [16, 32], strides = [1, 1]} : vector<16x96xf32> to vector<16x32xf32>
    %53 = vector.extract_strided_slice %50 {offsets = [0, 0], sizes = [8, 8], strides = [1, 1]} : vector<16x32xf32> to vector<8x8xf32>
    %54 = vector.extract_strided_slice %51 {offsets = [0, 0], sizes = [8, 8], strides = [1, 1]} : vector<16x32xf32> to vector<8x8xf32>
    %55 = vector.extract_strided_slice %52 {offsets = [0, 0], sizes = [8, 8], strides = [1, 1]} : vector<16x32xf32> to vector<8x8xf32>
    %cst_29 = arith.constant dense<0.000000e+00> : vector<8x8xf32>
    %56 = tpu.matmul %53, %54, %cst_29 {dimension_numbers = #tpu.dot_dimension_numbers<[1], [1], [0], [0], [0, 0, 1, 0], [], []>} : vector<8x8xf32>, vector<8x8xf32>, vector<8x8xf32> -> vector<8x8xf32>
    %cst_30 = arith.constant 0.353553385 : f32
    %57 = vector.broadcast %cst_30 : f32 to vector<8x8xf32>
    %58 = arith.mulf %56, %57 : vector<8x8xf32>
    %cst_31 = arith.constant -1.000000e+30 : f32
    %59 = vector.broadcast %cst_31 : f32 to vector<8x8xf32>
    %60 = arith.select %15, %58, %59 : vector<8x8xi1>, vector<8x8xf32>
    %cst_32 = arith.constant dense<0xFF800000> : vector<8xf32>
    %61 = vector.multi_reduction <maximumf>, %60, %cst_32 [1] : vector<8x8xf32> to vector<8xf32>
    %62 = vector.shape_cast %61 : vector<8xf32> to vector<8x1xf32>
    %63 = vector.broadcast %62 : vector<8x1xf32> to vector<8x8xf32>
    %64 = arith.subf %60, %63 : vector<8x8xf32>
    %65 = math.exp %64 : vector<8x8xf32>
    %cst_33 = arith.constant dense<0.000000e+00> : vector<8xf32>
    %66 = vector.multi_reduction <add>, %65, %cst_33 [1] : vector<8x8xf32> to vector<8xf32>
    %67 = vector.shape_cast %66 : vector<8xf32> to vector<8x1xf32>
    %68 = vector.broadcast %67 : vector<8x1xf32> to vector<8x8xf32>
    %69 = arith.divf %65, %68 : vector<8x8xf32>
    %cst_34 = arith.constant dense<0.000000e+00> : vector<8x8xf32>
    %70 = tpu.matmul %69, %55, %cst_34 {dimension_numbers = #tpu.dot_dimension_numbers<[1], [0], [0], [1], [0, 0, 1, 1], [], []>} : vector<8x8xf32>, vector<8x8xf32>, vector<8x8xf32> -> vector<8x8xf32>
    %c0_35 = arith.constant 0 : index
    %c0_36 = arith.constant 0 : index
    %71 = vector.load %arg20[%c0_35, %c0_36] : memref<16x32xf32, #tpu.memory_space<vmem>>, vector<8x8xf32>
    tpu.vector_store %arg20[%c0_35, %c0_36], %70 {strides = array<i32>} : memref<16x32xf32, #tpu.memory_space<vmem>>, vector<8x8xf32>,
    %72 = vector.extract_strided_slice %50 {offsets = [0, 8], sizes = [8, 8], strides = [1, 1]} : vector<16x32xf32> to vector<8x8xf32>
    %73 = vector.extract_strided_slice %51 {offsets = [0, 8], sizes = [8, 8], strides = [1, 1]} : vector<16x32xf32> to vector<8x8xf32>
    %74 = vector.extract_strided_slice %52 {offsets = [0, 8], sizes = [8, 8], strides = [1, 1]} : vector<16x32xf32> to vector<8x8xf32>
    %cst_37 = arith.constant dense<0.000000e+00> : vector<8x8xf32>
    %75 = tpu.matmul %72, %73, %cst_37 {dimension_numbers = #tpu.dot_dimension_numbers<[1], [1], [0], [0], [0, 0, 1, 0], [], []>} : vector<8x8xf32>, vector<8x8xf32>, vector<8x8xf32> -> vector<8x8xf32>
    %cst_38 = arith.constant 0.353553385 : f32
    %76 = vector.broadcast %cst_38 : f32 to vector<8x8xf32>
    %77 = arith.mulf %75, %76 : vector<8x8xf32>
    %cst_39 = arith.constant -1.000000e+30 : f32
    %78 = vector.broadcast %cst_39 : f32 to vector<8x8xf32>
    %79 = arith.select %15, %77, %78 : vector<8x8xi1>, vector<8x8xf32>
    %cst_40 = arith.constant dense<0xFF800000> : vector<8xf32>
    %80 = vector.multi_reduction <maximumf>, %79, %cst_40 [1] : vector<8x8xf32> to vector<8xf32>
    %81 = vector.shape_cast %80 : vector<8xf32> to vector<8x1xf32>
    %82 = vector.broadcast %81 : vector<8x1xf32> to vector<8x8xf32>
    %83 = arith.subf %79, %82 : vector<8x8xf32>
    %84 = math.exp %83 : vector<8x8xf32>
    %cst_41 = arith.constant dense<0.000000e+00> : vector<8xf32>
    %85 = vector.multi_reduction <add>, %84, %cst_41 [1] : vector<8x8xf32> to vector<8xf32>
    %86 = vector.shape_cast %85 : vector<8xf32> to vector<8x1xf32>
    %87 = vector.broadcast %86 : vector<8x1xf32> to vector<8x8xf32>
    %88 = arith.divf %84, %87 : vector<8x8xf32>
    %cst_42 = arith.constant dense<0.000000e+00> : vector<8x8xf32>
    %89 = tpu.matmul %88, %74, %cst_42 {dimension_numbers = #tpu.dot_dimension_numbers<[1], [0], [0], [1], [0, 0, 1, 1], [], []>} : vector<8x8xf32>, vector<8x8xf32>, vector<8x8xf32> -> vector<8x8xf32>
    %c0_43 = arith.constant 0 : index
    %c8 = arith.constant 8 : index
    %90 = vector.load %arg20[%c0_43, %c8] : memref<16x32xf32, #tpu.memory_space<vmem>>, vector<8x8xf32>
    tpu.vector_store %arg20[%c0_43, %c8], %89 {strides = array<i32>} : memref<16x32xf32, #tpu.memory_space<vmem>>, vector<8x8xf32>,
    %91 = vector.extract_strided_slice %50 {offsets = [0, 16], sizes = [8, 8], strides = [1, 1]} : vector<16x32xf32> to vector<8x8xf32>
    %92 = vector.extract_strided_slice %51 {offsets = [0, 16], sizes = [8, 8], strides = [1, 1]} : vector<16x32xf32> to vector<8x8xf32>
    %93 = vector.extract_strided_slice %52 {offsets = [0, 16], sizes = [8, 8], strides = [1, 1]} : vector<16x32xf32> to vector<8x8xf32>
    %cst_44 = arith.constant dense<0.000000e+00> : vector<8x8xf32>
    %94 = tpu.matmul %91, %92, %cst_44 {dimension_numbers = #tpu.dot_dimension_numbers<[1], [1], [0], [0], [0, 0, 1, 0], [], []>} : vector<8x8xf32>, vector<8x8xf32>, vector<8x8xf32> -> vector<8x8xf32>
    %cst_45 = arith.constant 0.353553385 : f32
    %95 = vector.broadcast %cst_45 : f32 to vector<8x8xf32>
    %96 = arith.mulf %94, %95 : vector<8x8xf32>
    %cst_46 = arith.constant -1.000000e+30 : f32
    %97 = vector.broadcast %cst_46 : f32 to vector<8x8xf32>
    %98 = arith.select %15, %96, %97 : vector<8x8xi1>, vector<8x8xf32>
    %cst_47 = arith.constant dense<0xFF800000> : vector<8xf32>
    %99 = vector.multi_reduction <maximumf>, %98, %cst_47 [1] : vector<8x8xf32> to vector<8xf32>
    %100 = vector.shape_cast %99 : vector<8xf32> to vector<8x1xf32>
    %101 = vector.broadcast %100 : vector<8x1xf32> to vector<8x8xf32>
    %102 = arith.subf %98, %101 : vector<8x8xf32>
    %103 = math.exp %102 : vector<8x8xf32>
    %cst_48 = arith.constant dense<0.000000e+00> : vector<8xf32>
    %104 = vector.multi_reduction <add>, %103, %cst_48 [1] : vector<8x8xf32> to vector<8xf32>
    %105 = vector.shape_cast %104 : vector<8xf32> to vector<8x1xf32>
    %106 = vector.broadcast %105 : vector<8x1xf32> to vector<8x8xf32>
    %107 = arith.divf %103, %106 : vector<8x8xf32>
    %cst_49 = arith.constant dense<0.000000e+00> : vector<8x8xf32>
    %108 = tpu.matmul %107, %93, %cst_49 {dimension_numbers = #tpu.dot_dimension_numbers<[1], [0], [0], [1], [0, 0, 1, 1], [], []>} : vector<8x8xf32>, vector<8x8xf32>, vector<8x8xf32> -> vector<8x8xf32>
    %c0_50 = arith.constant 0 : index
    %c16 = arith.constant 16 : index
    %109 = vector.load %arg20[%c0_50, %c16] : memref<16x32xf32, #tpu.memory_space<vmem>>, vector<8x8xf32>
    tpu.vector_store %arg20[%c0_50, %c16], %108 {strides = array<i32>} : memref<16x32xf32, #tpu.memory_space<vmem>>, vector<8x8xf32>,
    %110 = vector.extract_strided_slice %50 {offsets = [0, 24], sizes = [8, 8], strides = [1, 1]} : vector<16x32xf32> to vector<8x8xf32>
    %111 = vector.extract_strided_slice %51 {offsets = [0, 24], sizes = [8, 8], strides = [1, 1]} : vector<16x32xf32> to vector<8x8xf32>
    %112 = vector.extract_strided_slice %52 {offsets = [0, 24], sizes = [8, 8], strides = [1, 1]} : vector<16x32xf32> to vector<8x8xf32>
    %cst_51 = arith.constant dense<0.000000e+00> : vector<8x8xf32>
    %113 = tpu.matmul %110, %111, %cst_51 {dimension_numbers = #tpu.dot_dimension_numbers<[1], [1], [0], [0], [0, 0, 1, 0], [], []>} : vector<8x8xf32>, vector<8x8xf32>, vector<8x8xf32> -> vector<8x8xf32>
    %cst_52 = arith.constant 0.353553385 : f32
    %114 = vector.broadcast %cst_52 : f32 to vector<8x8xf32>
    %115 = arith.mulf %113, %114 : vector<8x8xf32>
    %cst_53 = arith.constant -1.000000e+30 : f32
    %116 = vector.broadcast %cst_53 : f32 to vector<8x8xf32>
    %117 = arith.select %15, %115, %116 : vector<8x8xi1>, vector<8x8xf32>
    %cst_54 = arith.constant dense<0xFF800000> : vector<8xf32>
    %118 = vector.multi_reduction <maximumf>, %117, %cst_54 [1] : vector<8x8xf32> to vector<8xf32>
    %119 = vector.shape_cast %118 : vector<8xf32> to vector<8x1xf32>
    %120 = vector.broadcast %119 : vector<8x1xf32> to vector<8x8xf32>
    %121 = arith.subf %117, %120 : vector<8x8xf32>
    %122 = math.exp %121 : vector<8x8xf32>
    %cst_55 = arith.constant dense<0.000000e+00> : vector<8xf32>
    %123 = vector.multi_reduction <add>, %122, %cst_55 [1] : vector<8x8xf32> to vector<8xf32>
    %124 = vector.shape_cast %123 : vector<8xf32> to vector<8x1xf32>
    %125 = vector.broadcast %124 : vector<8x1xf32> to vector<8x8xf32>
    %126 = arith.divf %122, %125 : vector<8x8xf32>
    %cst_56 = arith.constant dense<0.000000e+00> : vector<8x8xf32>
    %127 = tpu.matmul %126, %112, %cst_56 {dimension_numbers = #tpu.dot_dimension_numbers<[1], [0], [0], [1], [0, 0, 1, 1], [], []>} : vector<8x8xf32>, vector<8x8xf32>, vector<8x8xf32> -> vector<8x8xf32>
    %c0_57 = arith.constant 0 : index
    %c24 = arith.constant 24 : index
    %128 = vector.load %arg20[%c0_57, %c24] : memref<16x32xf32, #tpu.memory_space<vmem>>, vector<8x8xf32>
    tpu.vector_store %arg20[%c0_57, %c24], %127 {strides = array<i32>} : memref<16x32xf32, #tpu.memory_space<vmem>>, vector<8x8xf32>,
    %129 = vector.extract_strided_slice %50 {offsets = [8, 0], sizes = [8, 8], strides = [1, 1]} : vector<16x32xf32> to vector<8x8xf32>
    %130 = vector.extract_strided_slice %51 {offsets = [8, 0], sizes = [8, 8], strides = [1, 1]} : vector<16x32xf32> to vector<8x8xf32>
    %131 = vector.extract_strided_slice %52 {offsets = [8, 0], sizes = [8, 8], strides = [1, 1]} : vector<16x32xf32> to vector<8x8xf32>
    %cst_58 = arith.constant dense<0.000000e+00> : vector<8x8xf32>
    %132 = tpu.matmul %129, %130, %cst_58 {dimension_numbers = #tpu.dot_dimension_numbers<[1], [1], [0], [0], [0, 0, 1, 0], [], []>} : vector<8x8xf32>, vector<8x8xf32>, vector<8x8xf32> -> vector<8x8xf32>
    %cst_59 = arith.constant 0.353553385 : f32
    %133 = vector.broadcast %cst_59 : f32 to vector<8x8xf32>
    %134 = arith.mulf %132, %133 : vector<8x8xf32>
    %cst_60 = arith.constant -1.000000e+30 : f32
    %135 = vector.broadcast %cst_60 : f32 to vector<8x8xf32>
    %136 = arith.select %15, %134, %135 : vector<8x8xi1>, vector<8x8xf32>
    %cst_61 = arith.constant dense<0xFF800000> : vector<8xf32>
    %137 = vector.multi_reduction <maximumf>, %136, %cst_61 [1] : vector<8x8xf32> to vector<8xf32>
    %138 = vector.shape_cast %137 : vector<8xf32> to vector<8x1xf32>
    %139 = vector.broadcast %138 : vector<8x1xf32> to vector<8x8xf32>
    %140 = arith.subf %136, %139 : vector<8x8xf32>
    %141 = math.exp %140 : vector<8x8xf32>
    %cst_62 = arith.constant dense<0.000000e+00> : vector<8xf32>
    %142 = vector.multi_reduction <add>, %141, %cst_62 [1] : vector<8x8xf32> to vector<8xf32>
    %143 = vector.shape_cast %142 : vector<8xf32> to vector<8x1xf32>
    %144 = vector.broadcast %143 : vector<8x1xf32> to vector<8x8xf32>
    %145 = arith.divf %141, %144 : vector<8x8xf32>
    %cst_63 = arith.constant dense<0.000000e+00> : vector<8x8xf32>
    %146 = tpu.matmul %145, %131, %cst_63 {dimension_numbers = #tpu.dot_dimension_numbers<[1], [0], [0], [1], [0, 0, 1, 1], [], []>} : vector<8x8xf32>, vector<8x8xf32>, vector<8x8xf32> -> vector<8x8xf32>
    %c8_64 = arith.constant 8 : index
    %c0_65 = arith.constant 0 : index
    %147 = vector.load %arg20[%c8_64, %c0_65] : memref<16x32xf32, #tpu.memory_space<vmem>>, vector<8x8xf32>
    tpu.vector_store %arg20[%c8_64, %c0_65], %146 {strides = array<i32>} : memref<16x32xf32, #tpu.memory_space<vmem>>, vector<8x8xf32>,
    %148 = vector.extract_strided_slice %50 {offsets = [8, 8], sizes = [8, 8], strides = [1, 1]} : vector<16x32xf32> to vector<8x8xf32>
    %149 = vector.extract_strided_slice %51 {offsets = [8, 8], sizes = [8, 8], strides = [1, 1]} : vector<16x32xf32> to vector<8x8xf32>
    %150 = vector.extract_strided_slice %52 {offsets = [8, 8], sizes = [8, 8], strides = [1, 1]} : vector<16x32xf32> to vector<8x8xf32>
    %cst_66 = arith.constant dense<0.000000e+00> : vector<8x8xf32>
    %151 = tpu.matmul %148, %149, %cst_66 {dimension_numbers = #tpu.dot_dimension_numbers<[1], [1], [0], [0], [0, 0, 1, 0], [], []>} : vector<8x8xf32>, vector<8x8xf32>, vector<8x8xf32> -> vector<8x8xf32>
    %cst_67 = arith.constant 0.353553385 : f32
    %152 = vector.broadcast %cst_67 : f32 to vector<8x8xf32>
    %153 = arith.mulf %151, %152 : vector<8x8xf32>
    %cst_68 = arith.constant -1.000000e+30 : f32
    %154 = vector.broadcast %cst_68 : f32 to vector<8x8xf32>
    %155 = arith.select %15, %153, %154 : vector<8x8xi1>, vector<8x8xf32>
    %cst_69 = arith.constant dense<0xFF800000> : vector<8xf32>
    %156 = vector.multi_reduction <maximumf>, %155, %cst_69 [1] : vector<8x8xf32> to vector<8xf32>
    %157 = vector.shape_cast %156 : vector<8xf32> to vector<8x1xf32>
    %158 = vector.broadcast %157 : vector<8x1xf32> to vector<8x8xf32>
    %159 = arith.subf %155, %158 : vector<8x8xf32>
    %160 = math.exp %159 : vector<8x8xf32>
    %cst_70 = arith.constant dense<0.000000e+00> : vector<8xf32>
    %161 = vector.multi_reduction <add>, %160, %cst_70 [1] : vector<8x8xf32> to vector<8xf32>
    %162 = vector.shape_cast %161 : vector<8xf32> to vector<8x1xf32>
    %163 = vector.broadcast %162 : vector<8x1xf32> to vector<8x8xf32>
    %164 = arith.divf %160, %163 : vector<8x8xf32>
    %cst_71 = arith.constant dense<0.000000e+00> : vector<8x8xf32>
    %165 = tpu.matmul %164, %150, %cst_71 {dimension_numbers = #tpu.dot_dimension_numbers<[1], [0], [0], [1], [0, 0, 1, 1], [], []>} : vector<8x8xf32>, vector<8x8xf32>, vector<8x8xf32> -> vector<8x8xf32>
    %c8_72 = arith.constant 8 : index
    %c8_73 = arith.constant 8 : index
    %166 = vector.load %arg20[%c8_72, %c8_73] : memref<16x32xf32, #tpu.memory_space<vmem>>, vector<8x8xf32>
    tpu.vector_store %arg20[%c8_72, %c8_73], %165 {strides = array<i32>} : memref<16x32xf32, #tpu.memory_space<vmem>>, vector<8x8xf32>,
    %167 = vector.extract_strided_slice %50 {offsets = [8, 16], sizes = [8, 8], strides = [1, 1]} : vector<16x32xf32> to vector<8x8xf32>
    %168 = vector.extract_strided_slice %51 {offsets = [8, 16], sizes = [8, 8], strides = [1, 1]} : vector<16x32xf32> to vector<8x8xf32>
    %169 = vector.extract_strided_slice %52 {offsets = [8, 16], sizes = [8, 8], strides = [1, 1]} : vector<16x32xf32> to vector<8x8xf32>
    %cst_74 = arith.constant dense<0.000000e+00> : vector<8x8xf32>
    %170 = tpu.matmul %167, %168, %cst_74 {dimension_numbers = #tpu.dot_dimension_numbers<[1], [1], [0], [0], [0, 0, 1, 0], [], []>} : vector<8x8xf32>, vector<8x8xf32>, vector<8x8xf32> -> vector<8x8xf32>
    %cst_75 = arith.constant 0.353553385 : f32
    %171 = vector.broadcast %cst_75 : f32 to vector<8x8xf32>
    %172 = arith.mulf %170, %171 : vector<8x8xf32>
    %cst_76 = arith.constant -1.000000e+30 : f32
    %173 = vector.broadcast %cst_76 : f32 to vector<8x8xf32>
    %174 = arith.select %15, %172, %173 : vector<8x8xi1>, vector<8x8xf32>
    %cst_77 = arith.constant dense<0xFF800000> : vector<8xf32>
    %175 = vector.multi_reduction <maximumf>, %174, %cst_77 [1] : vector<8x8xf32> to vector<8xf32>
    %176 = vector.shape_cast %175 : vector<8xf32> to vector<8x1xf32>
    %177 = vector.broadcast %176 : vector<8x1xf32> to vector<8x8xf32>
    %178 = arith.subf %174, %177 : vector<8x8xf32>
    %179 = math.exp %178 : vector<8x8xf32>
    %cst_78 = arith.constant dense<0.000000e+00> : vector<8xf32>
    %180 = vector.multi_reduction <add>, %179, %cst_78 [1] : vector<8x8xf32> to vector<8xf32>
    %181 = vector.shape_cast %180 : vector<8xf32> to vector<8x1xf32>
    %182 = vector.broadcast %181 : vector<8x1xf32> to vector<8x8xf32>
    %183 = arith.divf %179, %182 : vector<8x8xf32>
    %cst_79 = arith.constant dense<0.000000e+00> : vector<8x8xf32>
    %184 = tpu.matmul %183, %169, %cst_79 {dimension_numbers = #tpu.dot_dimension_numbers<[1], [0], [0], [1], [0, 0, 1, 1], [], []>} : vector<8x8xf32>, vector<8x8xf32>, vector<8x8xf32> -> vector<8x8xf32>
    %c8_80 = arith.constant 8 : index
    %c16_81 = arith.constant 16 : index
    %185 = vector.load %arg20[%c8_80, %c16_81] : memref<16x32xf32, #tpu.memory_space<vmem>>, vector<8x8xf32>
    tpu.vector_store %arg20[%c8_80, %c16_81], %184 {strides = array<i32>} : memref<16x32xf32, #tpu.memory_space<vmem>>, vector<8x8xf32>,
    %186 = vector.extract_strided_slice %50 {offsets = [8, 24], sizes = [8, 8], strides = [1, 1]} : vector<16x32xf32> to vector<8x8xf32>
    %187 = vector.extract_strided_slice %51 {offsets = [8, 24], sizes = [8, 8], strides = [1, 1]} : vector<16x32xf32> to vector<8x8xf32>
    %188 = vector.extract_strided_slice %52 {offsets = [8, 24], sizes = [8, 8], strides = [1, 1]} : vector<16x32xf32> to vector<8x8xf32>
    %cst_82 = arith.constant dense<0.000000e+00> : vector<8x8xf32>
    %189 = tpu.matmul %186, %187, %cst_82 {dimension_numbers = #tpu.dot_dimension_numbers<[1], [1], [0], [0], [0, 0, 1, 0], [], []>} : vector<8x8xf32>, vector<8x8xf32>, vector<8x8xf32> -> vector<8x8xf32>
    %cst_83 = arith.constant 0.353553385 : f32
    %190 = vector.broadcast %cst_83 : f32 to vector<8x8xf32>
    %191 = arith.mulf %189, %190 : vector<8x8xf32>
    %cst_84 = arith.constant -1.000000e+30 : f32
    %192 = vector.broadcast %cst_84 : f32 to vector<8x8xf32>
    %193 = arith.select %15, %191, %192 : vector<8x8xi1>, vector<8x8xf32>
    %cst_85 = arith.constant dense<0xFF800000> : vector<8xf32>
    %194 = vector.multi_reduction <maximumf>, %193, %cst_85 [1] : vector<8x8xf32> to vector<8xf32>
    %195 = vector.shape_cast %194 : vector<8xf32> to vector<8x1xf32>
    %196 = vector.broadcast %195 : vector<8x1xf32> to vector<8x8xf32>
    %197 = arith.subf %193, %196 : vector<8x8xf32>
    %198 = math.exp %197 : vector<8x8xf32>
    %cst_86 = arith.constant dense<0.000000e+00> : vector<8xf32>
    %199 = vector.multi_reduction <add>, %198, %cst_86 [1] : vector<8x8xf32> to vector<8xf32>
    %200 = vector.shape_cast %199 : vector<8xf32> to vector<8x1xf32>
    %201 = vector.broadcast %200 : vector<8x1xf32> to vector<8x8xf32>
    %202 = arith.divf %198, %201 : vector<8x8xf32>
    %cst_87 = arith.constant dense<0.000000e+00> : vector<8x8xf32>
    %203 = tpu.matmul %202, %188, %cst_87 {dimension_numbers = #tpu.dot_dimension_numbers<[1], [0], [0], [1], [0, 0, 1, 1], [], []>} : vector<8x8xf32>, vector<8x8xf32>, vector<8x8xf32> -> vector<8x8xf32>
    %c8_88 = arith.constant 8 : index
    %c24_89 = arith.constant 24 : index
    %204 = vector.load %arg20[%c8_88, %c24_89] : memref<16x32xf32, #tpu.memory_space<vmem>>, vector<8x8xf32>
    tpu.vector_store %arg20[%c8_88, %c24_89], %203 {strides = array<i32>} : memref<16x32xf32, #tpu.memory_space<vmem>>, vector<8x8xf32>,
    %c0_90 = arith.constant 0 : index
    %c0_91 = arith.constant 0 : index
    %205 = vector.load %arg20[%c0_90, %c0_91] : memref<16x32xf32, #tpu.memory_space<vmem>>, vector<16x32xf32>
    %c0_92 = arith.constant 0 : index
    %c0_93 = arith.constant 0 : index
    %c0_94 = arith.constant 0 : index
    %c0_95 = arith.constant 0 : index
    %206 = vector.load %arg9[%c0_92, %c0_93, %c0_94, %c0_95] : memref<1x2x32x32xbf16, #tpu.memory_space<vmem>>, vector<1x1x32x32xbf16>
    %207 = vector.shape_cast %206 : vector<1x1x32x32xbf16> to vector<32x32xbf16>
    %c0_96 = arith.constant 0 : index
    %c0_97 = arith.constant 0 : index
    %c0_98 = arith.constant 0 : index
    %c0_99 = arith.constant 0 : index
    %208 = vector.load %arg10[%c0_96, %c0_97, %c0_98, %c0_99] : memref<1x2x1x32xf32, #tpu.memory_space<vmem>>, vector<1x1x1x32xf32>
    %209 = vector.shape_cast %208 : vector<1x1x1x32xf32> to vector<1x32xf32>
    %210 = arith.truncf %205 : vector<16x32xf32> to vector<16x32xbf16>
    %cst_100 = arith.constant dense<0.000000e+00> : vector<16x32xf32>
    %211 = tpu.matmul %210, %207, %cst_100 {dimension_numbers = #tpu.dot_dimension_numbers<[1], [0], [0], [1], [0, 0, 1, 1], [], []>} : vector<16x32xbf16>, vector<32x32xbf16>, vector<16x32xf32> -> vector<16x32xf32>
    %212 = vector.broadcast %209 : vector<1x32xf32> to vector<16x32xf32>
    %213 = arith.addf %211, %212 : vector<16x32xf32>
    %214 = arith.addf %12, %213 : vector<16x32xf32>
    %c0_101 = arith.constant 0 : index
    %c0_102 = arith.constant 0 : index
    %c0_103 = arith.constant 0 : index
    %c0_104 = arith.constant 0 : index
    %215 = vector.load %arg11[%c0_101, %c0_102, %c0_103, %c0_104] : memref<1x2x1x32xf32, #tpu.memory_space<vmem>>, vector<1x1x1x32xf32>
    %216 = vector.shape_cast %215 : vector<1x1x1x32xf32> to vector<1x32xf32>
    %c0_105 = arith.constant 0 : index
    %c0_106 = arith.constant 0 : index
    %c0_107 = arith.constant 0 : index
    %c0_108 = arith.constant 0 : index
    %217 = vector.load %arg12[%c0_105, %c0_106, %c0_107, %c0_108] : memref<1x2x1x32xf32, #tpu.memory_space<vmem>>, vector<1x1x1x32xf32>
    %218 = vector.shape_cast %217 : vector<1x1x1x32xf32> to vector<1x32xf32>
    %cst_109 = arith.constant dense<0.000000e+00> : vector<16xf32>
    %219 = vector.multi_reduction <add>, %214, %cst_109 [1] : vector<16x32xf32> to vector<16xf32>
    %220 = vector.shape_cast %219 : vector<16xf32> to vector<16x1xf32>
    %cst_110 = arith.constant 3.200000e+01 : f32
    %221 = vector.broadcast %cst_110 : f32 to vector<16x1xf32>
    %222 = arith.divf %220, %221 : vector<16x1xf32>
    %223 = vector.broadcast %222 : vector<16x1xf32> to vector<16x32xf32>
    %224 = arith.subf %214, %223 : vector<16x32xf32>
    %225 = arith.mulf %224, %224 : vector<16x32xf32>
    %cst_111 = arith.constant dense<0.000000e+00> : vector<16xf32>
    %226 = vector.multi_reduction <add>, %225, %cst_111 [1] : vector<16x32xf32> to vector<16xf32>
    %227 = vector.shape_cast %226 : vector<16xf32> to vector<16x1xf32>
    %cst_112 = arith.constant 3.200000e+01 : f32
    %228 = vector.broadcast %cst_112 : f32 to vector<16x1xf32>
    %229 = arith.divf %227, %228 : vector<16x1xf32>
    %230 = vector.broadcast %222 : vector<16x1xf32> to vector<16x32xf32>
    %231 = arith.subf %214, %230 : vector<16x32xf32>
    %cst_113 = arith.constant 9.99999974E-6 : f32
    %232 = vector.broadcast %cst_113 : f32 to vector<16x1xf32>
    %233 = arith.addf %229, %232 : vector<16x1xf32>
    %234 = math.rsqrt %233 : vector<16x1xf32>
    %235 = vector.broadcast %234 : vector<16x1xf32> to vector<16x32xf32>
    %236 = arith.mulf %231, %235 : vector<16x32xf32>
    %237 = vector.broadcast %216 : vector<1x32xf32> to vector<16x32xf32>
    %238 = arith.mulf %236, %237 : vector<16x32xf32>
    %239 = vector.broadcast %218 : vector<1x32xf32> to vector<16x32xf32>
    %240 = arith.addf %238, %239 : vector<16x32xf32>
    %c0_114 = arith.constant 0 : index
    %c0_115 = arith.constant 0 : index
    %c0_116 = arith.constant 0 : index
    %c0_117 = arith.constant 0 : index
    %241 = vector.load %arg13[%c0_114, %c0_115, %c0_116, %c0_117] : memref<1x2x32x128xbf16, #tpu.memory_space<vmem>>, vector<1x1x32x128xbf16>
    %242 = vector.shape_cast %241 : vector<1x1x32x128xbf16> to vector<32x128xbf16>
    %c0_118 = arith.constant 0 : index
    %c0_119 = arith.constant 0 : index
    %c0_120 = arith.constant 0 : index
    %c0_121 = arith.constant 0 : index
    %243 = vector.load %arg14[%c0_118, %c0_119, %c0_120, %c0_121] : memref<1x2x1x128xf32, #tpu.memory_space<vmem>>, vector<1x1x1x128xf32>
    %244 = vector.shape_cast %243 : vector<1x1x1x128xf32> to vector<1x128xf32>
    %245 = arith.truncf %240 : vector<16x32xf32> to vector<16x32xbf16>
    %cst_122 = arith.constant dense<0.000000e+00> : vector<16x128xf32>
    %246 = tpu.matmul %245, %242, %cst_122 {dimension_numbers = #tpu.dot_dimension_numbers<[1], [0], [0], [1], [0, 0, 1, 1], [], []>} : vector<16x32xbf16>, vector<32x128xbf16>, vector<16x128xf32> -> vector<16x128xf32>
    %247 = vector.broadcast %244 : vector<1x128xf32> to vector<16x128xf32>
    %248 = arith.addf %246, %247 : vector<16x128xf32>
    %249 = arith.mulf %248, %248 : vector<16x128xf32>
    %250 = arith.mulf %248, %249 : vector<16x128xf32>
    %cst_123 = arith.constant 4.471500e-02 : f32
    %251 = vector.broadcast %cst_123 : f32 to vector<16x128xf32>
    %252 = arith.mulf %251, %250 : vector<16x128xf32>
    %253 = arith.addf %248, %252 : vector<16x128xf32>
    %cst_124 = arith.constant 0.797884583 : f32
    %254 = vector.broadcast %cst_124 : f32 to vector<16x128xf32>
    %255 = arith.mulf %254, %253 : vector<16x128xf32>
    %256 = math.tanh %255 : vector<16x128xf32>
    %cst_125 = arith.constant 1.000000e+00 : f32
    %257 = vector.broadcast %cst_125 : f32 to vector<16x128xf32>
    %258 = arith.addf %257, %256 : vector<16x128xf32>
    %cst_126 = arith.constant 5.000000e-01 : f32
    %259 = vector.broadcast %cst_126 : f32 to vector<16x128xf32>
    %260 = arith.mulf %259, %258 : vector<16x128xf32>
    %261 = arith.mulf %248, %260 : vector<16x128xf32>
    %c0_127 = arith.constant 0 : index
    %c0_128 = arith.constant 0 : index
    %c0_129 = arith.constant 0 : index
    %c0_130 = arith.constant 0 : index
    %262 = vector.load %arg15[%c0_127, %c0_128, %c0_129, %c0_130] : memref<1x2x128x32xbf16, #tpu.memory_space<vmem>>, vector<1x1x128x32xbf16>
    %263 = vector.shape_cast %262 : vector<1x1x128x32xbf16> to vector<128x32xbf16>
    %c0_131 = arith.constant 0 : index
    %c0_132 = arith.constant 0 : index
    %c0_133 = arith.constant 0 : index
    %c0_134 = arith.constant 0 : index
    %264 = vector.load %arg16[%c0_131, %c0_132, %c0_133, %c0_134] : memref<1x2x1x32xf32, #tpu.memory_space<vmem>>, vector<1x1x1x32xf32>
    %265 = vector.shape_cast %264 : vector<1x1x1x32xf32> to vector<1x32xf32>
    %266 = arith.truncf %261 : vector<16x128xf32> to vector<16x128xbf16>
    %cst_135 = arith.constant dense<0.000000e+00> : vector<16x32xf32>
    %267 = tpu.matmul %266, %263, %cst_135 {dimension_numbers = #tpu.dot_dimension_numbers<[1], [0], [0], [1], [0, 0, 1, 1], [], []>} : vector<16x128xbf16>, vector<128x32xbf16>, vector<16x32xf32> -> vector<16x32xf32>
    %268 = vector.broadcast %265 : vector<1x32xf32> to vector<16x32xf32>
    %269 = arith.addf %267, %268 : vector<16x32xf32>
    %270 = arith.addf %214, %269 : vector<16x32xf32>
    %c0_136 = arith.constant 0 : index
    %c1 = arith.constant 1 : index
    %c0_137 = arith.constant 0 : index
    %c0_138 = arith.constant 0 : index
    %271 = vector.load %arg5[%c0_136, %c1, %c0_137, %c0_138] : memref<1x2x1x32xf32, #tpu.memory_space<vmem>>, vector<1x1x1x32xf32>
    %272 = vector.shape_cast %271 : vector<1x1x1x32xf32> to vector<1x32xf32>
    %c0_139 = arith.constant 0 : index
    %c1_140 = arith.constant 1 : index
    %c0_141 = arith.constant 0 : index
    %c0_142 = arith.constant 0 : index
    %273 = vector.load %arg6[%c0_139, %c1_140, %c0_141, %c0_142] : memref<1x2x1x32xf32, #tpu.memory_space<vmem>>, vector<1x1x1x32xf32>
    %274 = vector.shape_cast %273 : vector<1x1x1x32xf32> to vector<1x32xf32>
    %cst_143 = arith.constant dense<0.000000e+00> : vector<16xf32>
    %275 = vector.multi_reduction <add>, %270, %cst_143 [1] : vector<16x32xf32> to vector<16xf32>
    %276 = vector.shape_cast %275 : vector<16xf32> to vector<16x1xf32>
    %cst_144 = arith.constant 3.200000e+01 : f32
    %277 = vector.broadcast %cst_144 : f32 to vector<16x1xf32>
    %278 = arith.divf %276, %277 : vector<16x1xf32>
    %279 = vector.broadcast %278 : vector<16x1xf32> to vector<16x32xf32>
    %280 = arith.subf %270, %279 : vector<16x32xf32>
    %281 = arith.mulf %280, %280 : vector<16x32xf32>
    %cst_145 = arith.constant dense<0.000000e+00> : vector<16xf32>
    %282 = vector.multi_reduction <add>, %281, %cst_145 [1] : vector<16x32xf32> to vector<16xf32>
    %283 = vector.shape_cast %282 : vector<16xf32> to vector<16x1xf32>
    %cst_146 = arith.constant 3.200000e+01 : f32
    %284 = vector.broadcast %cst_146 : f32 to vector<16x1xf32>
    %285 = arith.divf %283, %284 : vector<16x1xf32>
    %286 = vector.broadcast %278 : vector<16x1xf32> to vector<16x32xf32>
    %287 = arith.subf %270, %286 : vector<16x32xf32>
    %cst_147 = arith.constant 9.99999974E-6 : f32
    %288 = vector.broadcast %cst_147 : f32 to vector<16x1xf32>
    %289 = arith.addf %285, %288 : vector<16x1xf32>
    %290 = math.rsqrt %289 : vector<16x1xf32>
    %291 = vector.broadcast %290 : vector<16x1xf32> to vector<16x32xf32>
    %292 = arith.mulf %287, %291 : vector<16x32xf32>
    %293 = vector.broadcast %272 : vector<1x32xf32> to vector<16x32xf32>
    %294 = arith.mulf %292, %293 : vector<16x32xf32>
    %295 = vector.broadcast %274 : vector<1x32xf32> to vector<16x32xf32>
    %296 = arith.addf %294, %295 : vector<16x32xf32>
    %c0_148 = arith.constant 0 : index
    %c1_149 = arith.constant 1 : index
    %c0_150 = arith.constant 0 : index
    %c0_151 = arith.constant 0 : index
    %297 = vector.load %arg7[%c0_148, %c1_149, %c0_150, %c0_151] : memref<1x2x32x96xbf16, #tpu.memory_space<vmem>>, vector<1x1x32x96xbf16>
    %298 = vector.shape_cast %297 : vector<1x1x32x96xbf16> to vector<32x96xbf16>
    %c0_152 = arith.constant 0 : index
    %c1_153 = arith.constant 1 : index
    %c0_154 = arith.constant 0 : index
    %c0_155 = arith.constant 0 : index
    %299 = vector.load %arg8[%c0_152, %c1_153, %c0_154, %c0_155] : memref<1x2x1x96xf32, #tpu.memory_space<vmem>>, vector<1x1x1x96xf32>
    %300 = vector.shape_cast %299 : vector<1x1x1x96xf32> to vector<1x96xf32>
    %301 = arith.truncf %296 : vector<16x32xf32> to vector<16x32xbf16>
    %cst_156 = arith.constant dense<0.000000e+00> : vector<16x96xf32>
    %302 = tpu.matmul %301, %298, %cst_156 {dimension_numbers = #tpu.dot_dimension_numbers<[1], [0], [0], [1], [0, 0, 1, 1], [], []>} : vector<16x32xbf16>, vector<32x96xbf16>, vector<16x96xf32> -> vector<16x96xf32>
    %303 = vector.broadcast %300 : vector<1x96xf32> to vector<16x96xf32>
    %304 = arith.addf %302, %303 : vector<16x96xf32>
    %305 = vector.extract_strided_slice %304 {offsets = [0, 0], sizes = [16, 32], strides = [1, 1]} : vector<16x96xf32> to vector<16x32xf32>
    %306 = vector.extract_strided_slice %304 {offsets = [0, 32], sizes = [16, 32], strides = [1, 1]} : vector<16x96xf32> to vector<16x32xf32>
    %307 = vector.extract_strided_slice %304 {offsets = [0, 64], sizes = [16, 32], strides = [1, 1]} : vector<16x96xf32> to vector<16x32xf32>
    %308 = vector.extract_strided_slice %305 {offsets = [0, 0], sizes = [8, 8], strides = [1, 1]} : vector<16x32xf32> to vector<8x8xf32>
    %309 = vector.extract_strided_slice %306 {offsets = [0, 0], sizes = [8, 8], strides = [1, 1]} : vector<16x32xf32> to vector<8x8xf32>
    %310 = vector.extract_strided_slice %307 {offsets = [0, 0], sizes = [8, 8], strides = [1, 1]} : vector<16x32xf32> to vector<8x8xf32>
    %cst_157 = arith.constant dense<0.000000e+00> : vector<8x8xf32>
    %311 = tpu.matmul %308, %309, %cst_157 {dimension_numbers = #tpu.dot_dimension_numbers<[1], [1], [0], [0], [0, 0, 1, 0], [], []>} : vector<8x8xf32>, vector<8x8xf32>, vector<8x8xf32> -> vector<8x8xf32>
    %cst_158 = arith.constant 0.353553385 : f32
    %312 = vector.broadcast %cst_158 : f32 to vector<8x8xf32>
    %313 = arith.mulf %311, %312 : vector<8x8xf32>
    %cst_159 = arith.constant -1.000000e+30 : f32
    %314 = vector.broadcast %cst_159 : f32 to vector<8x8xf32>
    %315 = arith.select %15, %313, %314 : vector<8x8xi1>, vector<8x8xf32>
    %cst_160 = arith.constant dense<0xFF800000> : vector<8xf32>
    %316 = vector.multi_reduction <maximumf>, %315, %cst_160 [1] : vector<8x8xf32> to vector<8xf32>
    %317 = vector.shape_cast %316 : vector<8xf32> to vector<8x1xf32>
    %318 = vector.broadcast %317 : vector<8x1xf32> to vector<8x8xf32>
    %319 = arith.subf %315, %318 : vector<8x8xf32>
    %320 = math.exp %319 : vector<8x8xf32>
    %cst_161 = arith.constant dense<0.000000e+00> : vector<8xf32>
    %321 = vector.multi_reduction <add>, %320, %cst_161 [1] : vector<8x8xf32> to vector<8xf32>
    %322 = vector.shape_cast %321 : vector<8xf32> to vector<8x1xf32>
    %323 = vector.broadcast %322 : vector<8x1xf32> to vector<8x8xf32>
    %324 = arith.divf %320, %323 : vector<8x8xf32>
    %cst_162 = arith.constant dense<0.000000e+00> : vector<8x8xf32>
    %325 = tpu.matmul %324, %310, %cst_162 {dimension_numbers = #tpu.dot_dimension_numbers<[1], [0], [0], [1], [0, 0, 1, 1], [], []>} : vector<8x8xf32>, vector<8x8xf32>, vector<8x8xf32> -> vector<8x8xf32>
    %c0_163 = arith.constant 0 : index
    %c0_164 = arith.constant 0 : index
    %326 = vector.load %arg20[%c0_163, %c0_164] : memref<16x32xf32, #tpu.memory_space<vmem>>, vector<8x8xf32>
    tpu.vector_store %arg20[%c0_163, %c0_164], %325 {strides = array<i32>} : memref<16x32xf32, #tpu.memory_space<vmem>>, vector<8x8xf32>,
    %327 = vector.extract_strided_slice %305 {offsets = [0, 8], sizes = [8, 8], strides = [1, 1]} : vector<16x32xf32> to vector<8x8xf32>
    %328 = vector.extract_strided_slice %306 {offsets = [0, 8], sizes = [8, 8], strides = [1, 1]} : vector<16x32xf32> to vector<8x8xf32>
    %329 = vector.extract_strided_slice %307 {offsets = [0, 8], sizes = [8, 8], strides = [1, 1]} : vector<16x32xf32> to vector<8x8xf32>
    %cst_165 = arith.constant dense<0.000000e+00> : vector<8x8xf32>
    %330 = tpu.matmul %327, %328, %cst_165 {dimension_numbers = #tpu.dot_dimension_numbers<[1], [1], [0], [0], [0, 0, 1, 0], [], []>} : vector<8x8xf32>, vector<8x8xf32>, vector<8x8xf32> -> vector<8x8xf32>
    %cst_166 = arith.constant 0.353553385 : f32
    %331 = vector.broadcast %cst_166 : f32 to vector<8x8xf32>
    %332 = arith.mulf %330, %331 : vector<8x8xf32>
    %cst_167 = arith.constant -1.000000e+30 : f32
    %333 = vector.broadcast %cst_167 : f32 to vector<8x8xf32>
    %334 = arith.select %15, %332, %333 : vector<8x8xi1>, vector<8x8xf32>
    %cst_168 = arith.constant dense<0xFF800000> : vector<8xf32>
    %335 = vector.multi_reduction <maximumf>, %334, %cst_168 [1] : vector<8x8xf32> to vector<8xf32>
    %336 = vector.shape_cast %335 : vector<8xf32> to vector<8x1xf32>
    %337 = vector.broadcast %336 : vector<8x1xf32> to vector<8x8xf32>
    %338 = arith.subf %334, %337 : vector<8x8xf32>
    %339 = math.exp %338 : vector<8x8xf32>
    %cst_169 = arith.constant dense<0.000000e+00> : vector<8xf32>
    %340 = vector.multi_reduction <add>, %339, %cst_169 [1] : vector<8x8xf32> to vector<8xf32>
    %341 = vector.shape_cast %340 : vector<8xf32> to vector<8x1xf32>
    %342 = vector.broadcast %341 : vector<8x1xf32> to vector<8x8xf32>
    %343 = arith.divf %339, %342 : vector<8x8xf32>
    %cst_170 = arith.constant dense<0.000000e+00> : vector<8x8xf32>
    %344 = tpu.matmul %343, %329, %cst_170 {dimension_numbers = #tpu.dot_dimension_numbers<[1], [0], [0], [1], [0, 0, 1, 1], [], []>} : vector<8x8xf32>, vector<8x8xf32>, vector<8x8xf32> -> vector<8x8xf32>
    %c0_171 = arith.constant 0 : index
    %c8_172 = arith.constant 8 : index
    %345 = vector.load %arg20[%c0_171, %c8_172] : memref<16x32xf32, #tpu.memory_space<vmem>>, vector<8x8xf32>
    tpu.vector_store %arg20[%c0_171, %c8_172], %344 {strides = array<i32>} : memref<16x32xf32, #tpu.memory_space<vmem>>, vector<8x8xf32>,
    %346 = vector.extract_strided_slice %305 {offsets = [0, 16], sizes = [8, 8], strides = [1, 1]} : vector<16x32xf32> to vector<8x8xf32>
    %347 = vector.extract_strided_slice %306 {offsets = [0, 16], sizes = [8, 8], strides = [1, 1]} : vector<16x32xf32> to vector<8x8xf32>
    %348 = vector.extract_strided_slice %307 {offsets = [0, 16], sizes = [8, 8], strides = [1, 1]} : vector<16x32xf32> to vector<8x8xf32>
    %cst_173 = arith.constant dense<0.000000e+00> : vector<8x8xf32>
    %349 = tpu.matmul %346, %347, %cst_173 {dimension_numbers = #tpu.dot_dimension_numbers<[1], [1], [0], [0], [0, 0, 1, 0], [], []>} : vector<8x8xf32>, vector<8x8xf32>, vector<8x8xf32> -> vector<8x8xf32>
    %cst_174 = arith.constant 0.353553385 : f32
    %350 = vector.broadcast %cst_174 : f32 to vector<8x8xf32>
    %351 = arith.mulf %349, %350 : vector<8x8xf32>
    %cst_175 = arith.constant -1.000000e+30 : f32
    %352 = vector.broadcast %cst_175 : f32 to vector<8x8xf32>
    %353 = arith.select %15, %351, %352 : vector<8x8xi1>, vector<8x8xf32>
    %cst_176 = arith.constant dense<0xFF800000> : vector<8xf32>
    %354 = vector.multi_reduction <maximumf>, %353, %cst_176 [1] : vector<8x8xf32> to vector<8xf32>
    %355 = vector.shape_cast %354 : vector<8xf32> to vector<8x1xf32>
    %356 = vector.broadcast %355 : vector<8x1xf32> to vector<8x8xf32>
    %357 = arith.subf %353, %356 : vector<8x8xf32>
    %358 = math.exp %357 : vector<8x8xf32>
    %cst_177 = arith.constant dense<0.000000e+00> : vector<8xf32>
    %359 = vector.multi_reduction <add>, %358, %cst_177 [1] : vector<8x8xf32> to vector<8xf32>
    %360 = vector.shape_cast %359 : vector<8xf32> to vector<8x1xf32>
    %361 = vector.broadcast %360 : vector<8x1xf32> to vector<8x8xf32>
    %362 = arith.divf %358, %361 : vector<8x8xf32>
    %cst_178 = arith.constant dense<0.000000e+00> : vector<8x8xf32>
    %363 = tpu.matmul %362, %348, %cst_178 {dimension_numbers = #tpu.dot_dimension_numbers<[1], [0], [0], [1], [0, 0, 1, 1], [], []>} : vector<8x8xf32>, vector<8x8xf32>, vector<8x8xf32> -> vector<8x8xf32>
    %c0_179 = arith.constant 0 : index
    %c16_180 = arith.constant 16 : index
    %364 = vector.load %arg20[%c0_179, %c16_180] : memref<16x32xf32, #tpu.memory_space<vmem>>, vector<8x8xf32>
    tpu.vector_store %arg20[%c0_179, %c16_180], %363 {strides = array<i32>} : memref<16x32xf32, #tpu.memory_space<vmem>>, vector<8x8xf32>,
    %365 = vector.extract_strided_slice %305 {offsets = [0, 24], sizes = [8, 8], strides = [1, 1]} : vector<16x32xf32> to vector<8x8xf32>
    %366 = vector.extract_strided_slice %306 {offsets = [0, 24], sizes = [8, 8], strides = [1, 1]} : vector<16x32xf32> to vector<8x8xf32>
    %367 = vector.extract_strided_slice %307 {offsets = [0, 24], sizes = [8, 8], strides = [1, 1]} : vector<16x32xf32> to vector<8x8xf32>
    %cst_181 = arith.constant dense<0.000000e+00> : vector<8x8xf32>
    %368 = tpu.matmul %365, %366, %cst_181 {dimension_numbers = #tpu.dot_dimension_numbers<[1], [1], [0], [0], [0, 0, 1, 0], [], []>} : vector<8x8xf32>, vector<8x8xf32>, vector<8x8xf32> -> vector<8x8xf32>
    %cst_182 = arith.constant 0.353553385 : f32
    %369 = vector.broadcast %cst_182 : f32 to vector<8x8xf32>
    %370 = arith.mulf %368, %369 : vector<8x8xf32>
    %cst_183 = arith.constant -1.000000e+30 : f32
    %371 = vector.broadcast %cst_183 : f32 to vector<8x8xf32>
    %372 = arith.select %15, %370, %371 : vector<8x8xi1>, vector<8x8xf32>
    %cst_184 = arith.constant dense<0xFF800000> : vector<8xf32>
    %373 = vector.multi_reduction <maximumf>, %372, %cst_184 [1] : vector<8x8xf32> to vector<8xf32>
    %374 = vector.shape_cast %373 : vector<8xf32> to vector<8x1xf32>
    %375 = vector.broadcast %374 : vector<8x1xf32> to vector<8x8xf32>
    %376 = arith.subf %372, %375 : vector<8x8xf32>
    %377 = math.exp %376 : vector<8x8xf32>
    %cst_185 = arith.constant dense<0.000000e+00> : vector<8xf32>
    %378 = vector.multi_reduction <add>, %377, %cst_185 [1] : vector<8x8xf32> to vector<8xf32>
    %379 = vector.shape_cast %378 : vector<8xf32> to vector<8x1xf32>
    %380 = vector.broadcast %379 : vector<8x1xf32> to vector<8x8xf32>
    %381 = arith.divf %377, %380 : vector<8x8xf32>
    %cst_186 = arith.constant dense<0.000000e+00> : vector<8x8xf32>
    %382 = tpu.matmul %381, %367, %cst_186 {dimension_numbers = #tpu.dot_dimension_numbers<[1], [0], [0], [1], [0, 0, 1, 1], [], []>} : vector<8x8xf32>, vector<8x8xf32>, vector<8x8xf32> -> vector<8x8xf32>
    %c0_187 = arith.constant 0 : index
    %c24_188 = arith.constant 24 : index
    %383 = vector.load %arg20[%c0_187, %c24_188] : memref<16x32xf32, #tpu.memory_space<vmem>>, vector<8x8xf32>
    tpu.vector_store %arg20[%c0_187, %c24_188], %382 {strides = array<i32>} : memref<16x32xf32, #tpu.memory_space<vmem>>, vector<8x8xf32>,
    %384 = vector.extract_strided_slice %305 {offsets = [8, 0], sizes = [8, 8], strides = [1, 1]} : vector<16x32xf32> to vector<8x8xf32>
    %385 = vector.extract_strided_slice %306 {offsets = [8, 0], sizes = [8, 8], strides = [1, 1]} : vector<16x32xf32> to vector<8x8xf32>
    %386 = vector.extract_strided_slice %307 {offsets = [8, 0], sizes = [8, 8], strides = [1, 1]} : vector<16x32xf32> to vector<8x8xf32>
    %cst_189 = arith.constant dense<0.000000e+00> : vector<8x8xf32>
    %387 = tpu.matmul %384, %385, %cst_189 {dimension_numbers = #tpu.dot_dimension_numbers<[1], [1], [0], [0], [0, 0, 1, 0], [], []>} : vector<8x8xf32>, vector<8x8xf32>, vector<8x8xf32> -> vector<8x8xf32>
    %cst_190 = arith.constant 0.353553385 : f32
    %388 = vector.broadcast %cst_190 : f32 to vector<8x8xf32>
    %389 = arith.mulf %387, %388 : vector<8x8xf32>
    %cst_191 = arith.constant -1.000000e+30 : f32
    %390 = vector.broadcast %cst_191 : f32 to vector<8x8xf32>
    %391 = arith.select %15, %389, %390 : vector<8x8xi1>, vector<8x8xf32>
    %cst_192 = arith.constant dense<0xFF800000> : vector<8xf32>
    %392 = vector.multi_reduction <maximumf>, %391, %cst_192 [1] : vector<8x8xf32> to vector<8xf32>
    %393 = vector.shape_cast %392 : vector<8xf32> to vector<8x1xf32>
    %394 = vector.broadcast %393 : vector<8x1xf32> to vector<8x8xf32>
    %395 = arith.subf %391, %394 : vector<8x8xf32>
    %396 = math.exp %395 : vector<8x8xf32>
    %cst_193 = arith.constant dense<0.000000e+00> : vector<8xf32>
    %397 = vector.multi_reduction <add>, %396, %cst_193 [1] : vector<8x8xf32> to vector<8xf32>
    %398 = vector.shape_cast %397 : vector<8xf32> to vector<8x1xf32>
    %399 = vector.broadcast %398 : vector<8x1xf32> to vector<8x8xf32>
    %400 = arith.divf %396, %399 : vector<8x8xf32>
    %cst_194 = arith.constant dense<0.000000e+00> : vector<8x8xf32>
    %401 = tpu.matmul %400, %386, %cst_194 {dimension_numbers = #tpu.dot_dimension_numbers<[1], [0], [0], [1], [0, 0, 1, 1], [], []>} : vector<8x8xf32>, vector<8x8xf32>, vector<8x8xf32> -> vector<8x8xf32>
    %c8_195 = arith.constant 8 : index
    %c0_196 = arith.constant 0 : index
    %402 = vector.load %arg20[%c8_195, %c0_196] : memref<16x32xf32, #tpu.memory_space<vmem>>, vector<8x8xf32>
    tpu.vector_store %arg20[%c8_195, %c0_196], %401 {strides = array<i32>} : memref<16x32xf32, #tpu.memory_space<vmem>>, vector<8x8xf32>,
    %403 = vector.extract_strided_slice %305 {offsets = [8, 8], sizes = [8, 8], strides = [1, 1]} : vector<16x32xf32> to vector<8x8xf32>
    %404 = vector.extract_strided_slice %306 {offsets = [8, 8], sizes = [8, 8], strides = [1, 1]} : vector<16x32xf32> to vector<8x8xf32>
    %405 = vector.extract_strided_slice %307 {offsets = [8, 8], sizes = [8, 8], strides = [1, 1]} : vector<16x32xf32> to vector<8x8xf32>
    %cst_197 = arith.constant dense<0.000000e+00> : vector<8x8xf32>
    %406 = tpu.matmul %403, %404, %cst_197 {dimension_numbers = #tpu.dot_dimension_numbers<[1], [1], [0], [0], [0, 0, 1, 0], [], []>} : vector<8x8xf32>, vector<8x8xf32>, vector<8x8xf32> -> vector<8x8xf32>
    %cst_198 = arith.constant 0.353553385 : f32
    %407 = vector.broadcast %cst_198 : f32 to vector<8x8xf32>
    %408 = arith.mulf %406, %407 : vector<8x8xf32>
    %cst_199 = arith.constant -1.000000e+30 : f32
    %409 = vector.broadcast %cst_199 : f32 to vector<8x8xf32>
    %410 = arith.select %15, %408, %409 : vector<8x8xi1>, vector<8x8xf32>
    %cst_200 = arith.constant dense<0xFF800000> : vector<8xf32>
    %411 = vector.multi_reduction <maximumf>, %410, %cst_200 [1] : vector<8x8xf32> to vector<8xf32>
    %412 = vector.shape_cast %411 : vector<8xf32> to vector<8x1xf32>
    %413 = vector.broadcast %412 : vector<8x1xf32> to vector<8x8xf32>
    %414 = arith.subf %410, %413 : vector<8x8xf32>
    %415 = math.exp %414 : vector<8x8xf32>
    %cst_201 = arith.constant dense<0.000000e+00> : vector<8xf32>
    %416 = vector.multi_reduction <add>, %415, %cst_201 [1] : vector<8x8xf32> to vector<8xf32>
    %417 = vector.shape_cast %416 : vector<8xf32> to vector<8x1xf32>
    %418 = vector.broadcast %417 : vector<8x1xf32> to vector<8x8xf32>
    %419 = arith.divf %415, %418 : vector<8x8xf32>
    %cst_202 = arith.constant dense<0.000000e+00> : vector<8x8xf32>
    %420 = tpu.matmul %419, %405, %cst_202 {dimension_numbers = #tpu.dot_dimension_numbers<[1], [0], [0], [1], [0, 0, 1, 1], [], []>} : vector<8x8xf32>, vector<8x8xf32>, vector<8x8xf32> -> vector<8x8xf32>
    %c8_203 = arith.constant 8 : index
    %c8_204 = arith.constant 8 : index
    %421 = vector.load %arg20[%c8_203, %c8_204] : memref<16x32xf32, #tpu.memory_space<vmem>>, vector<8x8xf32>
    tpu.vector_store %arg20[%c8_203, %c8_204], %420 {strides = array<i32>} : memref<16x32xf32, #tpu.memory_space<vmem>>, vector<8x8xf32>,
    %422 = vector.extract_strided_slice %305 {offsets = [8, 16], sizes = [8, 8], strides = [1, 1]} : vector<16x32xf32> to vector<8x8xf32>
    %423 = vector.extract_strided_slice %306 {offsets = [8, 16], sizes = [8, 8], strides = [1, 1]} : vector<16x32xf32> to vector<8x8xf32>
    %424 = vector.extract_strided_slice %307 {offsets = [8, 16], sizes = [8, 8], strides = [1, 1]} : vector<16x32xf32> to vector<8x8xf32>
    %cst_205 = arith.constant dense<0.000000e+00> : vector<8x8xf32>
    %425 = tpu.matmul %422, %423, %cst_205 {dimension_numbers = #tpu.dot_dimension_numbers<[1], [1], [0], [0], [0, 0, 1, 0], [], []>} : vector<8x8xf32>, vector<8x8xf32>, vector<8x8xf32> -> vector<8x8xf32>
    %cst_206 = arith.constant 0.353553385 : f32
    %426 = vector.broadcast %cst_206 : f32 to vector<8x8xf32>
    %427 = arith.mulf %425, %426 : vector<8x8xf32>
    %cst_207 = arith.constant -1.000000e+30 : f32
    %428 = vector.broadcast %cst_207 : f32 to vector<8x8xf32>
    %429 = arith.select %15, %427, %428 : vector<8x8xi1>, vector<8x8xf32>
    %cst_208 = arith.constant dense<0xFF800000> : vector<8xf32>
    %430 = vector.multi_reduction <maximumf>, %429, %cst_208 [1] : vector<8x8xf32> to vector<8xf32>
    %431 = vector.shape_cast %430 : vector<8xf32> to vector<8x1xf32>
    %432 = vector.broadcast %431 : vector<8x1xf32> to vector<8x8xf32>
    %433 = arith.subf %429, %432 : vector<8x8xf32>
    %434 = math.exp %433 : vector<8x8xf32>
    %cst_209 = arith.constant dense<0.000000e+00> : vector<8xf32>
    %435 = vector.multi_reduction <add>, %434, %cst_209 [1] : vector<8x8xf32> to vector<8xf32>
    %436 = vector.shape_cast %435 : vector<8xf32> to vector<8x1xf32>
    %437 = vector.broadcast %436 : vector<8x1xf32> to vector<8x8xf32>
    %438 = arith.divf %434, %437 : vector<8x8xf32>
    %cst_210 = arith.constant dense<0.000000e+00> : vector<8x8xf32>
    %439 = tpu.matmul %438, %424, %cst_210 {dimension_numbers = #tpu.dot_dimension_numbers<[1], [0], [0], [1], [0, 0, 1, 1], [], []>} : vector<8x8xf32>, vector<8x8xf32>, vector<8x8xf32> -> vector<8x8xf32>
    %c8_211 = arith.constant 8 : index
    %c16_212 = arith.constant 16 : index
    %440 = vector.load %arg20[%c8_211, %c16_212] : memref<16x32xf32, #tpu.memory_space<vmem>>, vector<8x8xf32>
    tpu.vector_store %arg20[%c8_211, %c16_212], %439 {strides = array<i32>} : memref<16x32xf32, #tpu.memory_space<vmem>>, vector<8x8xf32>,
    %441 = vector.extract_strided_slice %305 {offsets = [8, 24], sizes = [8, 8], strides = [1, 1]} : vector<16x32xf32> to vector<8x8xf32>
    %442 = vector.extract_strided_slice %306 {offsets = [8, 24], sizes = [8, 8], strides = [1, 1]} : vector<16x32xf32> to vector<8x8xf32>
    %443 = vector.extract_strided_slice %307 {offsets = [8, 24], sizes = [8, 8], strides = [1, 1]} : vector<16x32xf32> to vector<8x8xf32>
    %cst_213 = arith.constant dense<0.000000e+00> : vector<8x8xf32>
    %444 = tpu.matmul %441, %442, %cst_213 {dimension_numbers = #tpu.dot_dimension_numbers<[1], [1], [0], [0], [0, 0, 1, 0], [], []>} : vector<8x8xf32>, vector<8x8xf32>, vector<8x8xf32> -> vector<8x8xf32>
    %cst_214 = arith.constant 0.353553385 : f32
    %445 = vector.broadcast %cst_214 : f32 to vector<8x8xf32>
    %446 = arith.mulf %444, %445 : vector<8x8xf32>
    %cst_215 = arith.constant -1.000000e+30 : f32
    %447 = vector.broadcast %cst_215 : f32 to vector<8x8xf32>
    %448 = arith.select %15, %446, %447 : vector<8x8xi1>, vector<8x8xf32>
    %cst_216 = arith.constant dense<0xFF800000> : vector<8xf32>
    %449 = vector.multi_reduction <maximumf>, %448, %cst_216 [1] : vector<8x8xf32> to vector<8xf32>
    %450 = vector.shape_cast %449 : vector<8xf32> to vector<8x1xf32>
    %451 = vector.broadcast %450 : vector<8x1xf32> to vector<8x8xf32>
    %452 = arith.subf %448, %451 : vector<8x8xf32>
    %453 = math.exp %452 : vector<8x8xf32>
    %cst_217 = arith.constant dense<0.000000e+00> : vector<8xf32>
    %454 = vector.multi_reduction <add>, %453, %cst_217 [1] : vector<8x8xf32> to vector<8xf32>
    %455 = vector.shape_cast %454 : vector<8xf32> to vector<8x1xf32>
    %456 = vector.broadcast %455 : vector<8x1xf32> to vector<8x8xf32>
    %457 = arith.divf %453, %456 : vector<8x8xf32>
    %cst_218 = arith.constant dense<0.000000e+00> : vector<8x8xf32>
    %458 = tpu.matmul %457, %443, %cst_218 {dimension_numbers = #tpu.dot_dimension_numbers<[1], [0], [0], [1], [0, 0, 1, 1], [], []>} : vector<8x8xf32>, vector<8x8xf32>, vector<8x8xf32> -> vector<8x8xf32>
    %c8_219 = arith.constant 8 : index
    %c24_220 = arith.constant 24 : index
    %459 = vector.load %arg20[%c8_219, %c24_220] : memref<16x32xf32, #tpu.memory_space<vmem>>, vector<8x8xf32>
    tpu.vector_store %arg20[%c8_219, %c24_220], %458 {strides = array<i32>} : memref<16x32xf32, #tpu.memory_space<vmem>>, vector<8x8xf32>,
    %c0_221 = arith.constant 0 : index
    %c0_222 = arith.constant 0 : index
    %460 = vector.load %arg20[%c0_221, %c0_222] : memref<16x32xf32, #tpu.memory_space<vmem>>, vector<16x32xf32>
    %c0_223 = arith.constant 0 : index
    %c1_224 = arith.constant 1 : index
    %c0_225 = arith.constant 0 : index
    %c0_226 = arith.constant 0 : index
    %461 = vector.load %arg9[%c0_223, %c1_224, %c0_225, %c0_226] : memref<1x2x32x32xbf16, #tpu.memory_space<vmem>>, vector<1x1x32x32xbf16>
    %462 = vector.shape_cast %461 : vector<1x1x32x32xbf16> to vector<32x32xbf16>
    %c0_227 = arith.constant 0 : index
    %c1_228 = arith.constant 1 : index
    %c0_229 = arith.constant 0 : index
    %c0_230 = arith.constant 0 : index
    %463 = vector.load %arg10[%c0_227, %c1_228, %c0_229, %c0_230] : memref<1x2x1x32xf32, #tpu.memory_space<vmem>>, vector<1x1x1x32xf32>
    %464 = vector.shape_cast %463 : vector<1x1x1x32xf32> to vector<1x32xf32>
    %465 = arith.truncf %460 : vector<16x32xf32> to vector<16x32xbf16>
    %cst_231 = arith.constant dense<0.000000e+00> : vector<16x32xf32>
    %466 = tpu.matmul %465, %462, %cst_231 {dimension_numbers = #tpu.dot_dimension_numbers<[1], [0], [0], [1], [0, 0, 1, 1], [], []>} : vector<16x32xbf16>, vector<32x32xbf16>, vector<16x32xf32> -> vector<16x32xf32>
    %467 = vector.broadcast %464 : vector<1x32xf32> to vector<16x32xf32>
    %468 = arith.addf %466, %467 : vector<16x32xf32>
    %469 = arith.addf %270, %468 : vector<16x32xf32>
    %c0_232 = arith.constant 0 : index
    %c1_233 = arith.constant 1 : index
    %c0_234 = arith.constant 0 : index
    %c0_235 = arith.constant 0 : index
    %470 = vector.load %arg11[%c0_232, %c1_233, %c0_234, %c0_235] : memref<1x2x1x32xf32, #tpu.memory_space<vmem>>, vector<1x1x1x32xf32>
    %471 = vector.shape_cast %470 : vector<1x1x1x32xf32> to vector<1x32xf32>
    %c0_236 = arith.constant 0 : index
    %c1_237 = arith.constant 1 : index
    %c0_238 = arith.constant 0 : index
    %c0_239 = arith.constant 0 : index
    %472 = vector.load %arg12[%c0_236, %c1_237, %c0_238, %c0_239] : memref<1x2x1x32xf32, #tpu.memory_space<vmem>>, vector<1x1x1x32xf32>
    %473 = vector.shape_cast %472 : vector<1x1x1x32xf32> to vector<1x32xf32>
    %cst_240 = arith.constant dense<0.000000e+00> : vector<16xf32>
    %474 = vector.multi_reduction <add>, %469, %cst_240 [1] : vector<16x32xf32> to vector<16xf32>
    %475 = vector.shape_cast %474 : vector<16xf32> to vector<16x1xf32>
    %cst_241 = arith.constant 3.200000e+01 : f32
    %476 = vector.broadcast %cst_241 : f32 to vector<16x1xf32>
    %477 = arith.divf %475, %476 : vector<16x1xf32>
    %478 = vector.broadcast %477 : vector<16x1xf32> to vector<16x32xf32>
    %479 = arith.subf %469, %478 : vector<16x32xf32>
    %480 = arith.mulf %479, %479 : vector<16x32xf32>
    %cst_242 = arith.constant dense<0.000000e+00> : vector<16xf32>
    %481 = vector.multi_reduction <add>, %480, %cst_242 [1] : vector<16x32xf32> to vector<16xf32>
    %482 = vector.shape_cast %481 : vector<16xf32> to vector<16x1xf32>
    %cst_243 = arith.constant 3.200000e+01 : f32
    %483 = vector.broadcast %cst_243 : f32 to vector<16x1xf32>
    %484 = arith.divf %482, %483 : vector<16x1xf32>
    %485 = vector.broadcast %477 : vector<16x1xf32> to vector<16x32xf32>
    %486 = arith.subf %469, %485 : vector<16x32xf32>
    %cst_244 = arith.constant 9.99999974E-6 : f32
    %487 = vector.broadcast %cst_244 : f32 to vector<16x1xf32>
    %488 = arith.addf %484, %487 : vector<16x1xf32>
    %489 = math.rsqrt %488 : vector<16x1xf32>
    %490 = vector.broadcast %489 : vector<16x1xf32> to vector<16x32xf32>
    %491 = arith.mulf %486, %490 : vector<16x32xf32>
    %492 = vector.broadcast %471 : vector<1x32xf32> to vector<16x32xf32>
    %493 = arith.mulf %491, %492 : vector<16x32xf32>
    %494 = vector.broadcast %473 : vector<1x32xf32> to vector<16x32xf32>
    %495 = arith.addf %493, %494 : vector<16x32xf32>
    %c0_245 = arith.constant 0 : index
    %c1_246 = arith.constant 1 : index
    %c0_247 = arith.constant 0 : index
    %c0_248 = arith.constant 0 : index
    %496 = vector.load %arg13[%c0_245, %c1_246, %c0_247, %c0_248] : memref<1x2x32x128xbf16, #tpu.memory_space<vmem>>, vector<1x1x32x128xbf16>
    %497 = vector.shape_cast %496 : vector<1x1x32x128xbf16> to vector<32x128xbf16>
    %c0_249 = arith.constant 0 : index
    %c1_250 = arith.constant 1 : index
    %c0_251 = arith.constant 0 : index
    %c0_252 = arith.constant 0 : index
    %498 = vector.load %arg14[%c0_249, %c1_250, %c0_251, %c0_252] : memref<1x2x1x128xf32, #tpu.memory_space<vmem>>, vector<1x1x1x128xf32>
    %499 = vector.shape_cast %498 : vector<1x1x1x128xf32> to vector<1x128xf32>
    %500 = arith.truncf %495 : vector<16x32xf32> to vector<16x32xbf16>
    %cst_253 = arith.constant dense<0.000000e+00> : vector<16x128xf32>
    %501 = tpu.matmul %500, %497, %cst_253 {dimension_numbers = #tpu.dot_dimension_numbers<[1], [0], [0], [1], [0, 0, 1, 1], [], []>} : vector<16x32xbf16>, vector<32x128xbf16>, vector<16x128xf32> -> vector<16x128xf32>
    %502 = vector.broadcast %499 : vector<1x128xf32> to vector<16x128xf32>
    %503 = arith.addf %501, %502 : vector<16x128xf32>
    %504 = arith.mulf %503, %503 : vector<16x128xf32>
    %505 = arith.mulf %503, %504 : vector<16x128xf32>
    %cst_254 = arith.constant 4.471500e-02 : f32
    %506 = vector.broadcast %cst_254 : f32 to vector<16x128xf32>
    %507 = arith.mulf %506, %505 : vector<16x128xf32>
    %508 = arith.addf %503, %507 : vector<16x128xf32>
    %cst_255 = arith.constant 0.797884583 : f32
    %509 = vector.broadcast %cst_255 : f32 to vector<16x128xf32>
    %510 = arith.mulf %509, %508 : vector<16x128xf32>
    %511 = math.tanh %510 : vector<16x128xf32>
    %cst_256 = arith.constant 1.000000e+00 : f32
    %512 = vector.broadcast %cst_256 : f32 to vector<16x128xf32>
    %513 = arith.addf %512, %511 : vector<16x128xf32>
    %cst_257 = arith.constant 5.000000e-01 : f32
    %514 = vector.broadcast %cst_257 : f32 to vector<16x128xf32>
    %515 = arith.mulf %514, %513 : vector<16x128xf32>
    %516 = arith.mulf %503, %515 : vector<16x128xf32>
    %c0_258 = arith.constant 0 : index
    %c1_259 = arith.constant 1 : index
    %c0_260 = arith.constant 0 : index
    %c0_261 = arith.constant 0 : index
    %517 = vector.load %arg15[%c0_258, %c1_259, %c0_260, %c0_261] : memref<1x2x128x32xbf16, #tpu.memory_space<vmem>>, vector<1x1x128x32xbf16>
    %518 = vector.shape_cast %517 : vector<1x1x128x32xbf16> to vector<128x32xbf16>
    %c0_262 = arith.constant 0 : index
    %c1_263 = arith.constant 1 : index
    %c0_264 = arith.constant 0 : index
    %c0_265 = arith.constant 0 : index
    %519 = vector.load %arg16[%c0_262, %c1_263, %c0_264, %c0_265] : memref<1x2x1x32xf32, #tpu.memory_space<vmem>>, vector<1x1x1x32xf32>
    %520 = vector.shape_cast %519 : vector<1x1x1x32xf32> to vector<1x32xf32>
    %521 = arith.truncf %516 : vector<16x128xf32> to vector<16x128xbf16>
    %cst_266 = arith.constant dense<0.000000e+00> : vector<16x32xf32>
    %522 = tpu.matmul %521, %518, %cst_266 {dimension_numbers = #tpu.dot_dimension_numbers<[1], [0], [0], [1], [0, 0, 1, 1], [], []>} : vector<16x128xbf16>, vector<128x32xbf16>, vector<16x32xf32> -> vector<16x32xf32>
    %523 = vector.broadcast %520 : vector<1x32xf32> to vector<16x32xf32>
    %524 = arith.addf %522, %523 : vector<16x32xf32>
    %525 = arith.addf %469, %524 : vector<16x32xf32>
    %c0_267 = arith.constant 0 : index
    %c0_268 = arith.constant 0 : index
    %c0_269 = arith.constant 0 : index
    %526 = vector.load %arg17[%c0_267, %c0_268, %c0_269] : memref<1x1x32xf32, #tpu.memory_space<vmem>>, vector<1x1x32xf32>
    %527 = vector.shape_cast %526 : vector<1x1x32xf32> to vector<1x32xf32>
    %c0_270 = arith.constant 0 : index
    %c0_271 = arith.constant 0 : index
    %c0_272 = arith.constant 0 : index
    %528 = vector.load %arg18[%c0_270, %c0_271, %c0_272] : memref<1x1x32xf32, #tpu.memory_space<vmem>>, vector<1x1x32xf32>
    %529 = vector.shape_cast %528 : vector<1x1x32xf32> to vector<1x32xf32>
    %cst_273 = arith.constant dense<0.000000e+00> : vector<16xf32>
    %530 = vector.multi_reduction <add>, %525, %cst_273 [1] : vector<16x32xf32> to vector<16xf32>
    %531 = vector.shape_cast %530 : vector<16xf32> to vector<16x1xf32>
    %cst_274 = arith.constant 3.200000e+01 : f32
    %532 = vector.broadcast %cst_274 : f32 to vector<16x1xf32>
    %533 = arith.divf %531, %532 : vector<16x1xf32>
    %534 = vector.broadcast %533 : vector<16x1xf32> to vector<16x32xf32>
    %535 = arith.subf %525, %534 : vector<16x32xf32>
    %536 = arith.mulf %535, %535 : vector<16x32xf32>
    %cst_275 = arith.constant dense<0.000000e+00> : vector<16xf32>
    %537 = vector.multi_reduction <add>, %536, %cst_275 [1] : vector<16x32xf32> to vector<16xf32>
    %538 = vector.shape_cast %537 : vector<16xf32> to vector<16x1xf32>
    %cst_276 = arith.constant 3.200000e+01 : f32
    %539 = vector.broadcast %cst_276 : f32 to vector<16x1xf32>
    %540 = arith.divf %538, %539 : vector<16x1xf32>
    %541 = vector.broadcast %533 : vector<16x1xf32> to vector<16x32xf32>
    %542 = arith.subf %525, %541 : vector<16x32xf32>
    %cst_277 = arith.constant 9.99999974E-6 : f32
    %543 = vector.broadcast %cst_277 : f32 to vector<16x1xf32>
    %544 = arith.addf %540, %543 : vector<16x1xf32>
    %545 = math.rsqrt %544 : vector<16x1xf32>
    %546 = vector.broadcast %545 : vector<16x1xf32> to vector<16x32xf32>
    %547 = arith.mulf %542, %546 : vector<16x32xf32>
    %548 = vector.broadcast %527 : vector<1x32xf32> to vector<16x32xf32>
    %549 = arith.mulf %547, %548 : vector<16x32xf32>
    %550 = vector.broadcast %529 : vector<1x32xf32> to vector<16x32xf32>
    %551 = arith.addf %549, %550 : vector<16x32xf32>
    %552 = arith.truncf %551 : vector<16x32xf32> to vector<16x32xbf16>
    %c0_278 = arith.constant 0 : index
    %c0_279 = arith.constant 0 : index
    %c0_280 = arith.constant 0 : index
    %553 = vector.load %arg3[%c0_278, %c0_279, %c0_280] : memref<1x32x256xbf16, #tpu.memory_space<vmem>>, vector<1x32x256xbf16>
    %554 = vector.shape_cast %553 : vector<1x32x256xbf16> to vector<32x256xbf16>
    %cst_281 = arith.constant dense<0.000000e+00> : vector<16x256xf32>
    %555 = tpu.matmul %552, %554, %cst_281 {dimension_numbers = #tpu.dot_dimension_numbers<[1], [0], [0], [1], [0, 0, 1, 1], [], []>} : vector<16x32xbf16>, vector<32x256xbf16>, vector<16x256xf32> -> vector<16x256xf32>
    %cst_282 = arith.constant dense<0xFF800000> : vector<16xf32>
    %556 = vector.multi_reduction <maximumf>, %555, %cst_282 [1] : vector<16x256xf32> to vector<16xf32>
    %557 = vector.shape_cast %556 : vector<16xf32> to vector<16x1xf32>
    %558 = vector.broadcast %557 : vector<16x1xf32> to vector<16x256xf32>
    %559 = arith.subf %555, %558 : vector<16x256xf32>
    %560 = math.exp %559 : vector<16x256xf32>
    %cst_283 = arith.constant dense<0.000000e+00> : vector<16xf32>
    %561 = vector.multi_reduction <add>, %560, %cst_283 [1] : vector<16x256xf32> to vector<16xf32>
    %562 = vector.shape_cast %561 : vector<16xf32> to vector<16x1xf32>
    %563 = math.log %562 : vector<16x1xf32>
    %564 = arith.addf %563, %557 : vector<16x1xf32>
    %565 = arith.mulf %5, %555 : vector<16x256xf32>
    %cst_284 = arith.constant dense<0.000000e+00> : vector<16xf32>
    %566 = vector.multi_reduction <add>, %565, %cst_284 [1] : vector<16x256xf32> to vector<16xf32>
    %567 = vector.shape_cast %566 : vector<16xf32> to vector<16x1xf32>
    %568 = arith.subf %564, %567 : vector<16x1xf32>
    %569 = vector.extract_strided_slice %568 {offsets = [0, 0], sizes = [8, 1], strides = [1, 1]} : vector<16x1xf32> to vector<8x1xf32>
    %cst_285 = arith.constant dense<0.000000e+00> : vector<1xf32>
    %570 = vector.multi_reduction <add>, %569, %cst_285 [0] : vector<8x1xf32> to vector<1xf32>
    %571 = vector.shape_cast %570 : vector<1xf32> to vector<1x1xf32>
    %cst_286 = arith.constant 8.000000e+00 : f32
    %572 = vector.broadcast %cst_286 : f32 to vector<1x1xf32>
    %573 = arith.divf %571, %572 : vector<1x1xf32>
    %c0_287 = arith.constant 0 : index
    %c0_288 = arith.constant 0 : index
    %c0_289 = arith.constant 0 : index
    %574 = vector.load %arg19[%c0_287, %c0_288, %c0_289] : memref<1x2x1xf32, #tpu.memory_space<vmem>>, vector<1x1x1xf32>
    %575 = vector.shape_cast %574 : vector<1x1x1xf32> to vector<1x1xf32>
    %576 = vector.shape_cast %573 : vector<1x1xf32> to vector<1x1x1xf32>
    tpu.vector_store %arg19[%c0_287, %c0_288, %c0_289], %576 {strides = array<i32>} : memref<1x2x1xf32, #tpu.memory_space<vmem>>, vector<1x1x1xf32>,
    %577 = vector.extract_strided_slice %568 {offsets = [8, 0], sizes = [8, 1], strides = [1, 1]} : vector<16x1xf32> to vector<8x1xf32>
    %cst_290 = arith.constant dense<0.000000e+00> : vector<1xf32>
    %578 = vector.multi_reduction <add>, %577, %cst_290 [0] : vector<8x1xf32> to vector<1xf32>
    %579 = vector.shape_cast %578 : vector<1xf32> to vector<1x1xf32>
    %cst_291 = arith.constant 8.000000e+00 : f32
    %580 = vector.broadcast %cst_291 : f32 to vector<1x1xf32>
    %581 = arith.divf %579, %580 : vector<1x1xf32>
    %c0_292 = arith.constant 0 : index
    %c1_293 = arith.constant 1 : index
    %c0_294 = arith.constant 0 : index
    %582 = vector.load %arg19[%c0_292, %c1_293, %c0_294] : memref<1x2x1xf32, #tpu.memory_space<vmem>>, vector<1x1x1xf32>
    %583 = vector.shape_cast %582 : vector<1x1x1xf32> to vector<1x1xf32>
    %584 = vector.shape_cast %581 : vector<1x1xf32> to vector<1x1x1xf32>
    tpu.vector_store %arg19[%c0_292, %c1_293, %c0_294], %584 {strides = array<i32>} : memref<1x2x1xf32, #tpu.memory_space<vmem>>, vector<1x1x1xf32>,
    return
  }
  func.func @transform_0(%arg0: i32) -> (i32, i32) {
    %c0_i32 = arith.constant 0 : i32
    %c0_i32_0 = arith.constant 0 : i32
    %c0_i32_1 = arith.constant 0 : i32
    return %c0_i32, %c0_i32_0 : i32, i32
  }
  func.func @transform_1(%arg0: i32) -> (i32, i32, i32) {
    %c0_i32 = arith.constant 0 : i32
    %c0_i32_0 = arith.constant 0 : i32
    %c0_i32_1 = arith.constant 0 : i32
    return %arg0, %c0_i32, %c0_i32_0 : i32, i32, i32
  }
  func.func @transform_2(%arg0: i32) -> (i32, i32, i32) {
    %c0_i32 = arith.constant 0 : i32
    %c0_i32_0 = arith.constant 0 : i32
    %c0_i32_1 = arith.constant 0 : i32
    return %arg0, %c0_i32, %c0_i32_0 : i32, i32, i32
  }
  func.func @transform_3(%arg0: i32) -> (i32, i32, i32) {
    %c0_i32 = arith.constant 0 : i32
    %c0_i32_0 = arith.constant 0 : i32
    %c0_i32_1 = arith.constant 0 : i32
    return %arg0, %c0_i32, %c0_i32_0 : i32, i32, i32
  }
  func.func @transform_4(%arg0: i32) -> (i32, i32, i32, i32) {
    %c0_i32 = arith.constant 0 : i32
    %c0_i32_0 = arith.constant 0 : i32
    %c0_i32_1 = arith.constant 0 : i32
    %c0_i32_2 = arith.constant 0 : i32
    return %arg0, %c0_i32, %c0_i32_0, %c0_i32_1 : i32, i32, i32, i32
  }
  func.func @transform_5(%arg0: i32) -> (i32, i32, i32, i32) {
    %c0_i32 = arith.constant 0 : i32
    %c0_i32_0 = arith.constant 0 : i32
    %c0_i32_1 = arith.constant 0 : i32
    %c0_i32_2 = arith.constant 0 : i32
    return %arg0, %c0_i32, %c0_i32_0, %c0_i32_1 : i32, i32, i32, i32
  }
  func.func @transform_6(%arg0: i32) -> (i32, i32, i32, i32) {
    %c0_i32 = arith.constant 0 : i32
    %c0_i32_0 = arith.constant 0 : i32
    %c0_i32_1 = arith.constant 0 : i32
    %c0_i32_2 = arith.constant 0 : i32
    return %arg0, %c0_i32, %c0_i32_0, %c0_i32_1 : i32, i32, i32, i32
  }
  func.func @transform_7(%arg0: i32) -> (i32, i32, i32, i32) {
    %c0_i32 = arith.constant 0 : i32
    %c0_i32_0 = arith.constant 0 : i32
    %c0_i32_1 = arith.constant 0 : i32
    %c0_i32_2 = arith.constant 0 : i32
    return %arg0, %c0_i32, %c0_i32_0, %c0_i32_1 : i32, i32, i32, i32
  }
  func.func @transform_8(%arg0: i32) -> (i32, i32, i32, i32) {
    %c0_i32 = arith.constant 0 : i32
    %c0_i32_0 = arith.constant 0 : i32
    %c0_i32_1 = arith.constant 0 : i32
    %c0_i32_2 = arith.constant 0 : i32
    return %arg0, %c0_i32, %c0_i32_0, %c0_i32_1 : i32, i32, i32, i32
  }
  func.func @transform_9(%arg0: i32) -> (i32, i32, i32, i32) {
    %c0_i32 = arith.constant 0 : i32
    %c0_i32_0 = arith.constant 0 : i32
    %c0_i32_1 = arith.constant 0 : i32
    %c0_i32_2 = arith.constant 0 : i32
    return %arg0, %c0_i32, %c0_i32_0, %c0_i32_1 : i32, i32, i32, i32
  }
  func.func @transform_10(%arg0: i32) -> (i32, i32, i32, i32) {
    %c0_i32 = arith.constant 0 : i32
    %c0_i32_0 = arith.constant 0 : i32
    %c0_i32_1 = arith.constant 0 : i32
    %c0_i32_2 = arith.constant 0 : i32
    return %arg0, %c0_i32, %c0_i32_0, %c0_i32_1 : i32, i32, i32, i32
  }
  func.func @transform_11(%arg0: i32) -> (i32, i32, i32, i32) {
    %c0_i32 = arith.constant 0 : i32
    %c0_i32_0 = arith.constant 0 : i32
    %c0_i32_1 = arith.constant 0 : i32
    %c0_i32_2 = arith.constant 0 : i32
    return %arg0, %c0_i32, %c0_i32_0, %c0_i32_1 : i32, i32, i32, i32
  }
  func.func @transform_12(%arg0: i32) -> (i32, i32, i32, i32) {
    %c0_i32 = arith.constant 0 : i32
    %c0_i32_0 = arith.constant 0 : i32
    %c0_i32_1 = arith.constant 0 : i32
    %c0_i32_2 = arith.constant 0 : i32
    return %arg0, %c0_i32, %c0_i32_0, %c0_i32_1 : i32, i32, i32, i32
  }
  func.func @transform_13(%arg0: i32) -> (i32, i32, i32, i32) {
    %c0_i32 = arith.constant 0 : i32
    %c0_i32_0 = arith.constant 0 : i32
    %c0_i32_1 = arith.constant 0 : i32
    %c0_i32_2 = arith.constant 0 : i32
    return %arg0, %c0_i32, %c0_i32_0, %c0_i32_1 : i32, i32, i32, i32
  }
  func.func @transform_14(%arg0: i32) -> (i32, i32, i32, i32) {
    %c0_i32 = arith.constant 0 : i32
    %c0_i32_0 = arith.constant 0 : i32
    %c0_i32_1 = arith.constant 0 : i32
    %c0_i32_2 = arith.constant 0 : i32
    return %arg0, %c0_i32, %c0_i32_0, %c0_i32_1 : i32, i32, i32, i32
  }
  func.func @transform_15(%arg0: i32) -> (i32, i32, i32, i32) {
    %c0_i32 = arith.constant 0 : i32
    %c0_i32_0 = arith.constant 0 : i32
    %c0_i32_1 = arith.constant 0 : i32
    %c0_i32_2 = arith.constant 0 : i32
    return %arg0, %c0_i32, %c0_i32_0, %c0_i32_1 : i32, i32, i32, i32
  }
  func.func @transform_16(%arg0: i32) -> (i32, i32, i32) {
    %c0_i32 = arith.constant 0 : i32
    %c0_i32_0 = arith.constant 0 : i32
    %c0_i32_1 = arith.constant 0 : i32
    return %arg0, %c0_i32, %c0_i32_0 : i32, i32, i32
  }
  func.func @transform_17(%arg0: i32) -> (i32, i32, i32) {
    %c0_i32 = arith.constant 0 : i32
    %c0_i32_0 = arith.constant 0 : i32
    %c0_i32_1 = arith.constant 0 : i32
    return %arg0, %c0_i32, %c0_i32_0 : i32, i32, i32
  }
  func.func @transform_18(%arg0: i32) -> (i32, i32, i32) {
    %c0_i32 = arith.constant 0 : i32
    %c0_i32_0 = arith.constant 0 : i32
    %c0_i32_1 = arith.constant 0 : i32
    return %arg0, %c0_i32, %c0_i32_0 : i32, i32, i32
  }
}

module attributes {stable_mosaic.version = 11 : i64} {
  func.func @_two_class_softmax_kernel(%arg0: i32, %arg1: memref<2x2xf32, #tpu.memory_space<vmem>>, %arg2: memref<2x2xf32, #tpu.memory_space<vmem>>) attributes {dimension_semantics = [#tpu.dimension_semantics<arbitrary>], iteration_bounds = array<i64: 1>, scalar_prefetch = 0 : i64, scratch_operands = 0 : i64, tpu.core_type = #tpu.core_type<tc>, window_params = [{pipeline_mode = #tpu.pipeline_mode<synchronous>, transform_indices = @transform_0, window_bounds = array<i64: 2, 2>}, {pipeline_mode = #tpu.pipeline_mode<synchronous>, transform_indices = @transform_1, window_bounds = array<i64: 2, 2>}]} {
    %c0 = arith.constant 0 : index
    %c0_0 = arith.constant 0 : index
    %0 = vector.load %arg1[%c0, %c0_0] : memref<2x2xf32, #tpu.memory_space<vmem>>, vector<2x2xf32>
    %cst = arith.constant 0.000000e+00 : f32
    %1 = vector.broadcast %cst : f32 to vector<2x2xf32>
    %2 = arith.subf %1, %0 : vector<2x2xf32>
    %cst_1 = arith.constant dense<0xFF800000> : vector<2xf32>
    %3 = vector.multi_reduction <maximumf>, %2, %cst_1 [1] : vector<2x2xf32> to vector<2xf32>
    %4 = vector.shape_cast %3 : vector<2xf32> to vector<2x1xf32>
    %5 = vector.broadcast %4 : vector<2x1xf32> to vector<2x2xf32>
    %6 = arith.subf %2, %5 : vector<2x2xf32>
    %7 = math.exp %6 : vector<2x2xf32>
    %cst_2 = arith.constant dense<0.000000e+00> : vector<2xf32>
    %8 = vector.multi_reduction <add>, %7, %cst_2 [1] : vector<2x2xf32> to vector<2xf32>
    %9 = vector.shape_cast %8 : vector<2xf32> to vector<2x1xf32>
    %10 = vector.broadcast %9 : vector<2x1xf32> to vector<2x2xf32>
    %11 = arith.divf %7, %10 : vector<2x2xf32>
    %c0_3 = arith.constant 0 : index
    %c0_4 = arith.constant 0 : index
    %12 = vector.load %arg2[%c0_3, %c0_4] : memref<2x2xf32, #tpu.memory_space<vmem>>, vector<2x2xf32>
    tpu.vector_store %arg2[%c0_3, %c0_4], %11 {strides = array<i32>} : memref<2x2xf32, #tpu.memory_space<vmem>>, vector<2x2xf32>,
    return
  }
  func.func @transform_0(%arg0: i32) -> (i32, i32) {
    %c0_i32 = arith.constant 0 : i32
    %c0_i32_0 = arith.constant 0 : i32
    %c0_i32_1 = arith.constant 0 : i32
    return %c0_i32, %c0_i32_0 : i32, i32
  }
  func.func @transform_1(%arg0: i32) -> (i32, i32) {
    %c0_i32 = arith.constant 0 : i32
    %c0_i32_0 = arith.constant 0 : i32
    %c0_i32_1 = arith.constant 0 : i32
    return %c0_i32, %c0_i32_0 : i32, i32
  }
}

</mosaic_0001>

<bundles_post_ra>
// kernel: classification_forward.3
= control target key start
LH: loop header
LB: loop body
LE: loop exit
PB: predicated region body
PF: predicated region fallthrough
CT: control target
= control target key end

     0   :  { %vm11_vm0 = vcmask 9216   ;;  %s104_s0 = inlined_call_operand.vmem [shape: f32[2,2], index: 0, kind: input, shape index: {}]   ;;  %s105_s1 = inlined_call_operand.hbm [shape: f32[2,2], index: 1, kind: output, shape index: {}]  }
   0x1   :  { %v9_v0 = vld [vmem:[%s104_s0] sm:$0x3] }
   0x2   :  { %6 = vsyncpa [#allocation3], 0  ;;  %v10_v1 = vsub.f32 0.0, %v9_v0  ;;  %s84_s0 = smov [#allocation2]   ;;  %s44_s11 = sshll.u32 %s105_s1, 4  ;;  %s45_s11 = int_to_ptr.hbm [resolvable:$true] %s44_s11 }
   0x3   :  { %s42_s8 = sshll.u32 %s84_s0, 4  ;;  %s43_s8 = int_to_ptr.vmem [resolvable:$true] %s42_s8 }
   0x4   :  { %v12_v2 = vsel %vm11_vm0, %v10_v1, -inf }
   0x5   :  { %13 = vmax.xlane.f32.xlu0 %v12_v2 }
  0x78   :  { %v14_v3 = vpop.xlane.xlu0 %13 }
  0x79   :  { %v15_v4 = vsub.f32 %v10_v1, %v14_v3 }
  0x7b   :  { %v16_v5 = vmul.f32 1.442695, %v15_v4 }
  0x7d   :  { %54 = vpow2.f32 %v16_v5 }
  0x83   :  { %v55_v6 = vpop.eup %54 }
  0x84   :  { %v18_v7 = vsel %vm11_vm0, %v55_v6, 0.0 }
  0x85   :  { %19 = vadd.xlane.f32.xlu0 %v18_v7 }
  0xf8   :  { %v20_v8 = vpop.xlane.xlu0 %19 }
  0xf9   :  { %56 = vrcp.f32 %v20_v8  ;;  %v32_v12 = vand.u32 2147483648, %v20_v8  ;;  %v30_v14 = vand.u32 2147483647, %v20_v8  ;;  %vm26_vm2 = vweird.f32 %v20_v8 }
  0xfb   :  { %v33_v16 = vor.u32 1.1754944e-38, %v32_v12  ;;  %vm31_vm4 = vcmp.eq.f32.partialorder %v30_v14, 8.507059e+37 }
  0xff   :  { %v57_v9 = vpop.eup %56 }
 0x100   :  { %v22_v10 = vmul.f32 %v57_v9, %v20_v8  ;;  %vm27_vm1 = vweird.f32 %v57_v9 }
 0x101   :  { %vm28_vm3 = vmor %vm26_vm2, %vm27_vm1 }
 0x102   :  { %v23_v11 = vsub.f32 1.0, %v22_v10 }
 0x104   :  { %v24_v13 = vmul.f32 %v57_v9, %v23_v11 }
 0x106   :  { %v25_v15 = vadd.f32 %v57_v9, %v24_v13 }
 0x108   :  { %v29_v17 = vsel %vm28_vm3, %v57_v9, %v25_v15 }
 0x109   :  { %v34_v18 = vsel %vm31_vm4, %v33_v16, %v29_v17 }
 0x10a   :  { %v35_v19 = vmul.f32 %v55_v6, %v34_v18 }
 0x10c   :  { %36 = vst.msk [vmem:[#allocation2] sm:$0x3] %vm11_vm0, %v35_v19 }
 0x10d   :  { %47 = dma.vmem_to_hbm [thread:$0]  %s43_s8, 32, %s45_s11, [#allocation3]  }
 0x10e   :  { %82 = dma.done.wait [#allocation3], 32  }
 0x10f   :  { %83 = vsyncadd [#allocation3], 4294967264 }
 0x110   :  { %52 = vsyncpa [#allocation3], 1 }

// kernel: classification_forward.2
= control target key start
LH: loop header
LB: loop body
LE: loop exit
PB: predicated region body
PF: predicated region fallthrough
CT: control target
= control target key end

     0   :  { %s4145_s27 = smov 0   ;;  %s4817_s0 = inlined_call_operand.vmem [shape: s32[16,1], index: 0, kind: input, shape index: {}]   ;;  %s4818_s1 = inlined_call_operand.vmem [shape: bf16[2,256,32], index: 1, kind: input, shape index: {}]   ;;  %s4819_s2 = inlined_call_operand.vmem [shape: bf16[2,32,256], index: 2, kind: input, shape index: {}]   ;;  %s4820_s3 = inlined_call_operand.vmem [shape: f32[2,16,32], index: 3, kind: input, shape index: {}]   ;;  %s4821_s4 = inlined_call_operand.vmem [shape: f32[2,2,1,32], index: 4, kind: input, shape index: {}]   ;;  %s4822_s5 = inlined_call_operand.vmem [shape: f32[2,2,1,32], index: 5, kind: input, shape index: {}]   ;;  %s4823_s6 = inlined_call_operand.vmem [shape: bf16[2,2,32,96], index: 6, kind: input, shape index: {}]   ;;  %s4824_s7 = inlined_call_operand.vmem [shape: f32[2,2,1,96], index: 7, kind: input, shape index: {}]   ;;  %s4825_s8 = inlined_call_operand.vmem [shape: bf16[2,2,32,32], index: 8, kind: input, shape index: {}]   ;;  %s4826_s9 = inlined_call_operand.vmem [shape: f32[2,2,1,32], index: 9, kind: input, shape index: {}]   ;;  %s4827_s10 = inlined_call_operand.vmem [shape: f32[2,2,1,32], index: 10, kind: input, shape index: {}]   ;;  %s4828_s11 = inlined_call_operand.vmem [shape: f32[2,2,1,32], index: 11, kind: input, shape index: {}]   ;;  %s4829_s12 = inlined_call_operand.vmem [shape: bf16[2,2,32,128], index: 12, kind: input, shape index: {}]   ;;  %s4830_s13 = inlined_call_operand.vmem [shape: f32[2,2,1,128], index: 13, kind: input, shape index: {}]   ;;  %s4831_s14 = inlined_call_operand.vmem [shape: bf16[2,2,128,32], index: 14, kind: input, shape index: {}]   ;;  %s4832_s15 = inlined_call_operand.vmem [shape: f32[2,2,1,32], index: 15, kind: input, shape index: {}]   ;;  %s4833_s16 = inlined_call_operand.vmem [shape: f32[2,1,32], index: 16, kind: input, shape index: {}]   ;;  %s4834_s17 = inlined_call_operand.vmem [shape: f32[2,1,32], index: 17, kind: input, shape index: {}]   ;;  %s4835_s18 = inlined_call_operand.vmem [shape: f32[2,2,1], index: 18, kind: output, shape index: {}]  }
   0x1   :  { %4867 = sst [smem:[#allocation3_spill]] %s4817_s0 }
   0x2   :  { %4868 = sst [smem:[#allocation4_spill]] %s4818_s1 }
   0x3   :  { %4869 = sst [smem:[#allocation5_spill]] %s4819_s2 }
   0x4   :  { %4870 = sst [smem:[#allocation6_spill]] %s4820_s3 }
   0x5   :  { %4871 = sst [smem:[#allocation7_spill]] %s4821_s4 }
   0x6   :  { %4872 = sst [smem:[#allocation8_spill]] %s4822_s5 }
   0x7   :  { %4873 = sst [smem:[#allocation9_spill]] %s4823_s6 }
   0x8   :  { %4874 = sst [smem:[#allocation10_spill]] %s4824_s7 }
   0x9   :  { %4875 = sst [smem:[#allocation11_spill]] %s4825_s8 }
   0xa LB: > { %s3492_s28 = sadd.s32 4294967295, %s4029_s27   ;;  %p3496_p0 = scmp.ge.s32.totalorder %s4029_s27, 1  ;;  %s4029_s27 = sphi %s4145_s27, %s28_s27  }
   0xb   : > { %p660_p1 = scmp.lt.s32.totalorder %s4029_s27, 3 }
   0xd   : > { %p661_p2 = pnand %p3496_p0, %p660_p1 }
   0xe   : > { %s4876_s0 = sld [smem:[#allocation3_spill]] (!%p661_p2)  ;;  %p781_p3 = scmp.lt.s32.totalorder (!%p661_p2), %s3492_s28, 1 }
   0xf   : > { %664 = sbr.rel (%p661_p2) target bundleno = 6035 (0x1793), region = 92  ;;  %s4877_s21 = sld [smem:[#allocation4_spill]] (!%p661_p2) }
  0x10   : > { %s4878_s3 = sld [smem:[#allocation6_spill]] (!%p661_p2)  ;;  %s4845_s20 = smov (!%p661_p2), 80  }
  0x11   : > { %s4879_s4 = sld [smem:[#allocation7_spill]] (!%p661_p2)  ;;  %s4839_s2 = smov (!%p661_p2), 72  }
  0x12   : > { %s4880_s5 = sld [smem:[#allocation8_spill]] (!%p661_p2)  ;;  %s4841_s25 = smov (!%p661_p2), 104  }
  0x13   : > { %s4881_s7 = sld [smem:[#allocation10_spill]] (!%p661_p2) }
  0x14   : > { %v859_v0 = vld [vmem:[%s4876_s0] sm:$0xff]  ;;  %v4031_v1 = vmov 0   ;;  %s4907_s28 = smov (!%p781_p3, %s3492_s28), 1  ;;  %v860_v4 = vld [vmem:[%s4876_s0 + $0x8] sm:$0xff]  ;;  %v861_v19 = vlaneseq  ;;  %v4032_v24 = vmov 0.0   ;;  %vm1047_vm6 = vcmask 261120  }
  0x15   : > { %3896 = vset.pattern.permute.xlu0 %v4031_v1  ;;  %s4837_s19 = sshll.u32 %s4907_s28, 7  ;;  %v4033_v27 = vmov 1.0|1.0   ;;  %s3816_s24 = sshll.u32 %s4907_s28, 4  ;;  %v4034_v40 = vmov 32.0   ;;  %vm1150_vm14 = vcmask 64512  }
  0x16   : > { %865 = vperm.xlu0 %3896, %v859_v0   ;;  %s4164_s22 = scalar_lea.vmem %s4877_s21, %s4837_s19  ;;  %v4188_v21 = vand.u32 127, %v861_v19  ;;  %s795_s29 = scalar_lea.vmem %s4878_s3, %s3816_s24  ;;  %3915 = vrcp.f32 %v4034_v40 }
  0x17   : > { %v3828_v2 = vld [vmem:[%s4164_s22 + $0x38] sm:$0xff]  ;;  %v3827_v5 = vld [vmem:[%s4164_s22 + $0x30] sm:$0xff]  ;;  %v3826_v7 = vld [vmem:[%s4164_s22 + $0x28] sm:$0xff]  ;;  %s4232_s30 = sshll.u32 %s4907_s28, 1  ;;  %s4882_s6 = sld [smem:[#allocation9_spill]] }
  0x18   : > { %v3836_v3 = vld [vmem:[%s4164_s22 + $0x78] sm:$0xff]  ;;  %1014 = vmatpush.bf16.msra.mxu0 %v3828_v2  ;;  %v3835_v6 = vld [vmem:[%s4164_s22 + $0x70] sm:$0xff]  ;;  %v3834_v8 = vld [vmem:[%s4164_s22 + $0x68] sm:$0xff]  ;;  %v4191_v22 = vadd.s32 128, %v4188_v21  ;;  %s4238_s21 = scalar_lea.vmem %s4879_s4, %s4232_s30  ;;  %s4244_s23 = scalar_lea.vmem %s4880_s5, %s4232_s30 }
  0x19   : > { %1028 = vmatpush.bf16.msra.mxu1 %v3836_v3  ;;  %v3825_v9 = vld [vmem:[%s4164_s22 + $0x20] sm:$0xff]  ;;  %v3824_v11 = vld [vmem:[%s4164_s22 + $0x18] sm:$0xff]  ;;  %v3823_v13 = vld [vmem:[%s4164_s22 + $0x10] sm:$0xff]  ;;  %s4250_s26 = scalar_lea.vmem %s4881_s7, %s4232_s30  ;;  %s4855_s0 = smov 96  }
  0x1a   : > { %v3833_v10 = vld [vmem:[%s4164_s22 + $0x60] sm:$0xff]  ;;  %v3832_v12 = vld [vmem:[%s4164_s22 + $0x58] sm:$0xff]  ;;  %v3831_v14 = vld [vmem:[%s4164_s22 + $0x50] sm:$0xff]  ;;  %s4851_s19 = smov 64   ;;  %s4857_s24 = smov 88  }
  0x1b   : > { %v3822_v15 = vld [vmem:[%s4164_s22 + $0x8] sm:$0xff]  ;;  %v3821_v17 = vld [vmem:[%s4164_s22] sm:$0xff]  ;;  %s4889_s8 = sld [smem:[#allocation11_spill]]  ;;  %s4501_s3 = scalar_lea.vmem %s4828_s11, %s4232_s30 }
  0x1c   : > { %1015 = vmatpush.bf16.msra.mxu0 %v3827_v5  ;;  %v3830_v16 = vld [vmem:[%s4164_s22 + $0x48] sm:$0xff]  ;;  %v3829_v18 = vld [vmem:[%s4164_s22 + $0x40] sm:$0xff]  ;;  %v3916_v41 = vpop.eup %3915  ;;  %s4843_s22 = smov 112   ;;  %s4892_s7 = smov 88  }
  0x1d   : > { %1029 = vmatpush.bf16.msra.mxu1 %v3835_v6  ;;  %v916_v28 = vld [vmem:[%s795_s29] sm:$0xff]  ;;  %v917_v34 = vld [vmem:[%s795_s29 + $0x8] sm:$0xff]  ;;  %v1055_v42 = vmul.f32 32.0, %v3916_v41  ;;  %vm1059_vm7 = vweird.f32 %v3916_v41  ;;  %s4253_s29 = sshll.u32 %s4907_s28, 5  ;;  %s4897_s4 = smov 72  }
  0x1e   : > { %868 = vperm.xlu0 %3896, %v860_v4   ;;  %s4259_s1 = scalar_lea.vmem %s4882_s6, %s4253_s29  ;;  %s4524_s5 = scalar_lea.vmem %s4829_s12, %s4253_s29 }
  0x1f   : > { %v1056_v43 = vsub.f32 1.0, %v1055_v42  ;;  %v3838_v57 = vld [vmem:[%s4259_s1 + $0x8] sm:$0xff]  ;;  %v3837_v60 = vld [vmem:[%s4259_s1] sm:$0xff]  ;;  %s4891_s6 = smov 120  }
  0x20   : > { %1016 = vmatpush.bf16.msra.mxu0 %v3826_v7  ;;  %1139 = vmatpush.bf16.msra.mxu2 %v3838_v57 }
  0x21   : > { %1030 = vmatpush.bf16.msra.mxu1 %v3834_v8  ;;  %v1057_v44 = vmul.f32 %v3916_v41, %v1056_v43 }
  0x23   : > { %v1058_v45 = vadd.f32 %v3916_v41, %v1057_v44 }
  0x24   : > { %1017 = vmatpush.bf16.msra.mxu0 %v3825_v9  ;;  %1140 = vmatpush.bf16.msra.mxu2 %v3837_v60 }
  0x25   : > { %1031 = vmatpush.bf16.msra.mxu1 %v3833_v10  ;;  %v4223_v46 = vsel %vm1059_vm7, %v3916_v41, %v1058_v45  ;;  %v1043_v45 = vshrl.u32 %v861_v19, 7 }
  0x27   : > { %vm4294_vm15 = vcmp.ge.s32.totalorder %v1043_v45, %v4188_v21 }
  0x28   : > { %1018 = vmatpush.bf16.msra.mxu0 %v3824_v11 }
  0x29   : > { %1032 = vmatpush.bf16.msra.mxu1 %v3832_v12 }
  0x2c   : > { %1019 = vmatpush.bf16.msra.mxu0 %v3823_v13 }
  0x2d   : > { %1033 = vmatpush.bf16.msra.mxu1 %v3831_v14  ;;  %v3897_v14 = vld [vmem:[%s4238_s21] ss:$0 sm:$0xff] }
  0x30   : > { %1020 = vmatpush.bf16.msra.mxu0 %v3822_v15 }
  0x31   : > { %1034 = vmatpush.bf16.msra.mxu1 %v3830_v16 }
  0x34   : > { %1021 = vmatpush.bf16.msra.mxu0 %v3821_v17 }
  0x35   : > { %1035 = vmatpush.bf16.msra.mxu1 %v3829_v18 }
  0x88   : > { %v4185_v20 = vpop.permute.xlu0 %865 }
  0x89   : > { %vm870_vm0 = vcmp.eq.s32.totalorder %v4188_v21, %v4185_v20  ;;  %vm871_vm3 = vcmp.eq.s32.totalorder %v4191_v22, %v4185_v20 }
  0x90   : > { %v869_v23 = vpop.permute.xlu0 %868 }
  0x91   : > { %vm872_vm1 = vcmp.eq.s32.totalorder %v4188_v21, %v869_v23  ;;  %vm873_vm2 = vcmp.eq.s32.totalorder %v4191_v22, %v869_v23  ;;  %v3898_v23 = vld [vmem:[%s4244_s23] ss:$0 sm:$0xff] }
  0x92   : > { %vm3588_vm4 = vmpackc.low %vm872_vm1, %vm870_vm0  ;;  %v4203_v25 = vsel %vm872_vm1, 1.0, %v4032_v24  ;;  %v4206_v26 = vsel %vm873_vm2, 1.0, %v4032_v24 }
  0x93   : > { %3589 = vmatmul.msk.bf16.vlgmr.msra.gmra.mxu0 %vm3588_vm4, %v4033_v27  ;;  %vm3590_vm5 = vmpackc.low %vm873_vm2, %vm871_vm3 }
  0x94   : > { %3591 = vmatmul.msk.bf16.vlgmr.msra.gmra.mxu1 %vm3590_vm5, %v4033_v27 }
 0x110   : > { %v1023_v29 = vpop.f32.mrf.mxu0 }
 0x111   : > { %v1024_v30 = vadd.f32 %v1023_v29, %v916_v28  ;;  %v1037_v31 = vpop.f32.mrf.mxu1 }
 0x113   : > { %v4215_v32 = vadd.f32 %v1037_v31, %v1024_v30  ;;  %v3901_v31 = vld [vmem:[%s4250_s26] ss:$0 sm:$0xff] }
 0x115   : > { %v1048_v33 = vsel %vm1047_vm6, %v4215_v32, 0.0 }
 0x116   : > { %1049 = vadd.xlane.f32.xlu1 %v1048_v33 }
 0x118   : > { %v1025_v35 = vpop.f32.mrf.mxu0 }
 0x119   : > { %v1026_v36 = vadd.f32 %v1025_v35, %v917_v34  ;;  %v1039_v37 = vpop.f32.mrf.mxu1 }
 0x11b   : > { %v4219_v38 = vadd.f32 %v1039_v37, %v1026_v36 }
 0x11d   : > { %v1051_v39 = vsel %vm1047_vm6, %v4219_v38, 0.0 }
 0x11e   : > { %1052 = vadd.xlane.f32.xlu1 %v1051_v39 }
 0x189   : > { %v1050_v47 = vpop.xlane.xlu1 %1049 }
 0x18a   : > { %v1061_v48 = vmul.f32 %v4223_v46, %v1050_v47 }
 0x18c   : > { %v1063_v49 = vsub.f32 %v4215_v32, %v1061_v48 }
 0x18e   : > { %v1065_v50 = vmul.f32 %v1063_v49, %v1063_v49 }
 0x190   : > { %v1067_v51 = vsel %vm1047_vm6, %v1065_v50, 0.0 }
 0x191   : > { %1068 = vadd.xlane.f32.xlu2 %v1067_v51  ;;  %v1053_v52 = vpop.xlane.xlu1 %1052 }
 0x192   : > { %v1062_v53 = vmul.f32 %v4223_v46, %v1053_v52 }
 0x194   : > { %v1064_v54 = vsub.f32 %v4219_v38, %v1062_v53 }
 0x196   : > { %v1066_v55 = vmul.f32 %v1064_v54, %v1064_v54 }
 0x198   : > { %v1070_v56 = vsel %vm1047_vm6, %v1066_v55, 0.0 }
 0x199   : > { %1071 = vadd.xlane.f32.xlu2 %v1070_v56 }
 0x204   : > { %v1069_v58 = vpop.xlane.xlu2 %1068 }
 0x205   : > { %v1073_v59 = vmul.f32 %v1069_v58, %v4223_v46 }
 0x207   : > { %v1075_v61 = vadd.f32 1e-05, %v1073_v59 }
 0x209   : > { %3917 = vrsqrt.f32 %v1075_v61  ;;  %vm1083_vm9 = vweird.f32 %v1075_v61 }
 0x20c   : > { %v1072_v62 = vpop.xlane.xlu2 %1071 }
 0x20d   : > { %v1074_v63 = vmul.f32 %v1072_v62, %v4223_v46 }
 0x20f   : > { %v3918_v0 = vpop.eup %3917  ;;  %v1076_v1 = vadd.f32 1e-05, %v1074_v63 }
 0x210   : > { %v1078_v2 = vmul.f32 %v3918_v0, %v1075_v61  ;;  %vm1084_vm8 = vweird.f32 %v3918_v0 }
 0x211   : > { %3919 = vrsqrt.f32 %v1076_v1  ;;  %vm1085_vm10 = vmor %vm1083_vm9, %vm1084_vm8  ;;  %vm1093_vm12 = vweird.f32 %v1076_v1 }
 0x212   : > { %v1079_v3 = vmul.f32 %v3918_v0, %v1078_v2 }
 0x214   : > { %v1080_v4 = vmul.f32 0.5, %v1079_v3 }
 0x216   : > { %v1081_v5 = vsub.f32 1.5, %v1080_v4 }
 0x217   : > { %v3920_v6 = vpop.eup %3919 }
 0x218   : > { %v1082_v7 = vmul.f32 %v3918_v0, %v1081_v5  ;;  %v1088_v8 = vmul.f32 %v3920_v6, %v1076_v1  ;;  %vm1094_vm11 = vweird.f32 %v3920_v6 }
 0x219   : > { %vm1095_vm13 = vmor %vm1093_vm12, %vm1094_vm11 }
 0x21a   : > { %v1089_v9 = vmul.f32 %v3920_v6, %v1088_v8  ;;  %v1086_v10 = vsel %vm1085_vm10, %v3918_v0, %v1082_v7 }
 0x21b   : > { %v1097_v13 = vmul.f32 %v1086_v10, %v1063_v49 }
 0x21c   : > { %v1090_v11 = vmul.f32 0.5, %v1089_v9 }
 0x21d   : > { %v1102_v18 = vmul.f32 %v3897_v14, %v1097_v13 }
 0x21e   : > { %v1091_v12 = vsub.f32 1.5, %v1090_v11 }
 0x21f   : > { %v1107_v28 = vadd.f32 %v3898_v23, %v1102_v18 }
 0x220   : > { %v1092_v15 = vmul.f32 %v3920_v6, %v1091_v12 }
 0x222   : > { %v1096_v16 = vsel %vm1095_vm13, %v3920_v6, %v1092_v15 }
 0x223   : > { %v1098_v17 = vmul.f32 %v1096_v16, %v1064_v54 }
 0x225   : > { %v1103_v27 = vmul.f32 %v3897_v14, %v1098_v17 }
 0x227   : > { %v1108_v29 = vadd.f32 %v3898_v23, %v1103_v27 }
 0x229   : > { %v1114_v30 = vpack.c.bf16 %v1108_v29, %v1107_v28 }
 0x22b   : > { %3600 = vmatmul.msk.bf16.vlgmr.msra.gmra.mxu2 %vm1047_vm6, %v1114_v30 }
 0x2ae   : > { %v1142_v33 = vpop.f32.mrf.mxu2 }
 0x2af   : > { %v4269_v34 = vadd.f32 %v3901_v31, %v1142_v33 }
 0x2b1   : > { %1148 = vrot.lane.b32.xlu0 %v4269_v34, %s4855_s0 }
 0x2b6   : > { %v1144_v35 = vpop.f32.mrf.mxu2 }
 0x2b7   : > { %v4281_v36 = vadd.f32 %v3901_v31, %v1144_v35 }
 0x2b9   : > { %1201 = vrot.lane.b32.xlu0 %v4269_v34, %s4851_s19 }
 0x2c1   : > { %1316 = vrot.lane.b32.xlu0 %v4269_v34, %s4845_s20 }
 0x2c9   : > { %1314 = vrot.lane.b32.xlu0 %v4269_v34, %s4843_s22 }
 0x2d1   : > { %1402 = vrot.lane.b32.xlu0 %v4269_v34, %s4839_s2 }
 0x2d9   : > { %1568 = vrot.lane.b32.xlu0 %v4281_v36, %s4857_s24 }
 0x2e1   : > { %1738 = vrot.lane.b32.xlu0 %v4281_v36, %s4839_s2  ;;  %s4865_s2 = smov 120  }
 0x323   : > { %v1149_v37 = vpop.permute.xlu0 %1148 }
 0x324   : > { %3601 = vmatpush.xpose.msk.msrb.mxu1 %vm1150_vm14, %v1149_v37 }
 0x327   : > { %3602 = vmatmul.msk.f32.vlgmr.msrb.gmra.mxu1 %vm1150_vm14, %v4269_v34 }
 0x32b   : > { %v1202_v39 = vpop.permute.xlu0 %1201 }
 0x32c   : > { %1222 = vmatpush.msra.mxu3 %v1202_v39 }
 0x333   : > { %v1317_v40 = vpop.permute.xlu0 %1316 }
 0x33b   : > { %v1315_v41 = vpop.permute.xlu0 %1314 }
 0x343   : > { %v1403_v42 = vpop.permute.xlu0 %1402 }
 0x34b   : > { %v1569_v43 = vpop.permute.xlu0 %1568 }
 0x34c   : > { %3616 = vmatpush.xpose.msk.msra.mxu1 %vm1150_vm14, %v1569_v43 }
 0x353   : > { %v1739_v44 = vpop.permute.xlu0 %1738 }
 0x354   : > { %3622 = vmatpush.xpose.msk.msrb.mxu1 %vm1150_vm14, %v1739_v44 }
 0x3a4   : > { %v1172_v48 = vpop.f32.mrf.mxu1 }
 0x3a5   : > { %v1175_v49 = vmul.f32 0.35355338, %v1172_v48 }
 0x3a7   : > { %v1176_v50 = vsel %vm4294_vm15, %v1175_v49, -1e+30 }
 0x3a8   : > { %v1177_v51 = vsel %vm1150_vm14, %v1176_v50, -inf }
 0x3a9   : > { %1178 = vmax.xlane.f32.xlu1 %v1177_v51 }
 0x3c2   : > { %1230 = vrot.lane.b32.xlu1 %v4269_v34, %s4857_s24  ;;  %s4466_s24 = scalar_lea.vmem %s4826_s9, %s4232_s30 }
 0x3ca   : > { %1487 = vrot.lane.b32.xlu1 %v4281_v36, %s4855_s0  ;;  %s4518_s0 = scalar_lea.vmem %s4830_s13, %s4232_s30 }
 0x3d2   : > { %1653 = vrot.lane.b32.xlu1 %v4281_v36, %s4845_s20  ;;  %s4849_s20 = smov 40  }
 0x3da   : > { %1736 = vrot.lane.b32.xlu1 %v4281_v36, %s4841_s25 }
 0x41c   : > { %v1179_v19 = vpop.xlane.xlu1 %1178 }
 0x41d   : > { %v1180_v52 = vsub.f32 %v1176_v50, %v1179_v19 }
 0x41f   : > { %v1181_v53 = vmul.f32 1.442695, %v1180_v52 }
 0x421   : > { %3921 = vpow2.f32 %v1181_v53 }
 0x427   : > { %v3922_v54 = vpop.eup %3921 }
 0x428   : > { %v1183_v55 = vsel %vm1150_vm14, %v3922_v54, 0.0 }
 0x429   : > { %1184 = vadd.xlane.f32.xlu2 %v1183_v55 }
 0x434   : > { %v1231_v56 = vpop.permute.xlu1 %1230 }
 0x435   : > { %3604 = vmatpush.xpose.msk.msrb.mxu3 %vm1150_vm14, %v1231_v56 }
 0x43c   : > { %v1488_v63 = vpop.permute.xlu1 %1487 }
 0x441   : > { %1228 = vrot.lane.b32.xlu2 %v4269_v34, %s4865_s2 }
 0x444   : > { %v1654_v8 = vpop.permute.xlu1 %1653 }
 0x449   : > { %1400 = vrot.lane.b32.xlu2 %v4269_v34, %s4841_s25  ;;  %s4853_s25 = smov 56  }
 0x44c   : > { %v1737_v10 = vpop.permute.xlu1 %1736 }
 0x451   : > { %1566 = vrot.lane.b32.xlu2 %v4281_v36, %s4865_s2  ;;  %s4537_s2 = scalar_lea.vmem %s4832_s15, %s4232_s30 }
 0x459   : > { %1651 = vrot.lane.b32.xlu2 %v4281_v36, %s4843_s22  ;;  %s4847_s22 = smov 48  }
 0x49c   : > { %v1185_v57 = vpop.xlane.xlu2 %1184 }
 0x49d   : > { %3923 = vrcp.f32 %v1185_v57  ;;  %v1197_v62 = vand.u32 2147483648, %v1185_v57  ;;  %v1195_v1 = vand.u32 2147483647, %v1185_v57  ;;  %vm1191_vm2 = vweird.f32 %v1185_v57 }
 0x49f   : > { %v1198_v3 = vor.u32 1.1754944e-38, %v1197_v62  ;;  %vm1196_vm5 = vcmp.eq.f32.partialorder %v1195_v1, 8.507059e+37 }
 0x4a3   : > { %v3924_v58 = vpop.eup %3923 }
 0x4a4   : > { %v1187_v59 = vmul.f32 %v3924_v58, %v1185_v57  ;;  %v1229_v60 = vpop.permute.xlu2 %1228  ;;  %vm1192_vm1 = vweird.f32 %v3924_v58 }
 0x4a5   : > { %vm1193_vm4 = vmor %vm1191_vm2, %vm1192_vm1 }
 0x4a6   : > { %v1188_v61 = vsub.f32 1.0, %v1187_v59 }
 0x4a8   : > { %v1189_v0 = vmul.f32 %v3924_v58, %v1188_v61 }
 0x4aa   : > { %v1190_v2 = vadd.f32 %v3924_v58, %v1189_v0 }
 0x4ac   : > { %v1401_v4 = vpop.permute.xlu2 %1400  ;;  %v1194_v5 = vsel %vm1193_vm4, %v3924_v58, %v1190_v2 }
 0x4ad   : > { %v1199_v6 = vsel %vm1196_vm5, %v1198_v3, %v1194_v5 }
 0x4ae   : > { %v1200_v7 = vmul.f32 %v3922_v54, %v1199_v6 }
 0x4b0   : > { %3603 = vmatmul.msk.f32.vlgmr.msra.gmra.mxu3 %vm1150_vm14, %v1200_v7 }
 0x4b1   : > { %3607 = vmatpush.xpose.msk.msra.mxu3 %vm1150_vm14, %v1317_v40 }
 0x4b4   : > { %v1567_v9 = vpop.permute.xlu2 %1566 }
 0x4b5   : > { %3617 = vmatmul.msk.f32.vlgmr.msra.gmra.mxu1 %vm1150_vm14, %v1567_v9 }
 0x4b8   : > { %3605 = vmatmul.msk.f32.vlgmr.msrb.gmra.mxu3 %vm1150_vm14, %v1229_v60 }
 0x4b9   : > { %3610 = vmatpush.xpose.msk.msrb.mxu3 %vm1150_vm14, %v1403_v42 }
 0x4bc   : > { %v1652_v11 = vpop.permute.xlu2 %1651 }
 0x4bd   : > { %3623 = vmatmul.msk.f32.vlgmr.msrb.gmra.mxu1 %vm1150_vm14, %v1737_v10 }
 0x4c0   : > { %3608 = vmatmul.msk.f32.vlgmr.msra.gmra.mxu3 %vm1150_vm14, %v1315_v41 }
 0x4c1   : > { %3613 = vmatpush.xpose.msk.msra.mxu3 %vm1150_vm14, %v1488_v63 }
 0x4c8   : > { %3611 = vmatmul.msk.f32.vlgmr.msrb.gmra.mxu3 %vm1150_vm14, %v1401_v4 }
 0x4c9   : > { %3619 = vmatpush.xpose.msk.msrb.mxu3 %vm1150_vm14, %v1654_v8 }
 0x4d0   : > { %3614 = vmatmul.msk.f32.vlgmr.msra.gmra.mxu3 %vm1150_vm14, %v4281_v36 }
 0x4d8   : > { %3620 = vmatmul.msk.f32.vlgmr.msrb.gmra.mxu3 %vm1150_vm14, %v1652_v11 }
 0x532   : > { %v1591_v12 = vpop.f32.mrf.mxu1 }
 0x533   : > { %v1594_v13 = vmul.f32 0.35355338, %v1591_v12  ;;  %v1224_v14 = vpop.f32.mrf.mxu3 }
 0x534   : > { %1227 = vst.msk [vmem:[#allocation2] sm:$0xff] %vm1150_vm14, %v1224_v14 }
 0x535   : > { %v1595_v15 = vsel %vm4294_vm15, %v1594_v13, -1e+30 }
 0x536   : > { %v1596_v16 = vsel %vm1150_vm14, %v1595_v15, -inf }
 0x537   : > { %1597 = vmax.xlane.f32.xlu2 %v1596_v16 }
 0x53a   : > { %v1761_v37 = vpop.f32.mrf.mxu1 }
 0x53b   : > { %v1253_v17 = vpop.f32.mrf.mxu3  ;;  %v1764_v41 = vmul.f32 0.35355338, %v1761_v37 }
 0x53c   : > { %v1256_v18 = vmul.f32 0.35355338, %v1253_v17 }
 0x53d   : > { %v1765_v44 = vsel %vm4294_vm15, %v1764_v41, -1e+30 }
 0x53e   : > { %v1257_v23 = vsel %vm4294_vm15, %v1256_v18, -1e+30  ;;  %v1766_v49 = vsel %vm1150_vm14, %v1765_v44, -inf }
 0x53f   : > { %v1258_v27 = vsel %vm1150_vm14, %v1257_v23, -inf }
 0x540   : > { %1259 = vmax.xlane.f32.xlu0 %v1258_v27 }
 0x543   : > { %v1339_v28 = vpop.f32.mrf.mxu3 }
 0x544   : > { %v1342_v29 = vmul.f32 0.35355338, %v1339_v28 }
 0x546   : > { %v1343_v30 = vsel %vm4294_vm15, %v1342_v29, -1e+30 }
 0x547   : > { %v1344_v31 = vsel %vm1150_vm14, %v1343_v30, -inf }
 0x548   : > { %1345 = vmax.xlane.f32.xlu2 %v1344_v31 }
 0x54b   : > { %v1425_v33 = vpop.f32.mrf.mxu3 }
 0x54c   : > { %v1428_v35 = vmul.f32 0.35355338, %v1425_v33 }
 0x54e   : > { %v1429_v39 = vsel %vm4294_vm15, %v1428_v35, -1e+30 }
 0x54f   : > { %v1430_v40 = vsel %vm1150_vm14, %v1429_v39, -inf }
 0x550   : > { %1431 = vmax.xlane.f32.xlu1 %v1430_v40 }
 0x553   : > { %v1510_v42 = vpop.f32.mrf.mxu3 }
 0x554   : > { %v1513_v43 = vmul.f32 0.35355338, %v1510_v42 }
 0x556   : > { %v1514_v45 = vsel %vm4294_vm15, %v1513_v43, -1e+30 }
 0x557   : > { %v1515_v48 = vsel %vm1150_vm14, %v1514_v45, -inf }
 0x558   : > { %1516 = vmax.xlane.f32.xlu0 %v1515_v48  ;;  %1767 = vmax.xlane.f32.xlu1 %v1766_v49 }
 0x55b   : > { %v1676_v50 = vpop.f32.mrf.mxu3 }
 0x55c   : > { %v1679_v51 = vmul.f32 0.35355338, %v1676_v50 }
 0x55e   : > { %v1680_v19 = vsel %vm4294_vm15, %v1679_v51, -1e+30 }
 0x55f   : > { %v1681_v52 = vsel %vm1150_vm14, %v1680_v19, -inf }
 0x560   : > { %1682 = vmax.xlane.f32.xlu2 %v1681_v52 }
 0x56c   : > { %1282 = vrot.lane.b32.xlu0 %v4269_v34, %s4853_s25 }
 0x578   : > { %1368 = vrot.lane.b32.xlu2 %v4269_v34, %s4847_s22 }
 0x5aa   : > { %v1598_v53 = vpop.xlane.xlu2 %1597 }
 0x5ab   : > { %v1599_v54 = vsub.f32 %v1595_v15, %v1598_v53 }
 0x5ad   : > { %v1600_v55 = vmul.f32 1.442695, %v1599_v54 }
 0x5af   : > { %3925 = vpow2.f32 %v1600_v55 }
 0x5b3   : > { %v1260_v56 = vpop.xlane.xlu0 %1259 }
 0x5b4   : > { %v1261_v57 = vsub.f32 %v1257_v23, %v1260_v56 }
 0x5b5   : > { %v4358_v58 = vpop.eup %3925 }
 0x5b6   : > { %v1262_v59 = vmul.f32 1.442695, %v1261_v57  ;;  %v1602_v60 = vsel %vm1150_vm14, %v4358_v58, 0.0 }
 0x5b7   : > { %1603 = vadd.xlane.f32.xlu1 %v1602_v60 }
 0x5b8   : > { %3927 = vpow2.f32 %v1262_v59 }
 0x5bb   : > { %v1346_v2 = vpop.xlane.xlu2 %1345 }
 0x5bc   : > { %v1347_v6 = vsub.f32 %v1343_v30, %v1346_v2 }
 0x5be   : > { %v4362_v61 = vpop.eup %3927  ;;  %v1348_v9 = vmul.f32 1.442695, %v1347_v6 }
 0x5bf   : > { %v1264_v62 = vsel %vm1150_vm14, %v4362_v61, 0.0 }
 0x5c0   : > { %1265 = vadd.xlane.f32.xlu0 %v1264_v62 }
 0x5c3   : > { %v1432_v63 = vpop.xlane.xlu1 %1431 }
 0x5c4   : > { %v1433_v0 = vsub.f32 %v1429_v39, %v1432_v63 }
 0x5c6   : > { %v1434_v1 = vmul.f32 1.442695, %v1433_v0 }
 0x5c8   : > { %3929 = vpow2.f32 %v1434_v1 }
 0x5cb   : > { %v1768_v3 = vpop.xlane.xlu1 %1767  ;;  %v1517_v10 = vpop.xlane.xlu0 %1516 }
 0x5cc   : > { %v1769_v4 = vsub.f32 %v1765_v44, %v1768_v3  ;;  %v1518_v13 = vsub.f32 %v1514_v45, %v1517_v10 }
 0x5ce   : > { %v4366_v5 = vpop.eup %3929  ;;  %v1770_v7 = vmul.f32 1.442695, %v1769_v4  ;;  %v1519_v15 = vmul.f32 1.442695, %v1518_v13 }
 0x5cf   : > { %v1436_v8 = vsel %vm1150_vm14, %v4366_v5, 0.0 }
 0x5d0   : > { %3931 = vpow2.f32 %v1770_v7  ;;  %1437 = vadd.xlane.f32.xlu2 %v1436_v8 }
 0x5d1   : > { %3933 = vpow2.f32 %v1348_v9 }
 0x5d2   : > { %3935 = vpow2.f32 %v1519_v15 }
 0x5d3   : > { %v1683_v11 = vpop.xlane.xlu2 %1682 }
 0x5d4   : > { %1454 = vrot.lane.b32.xlu0 %v4269_v34, %s4849_s20  ;;  %v1684_v17 = vsub.f32 %v1680_v19, %v1683_v11 }
 0x5d6   : > { %v4372_v12 = vpop.eup %3931  ;;  %v1685_v27 = vmul.f32 1.442695, %v1684_v17 }
 0x5d7   : > { %v1772_v14 = vsel %vm1150_vm14, %v4372_v12, 0.0  ;;  %v4376_v16 = vpop.eup %3933 }
 0x5d8   : > { %1773 = vadd.xlane.f32.xlu1 %v1772_v14  ;;  %v1350_v34 = vsel %vm1150_vm14, %v4376_v16, 0.0  ;;  %v4382_v28 = vpop.eup %3935  ;;  %3937 = vpow2.f32 %v1685_v27 }
 0x5d9   : > { %v1521_v29 = vsel %vm1150_vm14, %v4382_v28, 0.0 }
 0x5db   : > { %v1369_v23 = vpop.permute.xlu2 %1368 }
 0x5dc   : > { %1620 = vrot.lane.b32.xlu0 %v4281_v36, %s4853_s25  ;;  %s4890_s25 = sshll.u32 %s4907_s28, 7 }
 0x5de   : > { %v1283_v18 = vpop.permute.xlu0 %1282  ;;  %v4390_v30 = vpop.eup %3937 }
 0x5df   : > { %1303 = vmatpush.msrb.mxu2 %v1283_v18  ;;  %v1687_v31 = vsel %vm1150_vm14, %v4390_v30, 0.0 }
 0x5e0   : > { %1351 = vadd.xlane.f32.xlu1 %v1350_v34 }
 0x5e1   : > { %1389 = vmatpush.msra.mxu2 %v1369_v23 }
 0x5e4   : > { %1705 = vrot.lane.b32.xlu0 %v4281_v36, %s4847_s22  ;;  %s4859_s22 = smov 8  }
 0x5e8   : > { %1539 = vrot.lane.b32.xlu2 %v4281_v36, %s4851_s19  ;;  %1522 = vadd.xlane.f32.xlu1 %v1521_v29  ;;  %s4861_s19 = smov 24  }
 0x5f0   : > { %1688 = vadd.xlane.f32.xlu1 %v1687_v31 }
 0x609   : > { %1790 = vrot.lane.b32.xlu1 %v4281_v36, %s4849_s20  ;;  %s4863_s20 = smov 16  }
 0x62a   : > { %v4396_v44 = vpop.xlane.xlu1 %1603 }
 0x633   : > { %v1266_v33 = vpop.xlane.xlu0 %1265 }
 0x634   : > { %3939 = vrcp.f32 %v1266_v33  ;;  %v1278_v41 = vand.u32 2147483648, %v1266_v33  ;;  %v1276_v42 = vand.u32 2147483647, %v1266_v33  ;;  %vm1272_vm8 = vweird.f32 %v1266_v33 }
 0x636   : > { %v1279_v45 = vor.u32 1.1754944e-38, %v1278_v41  ;;  %vm1277_vm10 = vcmp.eq.f32.partialorder %v1276_v42, 8.507059e+37 }
 0x63a   : > { %v3940_v35 = vpop.eup %3939 }
 0x63b   : > { %v1268_v37 = vmul.f32 %v3940_v35, %v1266_v33  ;;  %vm1273_vm7 = vweird.f32 %v3940_v35 }
 0x63c   : > { %vm1274_vm9 = vmor %vm1272_vm8, %vm1273_vm7 }
 0x63d   : > { %v1269_v39 = vsub.f32 1.0, %v1268_v37 }
 0x63f   : > { %v1270_v40 = vmul.f32 %v3940_v35, %v1269_v39 }
 0x641   : > { %v1271_v43 = vadd.f32 %v3940_v35, %v1270_v40 }
 0x643   : > { %v4398_v48 = vpop.xlane.xlu2 %1437  ;;  %v1275_v49 = vsel %vm1274_vm9, %v3940_v35, %v1271_v43 }
 0x644   : > { %v1280_v36 = vsel %vm1277_vm10, %v1279_v45, %v1275_v49  ;;  %3941 = vrcp.f32 %v4398_v48  ;;  %vm1444_vm4 = vweird.f32 %v4398_v48  ;;  %v1450_v18 = vand.u32 2147483648, %v4398_v48 }
 0x645   : > { %v1281_v51 = vmul.f32 %v4362_v61, %v1280_v36  ;;  %v1448_v27 = vand.u32 2147483647, %v4398_v48 }
 0x646   : > { %v1455_v50 = vpop.permute.xlu0 %1454  ;;  %v1451_v42 = vor.u32 1.1754944e-38, %v1450_v18 }
 0x647   : > { %3606 = vmatmul.msk.f32.vlgmr.msrb.gmra.mxu2 %vm1150_vm14, %v1281_v51  ;;  %vm1449_vm8 = vcmp.eq.f32.partialorder %v1448_v27, 8.507059e+37 }
 0x648   : > { %1475 = vmatpush.msrb.mxu2 %v1455_v50 }
 0x64a   : > { %v3942_v54 = vpop.eup %3941 }
 0x64b   : > { %v1540_v19 = vpop.permute.xlu2 %1539  ;;  %v4402_v52 = vpop.xlane.xlu1 %1773  ;;  %v1440_v56 = vmul.f32 %v3942_v54, %v4398_v48  ;;  %vm1445_vm13 = vweird.f32 %v3942_v54 }
 0x64c   : > { %1560 = vmatpush.msrb.mxu0 %v1540_v19  ;;  %vm4416_vm5 = vmor %vm1444_vm4, %vm1445_vm13  ;;  %vm1610_vm13 = vweird.f32 %v4396_v44  ;;  %v1616_v19 = vand.u32 2147483648, %v4396_v44 }
 0x64d   : > { %v1441_v60 = vsub.f32 1.0, %v1440_v56 }
 0x64e   : > { %v1621_v53 = vpop.permute.xlu0 %1620 }
 0x64f   : > { %v1442_v2 = vmul.f32 %v3942_v54, %v1441_v60 }
 0x651   : > { %v1443_v10 = vadd.f32 %v3942_v54, %v1442_v2 }
 0x653   : > { %v1352_v55 = vpop.xlane.xlu1 %1351  ;;  %v1447_v35 = vsel %vm4416_vm5, %v3942_v54, %v1443_v10 }
 0x654   : > { %3943 = vrcp.f32 %v1352_v55  ;;  %v1364_v3 = vand.u32 2147483648, %v1352_v55  ;;  %v1362_v6 = vand.u32 2147483647, %v1352_v55  ;;  %vm1358_vm12 = vweird.f32 %v1352_v55 }
 0x655   : > { %3945 = vrcp.f32 %v4396_v44  ;;  %v1452_v48 = vsel %vm1449_vm8, %v1451_v42, %v1447_v35 }
 0x656   : > { %v1706_v57 = vpop.permute.xlu0 %1705  ;;  %v1365_v11 = vor.u32 1.1754944e-38, %v1364_v3  ;;  %vm1363_vm2 = vcmp.eq.f32.partialorder %v1362_v6, 8.507059e+37 }
 0x657   : > { %1726 = vmatpush.msra.mxu0 %v1706_v57  ;;  %v1453_v57 = vmul.f32 %v4366_v5, %v1452_v48 }
 0x65a   : > { %v3944_v59 = vpop.eup %3943 }
 0x65b   : > { %v4407_v61 = vpop.eup %3945  ;;  %v1354_v62 = vmul.f32 %v3944_v59, %v1352_v55  ;;  %v1523_v63 = vpop.xlane.xlu1 %1522  ;;  %vm1359_vm11 = vweird.f32 %v3944_v59  ;;  %v1614_v55 = vand.u32 2147483647, %v4396_v44 }
 0x65c   : > { %3947 = vrcp.f32 %v1523_v63  ;;  %v1606_v1 = vmul.f32 %v4407_v61, %v4396_v44  ;;  %vm1360_vm1 = vmor %vm1358_vm12, %vm1359_vm11  ;;  %v1535_v37 = vand.u32 2147483648, %v1523_v63  ;;  %v1533_v41 = vand.u32 2147483647, %v1523_v63 }
 0x65d   : > { %v1355_v0 = vsub.f32 1.0, %v1354_v62  ;;  %3949 = vrcp.f32 %v4402_v52  ;;  %vm1529_vm9 = vweird.f32 %v1523_v63  ;;  %vm1611_vm10 = vweird.f32 %v4407_v61 }
 0x65e   : > { %v1607_v9 = vsub.f32 1.0, %v1606_v1  ;;  %v1536_v49 = vor.u32 1.1754944e-38, %v1535_v37  ;;  %vm1534_vm12 = vcmp.eq.f32.partialorder %v1533_v41, 8.507059e+37  ;;  %v1617_v44 = vor.u32 1.1754944e-38, %v1616_v19 }
 0x65f   : > { %v1356_v4 = vmul.f32 %v3944_v59, %v1355_v0  ;;  %vm1615_vm4 = vcmp.eq.f32.partialorder %v1614_v55, 8.507059e+37 }
 0x660   : > { %v1608_v33 = vmul.f32 %v4407_v61, %v1607_v9 }
 0x661   : > { %v1357_v7 = vadd.f32 %v3944_v59, %v1356_v4  ;;  %v1786_v4 = vand.u32 2147483648, %v4402_v52 }
 0x662   : > { %v3948_v8 = vpop.eup %3947  ;;  %v1609_v45 = vadd.f32 %v4407_v61, %v1608_v33 }
 0x663   : > { %v1361_v13 = vsel %vm1360_vm1, %v3944_v59, %v1357_v7  ;;  %v1525_v14 = vmul.f32 %v3948_v8, %v1523_v63  ;;  %v1689_v15 = vpop.xlane.xlu1 %1688  ;;  %v4412_v17 = vpop.eup %3949  ;;  %vm1530_vm7 = vweird.f32 %v3948_v8  ;;  %vm4432_vm1 = vmor %vm1610_vm13, %vm1611_vm10  ;;  %vm1780_vm10 = vweird.f32 %v4402_v52 }
 0x664   : > { %v1366_v23 = vsel %vm1363_vm2, %v1365_v11, %v1361_v13  ;;  %3951 = vrcp.f32 %v1689_v15  ;;  %v1776_v39 = vmul.f32 %v4412_v17, %v4402_v52  ;;  %vm1531_vm11 = vmor %vm1529_vm9, %vm1530_vm7  ;;  %v1613_v60 = vsel %vm4432_vm1, %v4407_v61, %v1609_v45 }
 0x665   : > { %v1526_v29 = vsub.f32 1.0, %v1525_v14  ;;  %v1367_v31 = vmul.f32 %v4376_v16, %v1366_v23  ;;  %v1701_v62 = vand.u32 2147483648, %v1689_v15  ;;  %v1699_v1 = vand.u32 2147483647, %v1689_v15 }
 0x666   : > { %v1777_v36 = vsub.f32 1.0, %v1776_v39  ;;  %vm1695_vm5 = vweird.f32 %v1689_v15  ;;  %v1618_v5 = vsel %vm1615_vm4, %v1617_v44, %v1613_v60  ;;  %vm1781_vm8 = vweird.f32 %v4412_v17 }
 0x667   : > { %v1527_v40 = vmul.f32 %v3948_v8, %v1526_v29  ;;  %3609 = vmatmul.msk.f32.vlgmr.msra.gmra.mxu2 %vm1150_vm14, %v1367_v31  ;;  %vm1700_vm9 = vcmp.eq.f32.partialorder %v1699_v1, 8.507059e+37  ;;  %v1784_v7 = vand.u32 2147483647, %v4402_v52  ;;  %v1787_v11 = vor.u32 1.1754944e-38, %v1786_v4 }
 0x668   : > { %1641 = vmatpush.msra.mxu2 %v1621_v53  ;;  %v1778_v63 = vmul.f32 %v4412_v17, %v1777_v36  ;;  %vm1312_vm13 = vcmask 130112   ;;  %vm1398_vm1 = vcmask 195712  }
 0x669   : > { %v1528_v43 = vadd.f32 %v3948_v8, %v1527_v40 }
 0x66a   : > { %v3952_v16 = vpop.eup %3951  ;;  %v1779_v3 = vadd.f32 %v4412_v17, %v1778_v63 }
 0x66b   : > { %v1691_v50 = vmul.f32 %v3952_v16, %v1689_v15  ;;  %v1532_v51 = vsel %vm1531_vm11, %v3948_v8, %v1528_v43  ;;  %vm1696_vm2 = vweird.f32 %v3952_v16  ;;  %v1619_v8 = vmul.f32 %v4358_v58, %v1618_v5  ;;  %vm1782_vm11 = vmor %vm1780_vm10, %vm1781_vm8  ;;  %v3902_v43 = vld [vmem:[%s4466_s24] ss:$0 sm:$0xff] }
 0x66c   : > { %v1537_v53 = vsel %vm1534_vm12, %v1536_v49, %v1532_v51  ;;  %vm1697_vm7 = vmor %vm1695_vm5, %vm1696_vm2  ;;  %v1783_v10 = vsel %vm1782_vm11, %v4412_v17, %v1779_v3  ;;  %vm1785_vm12 = vcmp.eq.f32.partialorder %v1784_v7, 8.507059e+37  ;;  %vm1484_vm2 = vcmask 261312  }
 0x66d   : > { %v1692_v56 = vsub.f32 1.0, %v1691_v50  ;;  %v1538_v59 = vmul.f32 %v4382_v28, %v1537_v53  ;;  %v1702_v28 = vor.u32 1.1754944e-38, %v1701_v62  ;;  %v1788_v13 = vsel %vm1785_vm12, %v1787_v11, %v1783_v10 }
 0x66e   : > { %v1789_v15 = vmul.f32 %v4372_v12, %v1788_v13 }
 0x66f   : > { %v1693_v0 = vmul.f32 %v3952_v16, %v1692_v56  ;;  %3612 = vmatmul.msk.f32.vlgmr.msrb.gmra.mxu2 %vm1150_vm14, %v1453_v57  ;;  %3615 = vmatmul.msk.f32.vlgmr.msrb.gmra.mxu0 %vm1150_vm14, %v1538_v59 }
 0x671   : > { %v1694_v2 = vadd.f32 %v3952_v16, %v1693_v0  ;;  %v3842_v0 = vld [vmem:[%s4524_s5 + $0x8] sm:$0xff] }
 0x673   : > { %v1698_v61 = vsel %vm1697_vm7, %v3952_v16, %v1694_v2  ;;  %v3841_v2 = vld [vmem:[%s4524_s5] sm:$0xff] }
 0x674   : > { %v1703_v6 = vsel %vm1700_vm9, %v1702_v28, %v1698_v61 }
 0x675   : > { %v1704_v9 = vmul.f32 %v4390_v30, %v1703_v6 }
 0x677   : > { %3618 = vmatmul.msk.f32.vlgmr.msra.gmra.mxu2 %vm1150_vm14, %v1619_v8  ;;  %3621 = vmatmul.msk.f32.vlgmr.msra.gmra.mxu0 %vm1150_vm14, %v1704_v9 }
 0x67b   : > { %v1791_v14 = vpop.permute.xlu1 %1790 }
 0x67c   : > { %1811 = vmatpush.msrb.mxu2 %v1791_v14 }
 0x67f   : > { %3624 = vmatmul.msk.f32.vlgmr.msrb.gmra.mxu2 %vm1150_vm14, %v1789_v15 }
 0x6ca   : > { %v1305_v58 = vpop.f32.mrf.mxu2 }
 0x6cb   : > { %1309 = vrot.lane.b32.xlu2 %v1305_v58, %s4859_s22 }
 0x6ea   : > { %v1391_v30 = vpop.f32.mrf.mxu2 }
 0x6eb   : > { %1395 = vrot.lane.b32.xlu2 %v1391_v30, %s4863_s20 }
 0x6ec   : > { %v1562_v52 = vpop.f32.mrf.mxu0 }
 0x6ed   : > { %1565 = vst.msk [vmem:[#allocation2 + $0x8] sm:$0xff] %vm1150_vm14, %v1562_v52 }
 0x6f2   : > { %v1477_v17 = vpop.f32.mrf.mxu2 }
 0x6f3   : > { %1481 = vrot.lane.b32.xlu2 %v1477_v17, %s4861_s19 }
 0x6f4   : > { %v1728_v12 = vpop.f32.mrf.mxu0 }
 0x6fa   : > { %v1643_v18 = vpop.f32.mrf.mxu2 }
 0x6fb   : > { %1647 = vrot.lane.b32.xlu0 %v1643_v18, %s4859_s22  ;;  %s4477_s22 = scalar_lea.vmem %s4889_s8, %s4253_s29  ;;  %s4544_s8 = scalar_lea.vmem %s4831_s14, %s4890_s25 }
 0x6fc   : > { %v3840_v31 = vld [vmem:[%s4477_s22 + $0x8] sm:$0xff]  ;;  %v3839_v33 = vld [vmem:[%s4477_s22] sm:$0xff]  ;;  %s4899_s25 = smov 104  }
 0x6fd   : > { %1853 = vmatpush.bf16.msra.mxu3 %v3840_v31 }
 0x701   : > { %1854 = vmatpush.bf16.msra.mxu3 %v3839_v33 }
 0x702   : > { %v1813_v23 = vpop.f32.mrf.mxu2 }
 0x703   : > { %1817 = vrot.lane.b32.xlu1 %v1813_v23, %s4861_s19  ;;  %1732 = vrot.lane.b32.xlu0 %v1728_v12, %s4863_s20  ;;  %s4495_s19 = scalar_lea.vmem %s4827_s10, %s4232_s30  ;;  %v3904_v12 = vld [vmem:[%s4501_s3] ss:$0 sm:$0xff]  ;;  %s4898_s20 = smov 112  }
 0x704   : > { %v3903_v30 = vld [vmem:[%s4495_s19] ss:$0 sm:$0xff] }
 0x705   : > { %1949 = vmatpush.bf16.msrb.mxu3 %v3842_v0 }
 0x709   : > { %1950 = vmatpush.bf16.msrb.mxu3 %v3841_v2 }
 0x725   : > { %v1310_v34 = vpop.permute.xlu2 %1309 }
 0x726   : > { %1313 = vst.msk [vmem:[#allocation2] sm:$0xff] %vm1312_vm13, %v1310_v34 }
 0x745   : > { %v1396_v27 = vpop.permute.xlu2 %1395 }
 0x746   : > { %1399 = vst.msk [vmem:[#allocation2] sm:$0xff] %vm1398_vm1, %v1396_v27 }
 0x74d   : > { %v1482_v29 = vpop.permute.xlu2 %1481 }
 0x74e   : > { %1485 = vst.msk [vmem:[#allocation2] sm:$0xff] %vm1484_vm2, %v1482_v29 }
 0x755   : > { %v1821_v40 = vld [vmem:[#allocation2] sm:$0xff] }
 0x76d   : > { %v1648_v35 = vpop.permute.xlu0 %1647 }
 0x76e   : > { %1650 = vst.msk [vmem:[#allocation2 + $0x8] sm:$0xff] %vm1312_vm13, %v1648_v35  ;;  %v3850_v35 = vld [vmem:[%s4544_s8 + $0x38] sm:$0xff] }
 0x76f   : > { %2044 = vmatpush.bf16.msra.mxu1 %v3850_v35 }
 0x775   : > { %v1818_v37 = vpop.permute.xlu1 %1817  ;;  %v1733_v39 = vpop.permute.xlu0 %1732 }
 0x776   : > { %1735 = vst.msk [vmem:[#allocation2 + $0x8] sm:$0xff] %vm1398_vm1, %v1733_v39  ;;  %v3848_v39 = vld [vmem:[%s4544_s8 + $0x28] sm:$0xff] }
 0x777   : > { %1820 = vst.msk [vmem:[#allocation2 + $0x8] sm:$0xff] %vm1484_vm2, %v1818_v37  ;;  %v3849_v37 = vld [vmem:[%s4544_s8 + $0x30] sm:$0xff] }
 0x778   : > { %2045 = vmatpush.bf16.msra.mxu1 %v3849_v37 }
 0x77c   : > { %2046 = vmatpush.bf16.msra.mxu1 %v3848_v39 }
 0x77e   : > { %v1822_v41 = vld [vmem:[#allocation2 + $0x8] sm:$0xff] }
 0x77f   : > { %v1828_v42 = vpack.c.bf16 %v1822_v41, %v1821_v40  ;;  %v3847_v40 = vld [vmem:[%s4544_s8 + $0x20] sm:$0xff]  ;;  %v3846_v41 = vld [vmem:[%s4544_s8 + $0x18] sm:$0xff] }
 0x780   : > { %2047 = vmatpush.bf16.msra.mxu1 %v3847_v40 }
 0x781   : > { %3633 = vmatmul.msk.bf16.vlgmr.msra.gmra.mxu3 %vm1047_vm6, %v1828_v42  ;;  %v3845_v42 = vld [vmem:[%s4544_s8 + $0x10] sm:$0xff] }
 0x784   : > { %2048 = vmatpush.bf16.msra.mxu1 %v3846_v41 }
 0x788   : > { %2049 = vmatpush.bf16.msra.mxu1 %v3845_v42 }
 0x804   : > { %v1856_v16 = vpop.f32.mrf.mxu3 }
 0x805   : > { %v1857_v45 = vadd.f32 %v3902_v43, %v1856_v16  ;;  %v3844_v16 = vld [vmem:[%s4544_s8 + $0x8] sm:$0xff] }
 0x806   : > { %2050 = vmatpush.bf16.msra.mxu1 %v3844_v16 }
 0x807   : > { %v4487_v48 = vadd.f32 %v1857_v45, %v4215_v32 }
 0x809   : > { %v1865_v49 = vsel %vm1047_vm6, %v4487_v48, 0.0 }
 0x80a   : > { %1866 = vadd.xlane.f32.xlu0 %v1865_v49  ;;  %v3843_v49 = vld [vmem:[%s4544_s8] sm:$0xff] }
 0x80b   : > { %2051 = vmatpush.bf16.msra.mxu1 %v3843_v49 }
 0x80c   : > { %v1858_v36 = vpop.f32.mrf.mxu3 }
 0x80d   : > { %v1859_v50 = vadd.f32 %v3902_v43, %v1858_v36  ;;  %v3905_v43 = vld [vmem:[%s4518_s0] ss:$0 sm:$0xff] }
 0x80f   : > { %v4504_v32 = vadd.f32 %v1859_v50, %v4219_v38 }
 0x811   : > { %v1868_v51 = vsel %vm1047_vm6, %v4504_v32, 0.0 }
 0x812   : > { %1869 = vadd.xlane.f32.xlu2 %v1868_v51 }
 0x87d   : > { %v1867_v19 = vpop.xlane.xlu0 %1866 }
 0x87e   : > { %v1871_v53 = vmul.f32 %v1867_v19, %v4223_v46 }
 0x880   : > { %v1873_v54 = vsub.f32 %v4487_v48, %v1871_v53 }
 0x882   : > { %v1875_v55 = vmul.f32 %v1873_v54, %v1873_v54 }
 0x884   : > { %v1877_v56 = vsel %vm1047_vm6, %v1875_v55, 0.0 }
 0x885   : > { %v1870_v57 = vpop.xlane.xlu2 %1869  ;;  %1878 = vadd.xlane.f32.xlu1 %v1877_v56 }
 0x886   : > { %v1872_v59 = vmul.f32 %v1870_v57, %v4223_v46 }
 0x888   : > { %v1874_v38 = vsub.f32 %v4504_v32, %v1872_v59 }
 0x88a   : > { %v1876_v60 = vmul.f32 %v1874_v38, %v1874_v38 }
 0x88c   : > { %v1880_v62 = vsel %vm1047_vm6, %v1876_v60, 0.0 }
 0x88d   : > { %1881 = vadd.xlane.f32.xlu0 %v1880_v62 }
 0x8f8   : > { %v1879_v63 = vpop.xlane.xlu1 %1878 }
 0x8f9   : > { %v1883_v1 = vmul.f32 %v1879_v63, %v4223_v46 }
 0x8fb   : > { %v1885_v44 = vadd.f32 1e-05, %v1883_v1 }
 0x8fd   : > { %3953 = vrsqrt.f32 %v1885_v44  ;;  %vm1893_vm5 = vweird.f32 %v1885_v44 }
 0x900   : > { %v1882_v5 = vpop.xlane.xlu0 %1881 }
 0x901   : > { %v1884_v28 = vmul.f32 %v1882_v5, %v4223_v46 }
 0x903   : > { %v3954_v3 = vpop.eup %3953  ;;  %v1886_v61 = vadd.f32 1e-05, %v1884_v28 }
 0x904   : > { %v1888_v4 = vmul.f32 %v3954_v3, %v1885_v44  ;;  %vm1894_vm4 = vweird.f32 %v3954_v3 }
 0x905   : > { %3955 = vrsqrt.f32 %v1886_v61  ;;  %vm1895_vm7 = vmor %vm1893_vm5, %vm1894_vm4  ;;  %vm1903_vm9 = vweird.f32 %v1886_v61 }
 0x906   : > { %v1889_v6 = vmul.f32 %v3954_v3, %v1888_v4  ;;  %v3906_v4 = vld [vmem:[%s4537_s2] ss:$0 sm:$0xff] }
 0x908   : > { %v1890_v7 = vmul.f32 0.5, %v1889_v6 }
 0x90a   : > { %v1891_v8 = vsub.f32 1.5, %v1890_v7 }
 0x90b   : > { %v3956_v9 = vpop.eup %3955 }
 0x90c   : > { %v1892_v10 = vmul.f32 %v3954_v3, %v1891_v8  ;;  %v1898_v11 = vmul.f32 %v3956_v9, %v1886_v61  ;;  %vm1904_vm8 = vweird.f32 %v3956_v9 }
 0x90d   : > { %vm1905_vm10 = vmor %vm1903_vm9, %vm1904_vm8 }
 0x90e   : > { %v1899_v13 = vmul.f32 %v3956_v9, %v1898_v11  ;;  %v1896_v14 = vsel %vm1895_vm7, %v3954_v3, %v1892_v10 }
 0x90f   : > { %v1907_v52 = vmul.f32 %v1896_v14, %v1873_v54 }
 0x910   : > { %v1900_v15 = vmul.f32 0.5, %v1899_v13 }
 0x911   : > { %v1912_v23 = vmul.f32 %v3903_v30, %v1907_v52 }
 0x912   : > { %v1901_v58 = vsub.f32 1.5, %v1900_v15 }
 0x913   : > { %v1917_v29 = vadd.f32 %v3904_v12, %v1912_v23 }
 0x914   : > { %v1902_v17 = vmul.f32 %v3956_v9, %v1901_v58 }
 0x916   : > { %v1906_v18 = vsel %vm1905_vm10, %v3956_v9, %v1902_v17 }
 0x917   : > { %v1908_v34 = vmul.f32 %v1906_v18, %v1874_v38 }
 0x919   : > { %v1913_v27 = vmul.f32 %v3903_v30, %v1908_v34 }
 0x91b   : > { %v1918_v31 = vadd.f32 %v3904_v12, %v1913_v27  ;;  %v3852_v27 = vld [vmem:[%s4259_s1 + $0x18] sm:$0xff] }
 0x91c   : > { %2150 = vmatpush.bf16.msra.mxu2 %v3852_v27 }
 0x91d   : > { %v1924_v33 = vpack.c.bf16 %v1918_v31, %v1917_v29 }
 0x91f   : > { %3642 = vmatmul.msk.bf16.vlgmr.msrb.gmra.mxu3 %vm1047_vm6, %v1924_v33  ;;  %v3851_v33 = vld [vmem:[%s4259_s1 + $0x10] sm:$0xff]  ;;  %s4896_s1 = smov 64  }
 0x920   : > { %2151 = vmatpush.bf16.msra.mxu2 %v3851_v33 }
 0x9a2   : > { %v1952_v45 = vpop.f32.mrf.mxu3 }
 0x9a3   : > { %v1953_v36 = vadd.f32 %v3905_v43, %v1952_v45 }
 0x9a5   : > { %v1957_v50 = vmul.f32 %v1953_v36, %v1953_v36 }
 0x9a7   : > { %v1959_v51 = vmul.f32 %v1957_v50, %v1953_v36 }
 0x9a9   : > { %v1961_v19 = vmul.f32 0.044715, %v1959_v51 }
 0x9aa   : > { %v1954_v53 = vpop.f32.mrf.mxu3 }
 0x9ab   : > { %v1963_v54 = vadd.f32 %v1961_v19, %v1953_v36  ;;  %v1955_v55 = vadd.f32 %v3905_v43, %v1954_v53 }
 0x9ad   : > { %v1965_v56 = vmul.f32 0.7978846, %v1963_v54  ;;  %v1958_v57 = vmul.f32 %v1955_v55, %v1955_v55  ;;  %v3899_v54 = vld [vmem:[%s4238_s21 + $0x1] ss:$0 sm:$0xff]  ;;  %s4893_s21 = smov 96  }
 0x9af   : > { %v1960_v59 = vmul.f32 %v1958_v57, %v1955_v55  ;;  %3957 = vtanh.f32 %v1965_v56 }
 0x9b1   : > { %v1962_v38 = vmul.f32 0.044715, %v1960_v59  ;;  %v3900_v59 = vld [vmem:[%s4244_s23 + $0x1] ss:$0 sm:$0xff]  ;;  %s4894_s23 = smov 80  }
 0x9b3   : > { %v1964_v60 = vadd.f32 %v1962_v38, %v1955_v55 }
 0x9b5   : > { %v1966_v62 = vmul.f32 0.7978846, %v1964_v60  ;;  %v3958_v63 = vpop.eup %3957 }
 0x9b6   : > { %v1969_v0 = vadd.f32 1.0, %v3958_v63 }
 0x9b7   : > { %3959 = vtanh.f32 %v1966_v62 }
 0x9b8   : > { %v1971_v44 = vmul.f32 0.5, %v1969_v0 }
 0x9ba   : > { %v1973_v28 = vmul.f32 %v1971_v44, %v1953_v36  ;;  %v3907_v44 = vld [vmem:[%s4250_s26 + $0x1] ss:$0 sm:$0xff]  ;;  %s4895_s26 = smov 56  }
 0x9bd   : > { %v3960_v1 = vpop.eup %3959 }
 0x9be   : > { %v1970_v2 = vadd.f32 1.0, %v3960_v1 }
 0x9c0   : > { %v1972_v5 = vmul.f32 0.5, %v1970_v2 }
 0x9c2   : > { %v1974_v3 = vmul.f32 %v1972_v5, %v1955_v55 }
 0x9c4   : > { %v1992_v61 = vpack.c.bf16 %v1974_v3, %v1973_v28 }
 0x9c6   : > { %2052 = vmatmul.bf16.vlgmr.msra.gmra.mxu1 %v1992_v61 }
 0xa43   : > { %v2053_v6 = vpop.f32.mrf.mxu1 }
 0xa44   : > { %v2054_v7 = vadd.f32 %v3906_v4, %v2053_v6 }
 0xa46   : > { %v4557_v8 = vadd.f32 %v2054_v7, %v4487_v48 }
 0xa48   : > { %v2064_v9 = vsel %vm1047_vm6, %v4557_v8, 0.0 }
 0xa49   : > { %2065 = vadd.xlane.f32.xlu2 %v2064_v9 }
 0xa4b   : > { %v2055_v10 = vpop.f32.mrf.mxu1 }
 0xa4c   : > { %v2056_v11 = vadd.f32 %v3906_v4, %v2055_v10 }
 0xa4e   : > { %v4562_v13 = vadd.f32 %v2056_v11, %v4504_v32 }
 0xa50   : > { %v2067_v14 = vsel %vm1047_vm6, %v4562_v13, 0.0 }
 0xa51   : > { %2068 = vadd.xlane.f32.xlu1 %v2067_v14 }
 0xabc   : > { %v2066_v15 = vpop.xlane.xlu2 %2065 }
 0xabd   : > { %v2070_v58 = vmul.f32 %v2066_v15, %v4223_v46 }
 0xabf   : > { %v2072_v48 = vsub.f32 %v4557_v8, %v2070_v58 }
 0xac1   : > { %v2074_v30 = vmul.f32 %v2072_v48, %v2072_v48 }
 0xac3   : > { %v2076_v52 = vsel %vm1047_vm6, %v2074_v30, 0.0 }
 0xac4   : > { %v2069_v17 = vpop.xlane.xlu1 %2068  ;;  %2077 = vadd.xlane.f32.xlu0 %v2076_v52 }
 0xac5   : > { %v2071_v18 = vmul.f32 %v2069_v17, %v4223_v46 }
 0xac7   : > { %v2073_v32 = vsub.f32 %v4562_v13, %v2071_v18 }
 0xac9   : > { %v2075_v12 = vmul.f32 %v2073_v32, %v2073_v32 }
 0xacb   : > { %v2079_v23 = vsel %vm1047_vm6, %v2075_v12, 0.0 }
 0xacc   : > { %2080 = vadd.xlane.f32.xlu2 %v2079_v23 }
 0xb37   : > { %v2078_v34 = vpop.xlane.xlu0 %2077 }
 0xb38   : > { %v2082_v29 = vmul.f32 %v2078_v34, %v4223_v46 }
 0xb3a   : > { %v2084_v31 = vadd.f32 1e-05, %v2082_v29 }
 0xb3c   : > { %3961 = vrsqrt.f32 %v2084_v31  ;;  %vm2092_vm12 = vweird.f32 %v2084_v31 }
 0xb3f   : > { %v2081_v35 = vpop.xlane.xlu2 %2080 }
 0xb40   : > { %v2083_v37 = vmul.f32 %v2081_v35, %v4223_v46 }
 0xb42   : > { %v3962_v39 = vpop.eup %3961  ;;  %v2085_v40 = vadd.f32 1e-05, %v2083_v37 }
 0xb43   : > { %v2087_v41 = vmul.f32 %v3962_v39, %v2084_v31  ;;  %vm2093_vm11 = vweird.f32 %v3962_v39 }
 0xb44   : > { %3963 = vrsqrt.f32 %v2085_v40  ;;  %vm2094_vm4 = vmor %vm2092_vm12, %vm2093_vm11  ;;  %vm2102_vm7 = vweird.f32 %v2085_v40 }
 0xb45   : > { %v2088_v42 = vmul.f32 %v3962_v39, %v2087_v41 }
 0xb47   : > { %v2089_v43 = vmul.f32 0.5, %v2088_v42 }
 0xb49   : > { %v2090_v16 = vsub.f32 1.5, %v2089_v43 }
 0xb4a   : > { %v3964_v45 = vpop.eup %3963 }
 0xb4b   : > { %v2091_v49 = vmul.f32 %v3962_v39, %v2090_v16  ;;  %v2097_v36 = vmul.f32 %v3964_v45, %v2085_v40  ;;  %vm2103_vm5 = vweird.f32 %v3964_v45 }
 0xb4c   : > { %vm2104_vm8 = vmor %vm2102_vm7, %vm2103_vm5 }
 0xb4d   : > { %v2098_v50 = vmul.f32 %v3964_v45, %v2097_v36  ;;  %v2095_v51 = vsel %vm2094_vm4, %v3962_v39, %v2091_v49 }
 0xb4e   : > { %v2106_v55 = vmul.f32 %v2095_v51, %v2072_v48 }
 0xb4f   : > { %v2099_v19 = vmul.f32 0.5, %v2098_v50 }
 0xb50   : > { %v2111_v38 = vmul.f32 %v3899_v54, %v2106_v55 }
 0xb51   : > { %v2100_v53 = vsub.f32 1.5, %v2099_v19 }
 0xb52   : > { %v2116_v63 = vadd.f32 %v3900_v59, %v2111_v38 }
 0xb53   : > { %v2101_v56 = vmul.f32 %v3964_v45, %v2100_v53 }
 0xb55   : > { %v2105_v57 = vsel %vm2104_vm8, %v3964_v45, %v2101_v56 }
 0xb56   : > { %v2107_v60 = vmul.f32 %v2105_v57, %v2073_v32 }
 0xb58   : > { %v2112_v62 = vmul.f32 %v3899_v54, %v2107_v60 }
 0xb5a   : > { %v2117_v0 = vadd.f32 %v3900_v59, %v2112_v62 }
 0xb5c   : > { %v2125_v1 = vpack.c.bf16 %v2117_v0, %v2116_v63 }
 0xb5e   : > { %3690 = vmatmul.msk.bf16.vlgmr.msra.gmra.mxu2 %vm1047_vm6, %v2125_v1 }
 0xbe1   : > { %v2153_v2 = vpop.f32.mrf.mxu2 }
 0xbe2   : > { %v4580_v5 = vadd.f32 %v3907_v44, %v2153_v2 }
 0xbe4   : > { %2238 = vrot.lane.b32.xlu2 %v4580_v5, %s4891_s6  ;;  %2240 = vrot.lane.b32.xlu0 %v4580_v5, %s4892_s7 }
 0xbe5   : > { %2159 = vrot.lane.b32.xlu1 %v4580_v5, %s4893_s21 }
 0xbe9   : > { %v2155_v4 = vpop.f32.mrf.mxu2 }
 0xbea   : > { %v4615_v37 = vadd.f32 %v3907_v44, %v2155_v4 }
 0xbec   : > { %2325 = vrot.lane.b32.xlu2 %v4580_v5, %s4894_s23 }
 0xc3e   : > { %v2239_v61 = vpop.permute.xlu2 %2238 }
 0xc46   : > { %v2326_v33 = vpop.permute.xlu2 %2325 }
 0xc56   : > { %v2241_v28 = vpop.permute.xlu0 %2240 }
 0xc57   : > { %v2160_v3 = vpop.permute.xlu1 %2159  ;;  %3694 = vmatpush.xpose.msk.msrb.mxu2 %vm1150_vm14, %v2241_v28 }
 0xc58   : > { %3691 = vmatpush.xpose.msk.msra.mxu3 %vm1150_vm14, %v2160_v3 }
 0xc5a   : > { %3695 = vmatmul.msk.f32.vlgmr.msrb.gmra.mxu2 %vm1150_vm14, %v2239_v61 }
 0xc5b   : > { %3692 = vmatmul.msk.f32.vlgmr.msra.gmra.mxu3 %vm1150_vm14, %v4580_v5 }
 0xcdd   : > { %v2263_v6 = vpop.f32.mrf.mxu2 }
 0xcde   : > { %v2182_v7 = vpop.f32.mrf.mxu3  ;;  %v2266_v9 = vmul.f32 0.35355338, %v2263_v6 }
 0xcdf   : > { %v2185_v10 = vmul.f32 0.35355338, %v2182_v7 }
 0xce0   : > { %v2267_v11 = vsel %vm4294_vm15, %v2266_v9, -1e+30 }
 0xce1   : > { %v2268_v14 = vsel %vm1150_vm14, %v2267_v11, -inf  ;;  %v2186_v15 = vsel %vm4294_vm15, %v2185_v10, -1e+30 }
 0xce2   : > { %2269 = vmax.xlane.f32.xlu1 %v2268_v14  ;;  %v2187_v58 = vsel %vm1150_vm14, %v2186_v15, -inf }
 0xce3   : > { %2188 = vmax.xlane.f32.xlu0 %v2187_v58 }
 0xcf7   : > { %2292 = vrot.lane.b32.xlu0 %v4580_v5, %s4895_s26 }
 0xcfb   : > { %2211 = vrot.lane.b32.xlu1 %v4580_v5, %s4896_s1 }
 0xd03   : > { %2410 = vrot.lane.b32.xlu1 %v4580_v5, %s4897_s4 }
 0xd55   : > { %v2270_v48 = vpop.xlane.xlu1 %2269 }
 0xd56   : > { %v2189_v30 = vpop.xlane.xlu0 %2188  ;;  %v2271_v52 = vsub.f32 %v2267_v11, %v2270_v48 }
 0xd57   : > { %v2190_v17 = vsub.f32 %v2186_v15, %v2189_v30 }
 0xd58   : > { %v2272_v18 = vmul.f32 1.442695, %v2271_v52 }
 0xd59   : > { %v2191_v32 = vmul.f32 1.442695, %v2190_v17 }
 0xd5a   : > { %3965 = vpow2.f32 %v2272_v18 }
 0xd5b   : > { %3967 = vpow2.f32 %v2191_v32 }
 0xd60   : > { %v3966_v12 = vpop.eup %3965 }
 0xd61   : > { %v3968_v23 = vpop.eup %3967  ;;  %v2274_v34 = vsel %vm1150_vm14, %v3966_v12, 0.0 }
 0xd62   : > { %v2193_v27 = vsel %vm1150_vm14, %v3968_v23, 0.0  ;;  %2275 = vadd.xlane.f32.xlu0 %v2274_v34 }
 0xd63   : > { %2194 = vadd.xlane.f32.xlu2 %v2193_v27 }
 0xd69   : > { %v2293_v29 = vpop.permute.xlu0 %2292 }
 0xd6a   : > { %2313 = vmatpush.msrb.mxu3 %v2293_v29 }
 0xd6d   : > { %v2212_v31 = vpop.permute.xlu1 %2211 }
 0xd6e   : > { %2232 = vmatpush.msrb.mxu0 %v2212_v31 }
 0xd70   : > { %3697 = vmatpush.xpose.msk.msra.mxu0 %vm1150_vm14, %v2326_v33 }
 0xd75   : > { %v2411_v35 = vpop.permute.xlu1 %2410 }
 0xd76   : > { %2323 = vrot.lane.b32.xlu0 %v4580_v5, %s4898_s20  ;;  %3700 = vmatpush.xpose.msk.msra.mxu3 %vm1150_vm14, %v2411_v35 }
 0xd7b   : > { %2408 = vrot.lane.b32.xlu2 %v4580_v5, %s4899_s25 }
 0xd83   : > { %2494 = vrot.lane.b32.xlu2 %v4615_v37, %s4893_s21  ;;  %s4900_s21 = smov 40  }
 0xd8b   : > { %2660 = vrot.lane.b32.xlu2 %v4615_v37, %s4894_s23  ;;  %s4901_s23 = smov 48  }
 0xdd5   : > { %v2276_v39 = vpop.xlane.xlu0 %2275 }
 0xdd6   : > { %v2195_v40 = vpop.xlane.xlu2 %2194  ;;  %3969 = vrcp.f32 %v2276_v39  ;;  %v2288_v36 = vand.u32 2147483648, %v2276_v39  ;;  %v2286_v19 = vand.u32 2147483647, %v2276_v39  ;;  %vm2282_vm11 = vweird.f32 %v2276_v39 }
 0xdd7   : > { %3971 = vrcp.f32 %v2195_v40  ;;  %v2207_v50 = vand.u32 2147483648, %v2195_v40  ;;  %v2205_v54 = vand.u32 2147483647, %v2195_v40  ;;  %vm2201_vm12 = vweird.f32 %v2195_v40 }
 0xdd8   : > { %v2289_v57 = vor.u32 1.1754944e-38, %v2288_v36  ;;  %vm2287_vm7 = vcmp.eq.f32.partialorder %v2286_v19, 8.507059e+37 }
 0xdd9   : > { %v2208_v59 = vor.u32 1.1754944e-38, %v2207_v50  ;;  %vm2206_vm8 = vcmp.eq.f32.partialorder %v2205_v54, 8.507059e+37 }
 0xddc   : > { %v3970_v41 = vpop.eup %3969 }
 0xddd   : > { %v3972_v42 = vpop.eup %3971  ;;  %v2278_v43 = vmul.f32 %v3970_v41, %v2276_v39  ;;  %vm2283_vm9 = vweird.f32 %v3970_v41 }
 0xdde   : > { %v2197_v16 = vmul.f32 %v3972_v42, %v2195_v40  ;;  %vm2202_vm10 = vweird.f32 %v3972_v42  ;;  %vm2284_vm4 = vmor %vm2282_vm11, %vm2283_vm9  ;;  %v2409_v44 = vpop.permute.xlu2 %2408 }
 0xddf   : > { %v2279_v45 = vsub.f32 1.0, %v2278_v43  ;;  %vm2203_vm5 = vmor %vm2201_vm12, %vm2202_vm10 }
 0xde0   : > { %v2198_v49 = vsub.f32 1.0, %v2197_v16 }
 0xde1   : > { %v2280_v51 = vmul.f32 %v3970_v41, %v2279_v45 }
 0xde2   : > { %v2199_v53 = vmul.f32 %v3972_v42, %v2198_v49 }
 0xde3   : > { %v2281_v55 = vadd.f32 %v3970_v41, %v2280_v51 }
 0xde4   : > { %v2200_v56 = vadd.f32 %v3972_v42, %v2199_v53 }
 0xde5   : > { %v2285_v38 = vsel %vm2284_vm4, %v3970_v41, %v2281_v55 }
 0xde6   : > { %v2204_v60 = vsel %vm2203_vm5, %v3972_v42, %v2200_v56  ;;  %v2290_v62 = vsel %vm2287_vm7, %v2289_v57, %v2285_v38  ;;  %v2495_v29 = vpop.permute.xlu2 %2494 }
 0xde7   : > { %v2209_v63 = vsel %vm2206_vm8, %v2208_v59, %v2204_v60  ;;  %v2291_v0 = vmul.f32 %v3966_v12, %v2290_v62 }
 0xde8   : > { %v2210_v1 = vmul.f32 %v3968_v23, %v2209_v63  ;;  %v2324_v2 = vpop.permute.xlu0 %2323 }
 0xde9   : > { %3696 = vmatmul.msk.f32.vlgmr.msrb.gmra.mxu3 %vm1150_vm14, %v2291_v0 }
 0xdea   : > { %3693 = vmatmul.msk.f32.vlgmr.msrb.gmra.mxu0 %vm1150_vm14, %v2210_v1 }
 0xdee   : > { %v2661_v31 = vpop.permute.xlu2 %2660 }
 0xdf1   : > { %3701 = vmatmul.msk.f32.vlgmr.msra.gmra.mxu3 %vm1150_vm14, %v2409_v44 }
 0xdf2   : > { %3698 = vmatmul.msk.f32.vlgmr.msra.gmra.mxu0 %vm1150_vm14, %v2324_v2 }
 0xe67   : > { %v2234_v28 = vpop.f32.mrf.mxu0 }
 0xe68   : > { %2237 = vst.msk [vmem:[#allocation2] sm:$0xff] %vm1150_vm14, %v2234_v28 }
 0xe6c   : > { %v4626_v3 = vpop.f32.mrf.mxu3 }
 0xe6f   : > { %v2348_v61 = vpop.f32.mrf.mxu0 }
 0xe70   : > { %v2351_v4 = vmul.f32 0.35355338, %v2348_v61 }
 0xe72   : > { %v2352_v6 = vsel %vm4294_vm15, %v2351_v4, -1e+30 }
 0xe73   : > { %v2353_v7 = vsel %vm1150_vm14, %v2352_v6, -inf }
 0xe74   : > { %2354 = vmax.xlane.f32.xlu0 %v2353_v7  ;;  %v2433_v9 = vpop.f32.mrf.mxu3 }
 0xe75   : > { %v2436_v10 = vmul.f32 0.35355338, %v2433_v9 }
 0xe77   : > { %v2437_v11 = vsel %vm4294_vm15, %v2436_v10, -1e+30 }
 0xe78   : > { %v2438_v14 = vsel %vm1150_vm14, %v2437_v11, -inf }
 0xe79   : > { %2439 = vmax.xlane.f32.xlu1 %v2438_v14 }
 0xe88   : > { %2462 = vrot.lane.b32.xlu0 %v4580_v5, %s4900_s21 }
 0xe90   : > { %2575 = vrot.lane.b32.xlu0 %v4615_v37, %s4892_s7  ;;  %s4903_s7 = smov 16  }
 0xe92   : > { %2377 = vrot.lane.b32.xlu1 %v4580_v5, %s4901_s23 }
 0xe9a   : > { %2658 = vrot.lane.b32.xlu1 %v4615_v37, %s4898_s20 }
 0xea2   : > { %2745 = vrot.lane.b32.xlu1 %v4615_v37, %s4897_s4 }
 0xee7   : > { %v2355_v15 = vpop.xlane.xlu0 %2354 }
 0xee8   : > { %v2356_v58 = vsub.f32 %v2352_v6, %v2355_v15 }
 0xeea   : > { %v2357_v48 = vmul.f32 1.442695, %v2356_v58 }
 0xeec   : > { %3973 = vpow2.f32 %v2357_v48  ;;  %v2440_v30 = vpop.xlane.xlu1 %2439 }
 0xeed   : > { %v2441_v52 = vsub.f32 %v2437_v11, %v2440_v30 }
 0xeef   : > { %v2442_v17 = vmul.f32 1.442695, %v2441_v52 }
 0xef1   : > { %3975 = vpow2.f32 %v2442_v17 }
 0xef2   : > { %v3974_v18 = vpop.eup %3973 }
 0xef3   : > { %v2359_v32 = vsel %vm1150_vm14, %v3974_v18, 0.0 }
 0xef4   : > { %2360 = vadd.xlane.f32.xlu2 %v2359_v32 }
 0xef7   : > { %v3976_v12 = vpop.eup %3975 }
 0xef8   : > { %v2444_v5 = vsel %vm1150_vm14, %v3976_v12, 0.0 }
 0xef9   : > { %2445 = vadd.xlane.f32.xlu0 %v2444_v5 }
 0xefa   : > { %v2463_v23 = vpop.permute.xlu0 %2462 }
 0xefb   : > { %2483 = vmatpush.msrb.mxu0 %v2463_v23 }
 0xf02   : > { %v2576_v34 = vpop.permute.xlu0 %2575 }
 0xf03   : > { %3706 = vmatpush.xpose.msk.msra.mxu0 %vm1150_vm14, %v2576_v34 }
 0xf04   : > { %v2378_v27 = vpop.permute.xlu1 %2377 }
 0xf05   : > { %2398 = vmatpush.msra.mxu2 %v2378_v27 }
 0xf07   : > { %3703 = vmatpush.xpose.msk.msrb.mxu2 %vm1150_vm14, %v2495_v29 }
 0xf0c   : > { %2573 = vrot.lane.b32.xlu2 %v4615_v37, %s4891_s6  ;;  %v2659_v50 = vpop.permute.xlu1 %2658  ;;  %s4902_s6 = smov 8  }
 0xf0d   : > { %2743 = vrot.lane.b32.xlu0 %v4615_v37, %s4899_s25 }
 0xf14   : > { %v2746_v1 = vpop.permute.xlu1 %2745 }
 0xf67   : > { %v2361_v33 = vpop.xlane.xlu2 %2360 }
 0xf68   : > { %3977 = vrcp.f32 %v2361_v33  ;;  %v2373_v42 = vand.u32 2147483648, %v2361_v33  ;;  %v2371_v45 = vand.u32 2147483647, %v2361_v33  ;;  %vm2367_vm10 = vweird.f32 %v2361_v33 }
 0xf6a   : > { %v2374_v51 = vor.u32 1.1754944e-38, %v2373_v42  ;;  %vm2372_vm12 = vcmp.eq.f32.partialorder %v2371_v45, 8.507059e+37 }
 0xf6c   : > { %v2446_v35 = vpop.xlane.xlu0 %2445 }
 0xf6d   : > { %3979 = vrcp.f32 %v2446_v35  ;;  %v2458_v54 = vand.u32 2147483648, %v2446_v35  ;;  %v2456_v57 = vand.u32 2147483647, %v2446_v35  ;;  %vm2452_vm5 = vweird.f32 %v2446_v35 }
 0xf6e   : > { %v3978_v39 = vpop.eup %3977 }
 0xf6f   : > { %v2363_v40 = vmul.f32 %v3978_v39, %v2361_v33  ;;  %vm2368_vm9 = vweird.f32 %v3978_v39  ;;  %v2459_v60 = vor.u32 1.1754944e-38, %v2458_v54  ;;  %vm2457_vm8 = vcmp.eq.f32.partialorder %v2456_v57, 8.507059e+37  ;;  %v2574_v44 = vpop.permute.xlu2 %2573 }
 0xf70   : > { %vm2369_vm11 = vmor %vm2367_vm10, %vm2368_vm9 }
 0xf71   : > { %v2364_v41 = vsub.f32 1.0, %v2363_v40 }
 0xf73   : > { %v3980_v43 = vpop.eup %3979  ;;  %v2365_v16 = vmul.f32 %v3978_v39, %v2364_v41 }
 0xf74   : > { %v2448_v49 = vmul.f32 %v3980_v43, %v2446_v35  ;;  %vm2453_vm4 = vweird.f32 %v3980_v43 }
 0xf75   : > { %v2366_v36 = vadd.f32 %v3978_v39, %v2365_v16  ;;  %vm2454_vm7 = vmor %vm2452_vm5, %vm2453_vm4 }
 0xf76   : > { %v2449_v19 = vsub.f32 1.0, %v2448_v49 }
 0xf77   : > { %v2370_v53 = vsel %vm2369_vm11, %v3978_v39, %v2366_v36 }
 0xf78   : > { %v2375_v55 = vsel %vm2372_vm12, %v2374_v51, %v2370_v53  ;;  %v2450_v56 = vmul.f32 %v3980_v43, %v2449_v19 }
 0xf79   : > { %v2376_v59 = vmul.f32 %v3974_v18, %v2375_v55 }
 0xf7a   : > { %v2451_v38 = vadd.f32 %v3980_v43, %v2450_v56 }
 0xf7b   : > { %3699 = vmatmul.msk.f32.vlgmr.msra.gmra.mxu2 %vm1150_vm14, %v2376_v59 }
 0xf7c   : > { %v2455_v62 = vsel %vm2454_vm7, %v3980_v43, %v2451_v38  ;;  %3709 = vmatpush.xpose.msk.msra.mxu2 %vm1150_vm14, %v2661_v31 }
 0xf7d   : > { %v2460_v63 = vsel %vm2457_vm8, %v2459_v60, %v2455_v62 }
 0xf7e   : > { %v2461_v0 = vmul.f32 %v3976_v12, %v2460_v63 }
 0xf7f   : > { %v2744_v2 = vpop.permute.xlu0 %2743 }
 0xf80   : > { %3702 = vmatmul.msk.f32.vlgmr.msrb.gmra.mxu0 %vm1150_vm14, %v2461_v0 }
 0xf81   : > { %3712 = vmatpush.xpose.msk.msrb.mxu0 %vm1150_vm14, %v2746_v1 }
 0xf83   : > { %3704 = vmatmul.msk.f32.vlgmr.msrb.gmra.mxu2 %vm1150_vm14, %v4615_v37 }
 0xf88   : > { %3707 = vmatmul.msk.f32.vlgmr.msra.gmra.mxu0 %vm1150_vm14, %v2574_v44 }
 0xf8b   : > { %3710 = vmatmul.msk.f32.vlgmr.msra.gmra.mxu2 %vm1150_vm14, %v2659_v50 }
 0xf90   : > { %3713 = vmatmul.msk.f32.vlgmr.msrb.gmra.mxu0 %vm1150_vm14, %v2744_v2 }
 0xffd   : > { %v4661_v28 = vpop.f32.mrf.mxu0 }
 0xffe   : > { %v2400_v61 = vpop.f32.mrf.mxu2 }
0x1005   : > { %v2598_v4 = vpop.f32.mrf.mxu0 }
0x1006   : > { %v2517_v6 = vpop.f32.mrf.mxu2  ;;  %v2601_v7 = vmul.f32 0.35355338, %v2598_v4 }
0x1007   : > { %v2520_v9 = vmul.f32 0.35355338, %v2517_v6 }
0x1008   : > { %v2602_v10 = vsel %vm4294_vm15, %v2601_v7, -1e+30 }
0x1009   : > { %v2603_v11 = vsel %vm1150_vm14, %v2602_v10, -inf  ;;  %v2521_v14 = vsel %vm4294_vm15, %v2520_v9, -1e+30 }
0x100a   : > { %2604 = vmax.xlane.f32.xlu1 %v2603_v11  ;;  %v2522_v15 = vsel %vm1150_vm14, %v2521_v14, -inf }
0x100b   : > { %2523 = vmax.xlane.f32.xlu2 %v2522_v15 }
0x100d   : > { %v2768_v58 = vpop.f32.mrf.mxu0 }
0x100e   : > { %v2683_v48 = vpop.f32.mrf.mxu2  ;;  %v2771_v30 = vmul.f32 0.35355338, %v2768_v58 }
0x100f   : > { %v2686_v52 = vmul.f32 0.35355338, %v2683_v48 }
0x1010   : > { %v2772_v17 = vsel %vm4294_vm15, %v2771_v30, -1e+30 }
0x1011   : > { %v2687_v18 = vsel %vm4294_vm15, %v2686_v52, -1e+30  ;;  %v2773_v32 = vsel %vm1150_vm14, %v2772_v17, -inf }
0x1012   : > { %v2688_v12 = vsel %vm1150_vm14, %v2687_v18, -inf }
0x1013   : > { %2689 = vmax.xlane.f32.xlu0 %v2688_v12  ;;  %2774 = vmax.xlane.f32.xlu2 %v2773_v32 }
0x1027   : > { %2546 = vrot.lane.b32.xlu0 %v4615_v37, %s4896_s1  ;;  %s4905_s1 = sld [smem:[#allocation5_spill]] }
0x102d   : > { %s790_s4 = scalar_lea.vmem %s4905_s1, %s4253_s29 }
0x107d   : > { %v2605_v5 = vpop.xlane.xlu1 %2604 }
0x107e   : > { %v2524_v23 = vpop.xlane.xlu2 %2523  ;;  %v2606_v34 = vsub.f32 %v2602_v10, %v2605_v5 }
0x107f   : > { %v2525_v27 = vsub.f32 %v2521_v14, %v2524_v23 }
0x1080   : > { %v2607_v29 = vmul.f32 1.442695, %v2606_v34 }
0x1081   : > { %v2526_v31 = vmul.f32 1.442695, %v2525_v27 }
0x1082   : > { %3981 = vpow2.f32 %v2607_v29 }
0x1083   : > { %3983 = vpow2.f32 %v2526_v31 }
0x1086   : > { %v2690_v33 = vpop.xlane.xlu0 %2689  ;;  %v2775_v47 = vpop.xlane.xlu2 %2774 }
0x1087   : > { %v2691_v35 = vsub.f32 %v2687_v18, %v2690_v33  ;;  %v2776_v39 = vsub.f32 %v2772_v17, %v2775_v47 }
0x1088   : > { %v4677_v40 = vpop.eup %3981 }
0x1089   : > { %v4679_v41 = vpop.eup %3983  ;;  %v2692_v42 = vmul.f32 1.442695, %v2691_v35  ;;  %v2777_v43 = vmul.f32 1.442695, %v2776_v39  ;;  %v2609_v16 = vsel %vm1150_vm14, %v4677_v40, 0.0 }
0x108a   : > { %v2528_v45 = vsel %vm1150_vm14, %v4679_v41, 0.0  ;;  %2610 = vadd.xlane.f32.xlu0 %v2609_v16 }
0x108b   : > { %3985 = vpow2.f32 %v2692_v42  ;;  %2529 = vadd.xlane.f32.xlu1 %v2528_v45 }
0x108c   : > { %3987 = vpow2.f32 %v2777_v43 }
0x1091   : > { %v4685_v49 = vpop.eup %3985 }
0x1092   : > { %v4687_v36 = vpop.eup %3987  ;;  %v2694_v50 = vsel %vm1150_vm14, %v4685_v49, 0.0 }
0x1093   : > { %2695 = vadd.xlane.f32.xlu2 %v2694_v50  ;;  %v2779_v51 = vsel %vm1150_vm14, %v4687_v36, 0.0 }
0x1094   : > { %2780 = vadd.xlane.f32.xlu1 %v2779_v51 }
0x1099   : > { %v2547_v19 = vpop.permute.xlu0 %2546 }
0x109a   : > { %2567 = vmatpush.msrb.mxu3 %v2547_v19 }
0x109e   : > { %2797 = vrot.lane.b32.xlu0 %v4615_v37, %s4900_s21 }
0x10ab   : > { %2627 = vrot.lane.b32.xlu2 %v4615_v37, %s4895_s26  ;;  %s4904_s26 = smov 24  }
0x10ad   : > { %2712 = vrot.lane.b32.xlu1 %v4615_v37, %s4901_s23 }
0x10b3   : > { %2319 = vrot.lane.b32.xlu2 %v4626_v3, %s4902_s6 }
0x10b5   : > { %2404 = vrot.lane.b32.xlu1 %v2400_v61, %s4903_s7 }
0x10fd   : > { %v2611_v53 = vpop.xlane.xlu0 %2610 }
0x10fe   : > { %3989 = vrcp.f32 %v2611_v53  ;;  %v2530_v54 = vpop.xlane.xlu1 %2529  ;;  %v2623_v37 = vand.u32 2147483648, %v2611_v53  ;;  %v2621_v0 = vand.u32 2147483647, %v2611_v53  ;;  %vm2617_vm10 = vweird.f32 %v2611_v53 }
0x10ff   : > { %3991 = vrcp.f32 %v2530_v54  ;;  %v2542_v1 = vand.u32 2147483648, %v2530_v54  ;;  %v2540_v2 = vand.u32 2147483647, %v2530_v54  ;;  %vm2536_vm12 = vweird.f32 %v2530_v54 }
0x1100   : > { %v2624_v4 = vor.u32 1.1754944e-38, %v2623_v37  ;;  %vm2622_vm4 = vcmp.eq.f32.partialorder %v2621_v0, 8.507059e+37 }
0x1101   : > { %v2543_v10 = vor.u32 1.1754944e-38, %v2542_v1  ;;  %vm2541_vm7 = vcmp.eq.f32.partialorder %v2540_v2, 8.507059e+37 }
0x1104   : > { %v3990_v55 = vpop.eup %3989 }
0x1105   : > { %v3992_v56 = vpop.eup %3991  ;;  %v2613_v57 = vmul.f32 %v3990_v55, %v2611_v53  ;;  %vm2618_vm15 = vweird.f32 %v3990_v55 }
0x1106   : > { %v2532_v59 = vmul.f32 %v3992_v56, %v2530_v54  ;;  %v4702_v38 = vpop.xlane.xlu2 %2695  ;;  %vm2537_vm9 = vweird.f32 %v3992_v56  ;;  %vm2619_vm11 = vmor %vm2617_vm10, %vm2618_vm15 }
0x1107   : > { %v2614_v60 = vsub.f32 1.0, %v2613_v57  ;;  %3993 = vrcp.f32 %v4702_v38  ;;  %v2781_v62 = vpop.xlane.xlu1 %2780  ;;  %vm2538_vm5 = vmor %vm2536_vm12, %vm2537_vm9  ;;  %v2708_v47 = vand.u32 2147483648, %v4702_v38  ;;  %v3853_v57 = vld [vmem:[%s4477_s22 + $0x10] sm:$0xff] }
0x1108   : > { %v2533_v63 = vsub.f32 1.0, %v2532_v59  ;;  %3995 = vrcp.f32 %v2781_v62  ;;  %v2793_v34 = vand.u32 2147483648, %v2781_v62  ;;  %v2791_v29 = vand.u32 2147483647, %v2781_v62 }
0x1109   : > { %v2615_v3 = vmul.f32 %v3990_v55, %v2614_v60  ;;  %vm2787_vm9 = vweird.f32 %v2781_v62  ;;  %v2709_v45 = vor.u32 1.1754944e-38, %v2708_v47 }
0x110a   : > { %v2534_v44 = vmul.f32 %v3992_v56, %v2533_v63  ;;  %v2794_v35 = vor.u32 1.1754944e-38, %v2793_v34  ;;  %vm2792_vm12 = vcmp.eq.f32.partialorder %v2791_v29, 8.507059e+37 }
0x110b   : > { %v2616_v61 = vadd.f32 %v3990_v55, %v2615_v3  ;;  %v3908_v3 = vld [vmem:[%s4466_s24 + $0x1] ss:$0 sm:$0xff]  ;;  %s853_s24 = scalar_lea.vmem %s4834_s17, %s4907_s28 }
0x110c   : > { %v2535_v6 = vadd.f32 %v3992_v56, %v2534_v44 }
0x110d   : > { %v3994_v7 = vpop.eup %3993  ;;  %v2620_v9 = vsel %vm2619_vm11, %v3990_v55, %v2616_v61  ;;  %vm2702_vm11 = vweird.f32 %v4702_v38 }
0x110e   : > { %v3996_v11 = vpop.eup %3995  ;;  %v2625_v14 = vsel %vm2622_vm4, %v2624_v4, %v2620_v9  ;;  %v2539_v15 = vsel %vm2538_vm5, %v3992_v56, %v2535_v6  ;;  %v2698_v58 = vmul.f32 %v3994_v7, %v4702_v38  ;;  %v2628_v48 = vpop.permute.xlu2 %2627  ;;  %vm2703_vm15 = vweird.f32 %v3994_v7  ;;  %v3854_v56 = vld [vmem:[%s4477_s22 + $0x18] sm:$0xff] }
0x110f   : > { %v2544_v30 = vsel %vm2541_vm7, %v2543_v10, %v2539_v15  ;;  %v2783_v52 = vmul.f32 %v3996_v11, %v2781_v62  ;;  %2648 = vmatpush.msrb.mxu1 %v2628_v48  ;;  %v2626_v17 = vmul.f32 %v4677_v40, %v2625_v14  ;;  %vm2788_vm8 = vweird.f32 %v3996_v11  ;;  %vm2704_vm4 = vmor %vm2702_vm11, %vm2703_vm15  ;;  %2862 = vmatpush.bf16.msrb.mxu2 %v3854_v56 }
0x1110   : > { %v2699_v18 = vsub.f32 1.0, %v2698_v58  ;;  %v2798_v32 = vpop.permute.xlu0 %2797  ;;  %v2545_v12 = vmul.f32 %v4679_v41, %v2544_v30  ;;  %vm2789_vm10 = vmor %vm2787_vm9, %vm2788_vm8  ;;  %v2706_v40 = vand.u32 2147483647, %v4702_v38 }
0x1111   : > { %v2784_v5 = vsub.f32 1.0, %v2783_v52  ;;  %3708 = vmatmul.msk.f32.vlgmr.msrb.gmra.mxu1 %vm1150_vm14, %v2626_v17  ;;  %v3856_v52 = vld [vmem:[%s4524_s5 + $0x18] sm:$0xff] }
0x1112   : > { %v2700_v23 = vmul.f32 %v3994_v7, %v2699_v18  ;;  %3705 = vmatmul.msk.f32.vlgmr.msrb.gmra.mxu3 %vm1150_vm14, %v2545_v12  ;;  %2818 = vmatpush.msra.mxu1 %v2798_v32  ;;  %vm2707_vm5 = vcmp.eq.f32.partialorder %v2706_v40, 8.507059e+37  ;;  %v3855_v12 = vld [vmem:[%s4524_s5 + $0x10] sm:$0xff] }
0x1113   : > { %v2785_v27 = vmul.f32 %v3996_v11, %v2784_v5  ;;  %2863 = vmatpush.bf16.msrb.mxu2 %v3853_v57 }
0x1114   : > { %v2701_v31 = vadd.f32 %v3994_v7, %v2700_v23 }
0x1115   : > { %v2786_v33 = vadd.f32 %v3996_v11, %v2785_v27 }
0x1116   : > { %v2320_v39 = vpop.permute.xlu2 %2319  ;;  %v2705_v43 = vsel %vm2704_vm4, %v3994_v7, %v2701_v31 }
0x1117   : > { %v2790_v41 = vsel %vm2789_vm10, %v3996_v11, %v2786_v33  ;;  %2322 = vst.msk [vmem:[#allocation2] sm:$0xff] %vm1312_vm13, %v2320_v39  ;;  %v2710_v50 = vsel %vm2707_vm5, %v2709_v45, %v2705_v43  ;;  %v3909_v45 = vld [vmem:[%s4495_s19 + $0x1] ss:$0 sm:$0xff] }
0x1118   : > { %v2795_v42 = vsel %vm2792_vm12, %v2794_v35, %v2790_v41  ;;  %v2711_v19 = vmul.f32 %v4685_v49, %v2710_v50 }
0x1119   : > { %v2796_v16 = vmul.f32 %v4687_v36, %v2795_v42 }
0x111b   : > { %3714 = vmatmul.msk.f32.vlgmr.msra.gmra.mxu1 %vm1150_vm14, %v2796_v16 }
0x111f   : > { %v2713_v51 = vpop.permute.xlu1 %2712 }
0x1120   : > { %2733 = vmatpush.msra.mxu3 %v2713_v51 }
0x1121   : > { %3711 = vmatmul.msk.f32.vlgmr.msra.gmra.mxu3 %vm1150_vm14, %v2711_v19 }
0x1122   : > { %2962 = vmatpush.bf16.msrb.mxu3 %v3856_v52 }
0x1126   : > { %2963 = vmatpush.bf16.msrb.mxu3 %v3855_v12 }
0x1127   : > { %v2405_v53 = vpop.permute.xlu1 %2404 }
0x1128   : > { %2407 = vst.msk [vmem:[#allocation2] sm:$0xff] %vm1398_vm1, %v2405_v53  ;;  %v3910_v53 = vld [vmem:[%s4501_s3 + $0x1] ss:$0 sm:$0xff] }
0x118e   : > { %v2650_v54 = vpop.f32.mrf.mxu1 }
0x118f   : > { %2654 = vrot.lane.b32.xlu0 %v2650_v54, %s4902_s6  ;;  %s857_s6 = scalar_lea.vmem %s4835_s18, %s4232_s30 }
0x1195   : > { %v2569_v36 = vpop.f32.mrf.mxu3 }
0x1196   : > { %2572 = vst.msk [vmem:[#allocation2 + $0x8] sm:$0xff] %vm1150_vm14, %v2569_v36 }
0x1197   : > { %2489 = vrot.lane.b32.xlu0 %v4661_v28, %s4904_s26 }
0x1198   : > { %v2820_v55 = vpop.f32.mrf.mxu1 }
0x1199   : > { %2824 = vrot.lane.b32.xlu1 %v2820_v55, %s4904_s26 }
0x11a4   : > { %v2735_v49 = vpop.f32.mrf.mxu3 }
0x11a5   : > { %2739 = vrot.lane.b32.xlu2 %v2735_v49, %s4903_s7 }
0x11ff   : > { %v2740_v38 = vpop.permute.xlu2 %2739 }
0x1201   : > { %v2655_v59 = vpop.permute.xlu0 %2654 }
0x1202   : > { %2657 = vst.msk [vmem:[#allocation2 + $0x8] sm:$0xff] %vm1312_vm13, %v2655_v59  ;;  %v3864_v59 = vld [vmem:[%s4544_s8 + $0x78] sm:$0xff] }
0x1203   : > { %2742 = vst.msk [vmem:[#allocation2 + $0x8] sm:$0xff] %vm1398_vm1, %v2740_v38  ;;  %3059 = vmatpush.bf16.msra.mxu0 %v3864_v59  ;;  %v3863_v38 = vld [vmem:[%s4544_s8 + $0x70] sm:$0xff] }
0x1207   : > { %3060 = vmatpush.bf16.msra.mxu0 %v3863_v38 }
0x1209   : > { %v2490_v60 = vpop.permute.xlu0 %2489 }
0x120a   : > { %2492 = vst.msk [vmem:[#allocation2] sm:$0xff] %vm1484_vm2, %v2490_v60  ;;  %v3862_v60 = vld [vmem:[%s4544_s8 + $0x68] sm:$0xff] }
0x120b   : > { %v2825_v28 = vpop.permute.xlu1 %2824  ;;  %3061 = vmatpush.bf16.msra.mxu0 %v3862_v60  ;;  %v3796_v60 = vld [vmem:[%s790_s4] sm:$0xf] }
0x120c   : > { %2827 = vst.msk [vmem:[#allocation2 + $0x8] sm:$0xff] %vm1484_vm2, %v2825_v28  ;;  %v3861_v28 = vld [vmem:[%s4544_s8 + $0x60] sm:$0xff] }
0x120f   : > { %3062 = vmatpush.bf16.msra.mxu0 %v3861_v28  ;;  %v3866_v28 = vld [vmem:[%s790_s4 + $0x4] sm:$0xf0] }
0x1211   : > { %v2828_v62 = vld [vmem:[#allocation2] sm:$0xff] }
0x1213   : > { %v2829_v37 = vld [vmem:[#allocation2 + $0x8] sm:$0xff] }
0x1214   : > { %v2837_v63 = vpack.c.bf16 %v2829_v37, %v2828_v62  ;;  %v3860_v62 = vld [vmem:[%s4544_s8 + $0x58] sm:$0xff]  ;;  %v3859_v37 = vld [vmem:[%s4544_s8 + $0x50] sm:$0xff] }
0x1215   : > { %3063 = vmatpush.bf16.msra.mxu0 %v3860_v62  ;;  %v3865_v62 = vld [vmem:[%s790_s4 + $0x4] sm:$0xf] }
0x1216   : > { %3728 = vmatmul.msk.bf16.vlgmr.msrb.gmra.mxu2 %vm1047_vm6, %v2837_v63  ;;  %v3858_v63 = vld [vmem:[%s4544_s8 + $0x48] sm:$0xff] }
0x1219   : > { %3064 = vmatpush.bf16.msra.mxu0 %v3859_v37 }
0x121d   : > { %3065 = vmatpush.bf16.msra.mxu0 %v3858_v63  ;;  %v3797_v63 = vor.u32 %v3866_v28, %v3796_v60 }
0x1299   : > { %v2865_v0 = vpop.f32.mrf.mxu2 }
0x129a   : > { %v2866_v1 = vadd.f32 %v3908_v3, %v2865_v0 }
0x129c   : > { %v4734_v44 = vadd.f32 %v2866_v1, %v4557_v8  ;;  %v3857_v1 = vld [vmem:[%s4544_s8 + $0x40] sm:$0xff]  ;;  %s850_s8 = scalar_lea.vmem %s4833_s16, %s4907_s28 }
0x129d   : > { %3066 = vmatpush.bf16.msra.mxu0 %v3857_v1 }
0x129e   : > { %v2876_v2 = vsel %vm1047_vm6, %v4734_v44, 0.0 }
0x129f   : > { %2877 = vadd.xlane.f32.xlu2 %v2876_v2 }
0x12a1   : > { %v2867_v61 = vpop.f32.mrf.mxu2 }
0x12a2   : > { %v2868_v4 = vadd.f32 %v3908_v3, %v2867_v61  ;;  %v3911_v3 = vld [vmem:[%s4518_s0 + $0x1] ss:$0 sm:$0xff] }
0x12a4   : > { %v4739_v6 = vadd.f32 %v2868_v4, %v4562_v13 }
0x12a6   : > { %v2879_v7 = vsel %vm1047_vm6, %v4739_v6, 0.0 }
0x12a7   : > { %2880 = vadd.xlane.f32.xlu0 %v2879_v7 }
0x1312   : > { %v2878_v9 = vpop.xlane.xlu2 %2877 }
0x1313   : > { %v2882_v10 = vmul.f32 %v2878_v9, %v4223_v46 }
0x1315   : > { %v2884_v8 = vsub.f32 %v4734_v44, %v2882_v10 }
0x1317   : > { %v2886_v11 = vmul.f32 %v2884_v8, %v2884_v8 }
0x1319   : > { %v2888_v14 = vsel %vm1047_vm6, %v2886_v11, 0.0 }
0x131a   : > { %v2881_v15 = vpop.xlane.xlu0 %2880  ;;  %2889 = vadd.xlane.f32.xlu1 %v2888_v14 }
0x131b   : > { %v2883_v58 = vmul.f32 %v2881_v15, %v4223_v46 }
0x131d   : > { %v2885_v13 = vsub.f32 %v4739_v6, %v2883_v58 }
0x131f   : > { %v2887_v48 = vmul.f32 %v2885_v13, %v2885_v13 }
0x1321   : > { %v2891_v30 = vsel %vm1047_vm6, %v2887_v48, 0.0 }
0x1322   : > { %2892 = vadd.xlane.f32.xlu2 %v2891_v30 }
0x138d   : > { %v2890_v17 = vpop.xlane.xlu1 %2889 }
0x138e   : > { %v2894_v18 = vmul.f32 %v2890_v17, %v4223_v46 }
0x1390   : > { %v2896_v32 = vadd.f32 1e-05, %v2894_v18 }
0x1392   : > { %3997 = vrsqrt.f32 %v2896_v32  ;;  %vm2904_vm13 = vweird.f32 %v2896_v32 }
0x1395   : > { %v2893_v5 = vpop.xlane.xlu2 %2892 }
0x1396   : > { %v2895_v23 = vmul.f32 %v2893_v5, %v4223_v46 }
0x1398   : > { %v3998_v34 = vpop.eup %3997  ;;  %v2897_v27 = vadd.f32 1e-05, %v2895_v23 }
0x1399   : > { %v2899_v29 = vmul.f32 %v3998_v34, %v2896_v32  ;;  %vm2905_vm14 = vweird.f32 %v3998_v34 }
0x139a   : > { %3999 = vrsqrt.f32 %v2897_v27  ;;  %vm2906_vm1 = vmor %vm2904_vm13, %vm2905_vm14  ;;  %vm2914_vm7 = vweird.f32 %v2897_v27 }
0x139b   : > { %v2900_v31 = vmul.f32 %v3998_v34, %v2899_v29 }
0x139d   : > { %v2901_v33 = vmul.f32 0.5, %v2900_v31 }
0x139f   : > { %v2902_v47 = vsub.f32 1.5, %v2901_v33 }
0x13a0   : > { %v4000_v35 = vpop.eup %3999 }
0x13a1   : > { %v2903_v39 = vmul.f32 %v3998_v34, %v2902_v47  ;;  %v2909_v40 = vmul.f32 %v4000_v35, %v2897_v27  ;;  %vm2915_vm2 = vweird.f32 %v4000_v35  ;;  %v3912_v27 = vld [vmem:[%s4537_s2 + $0x1] ss:$0 sm:$0xff] }
0x13a2   : > { %vm2916_vm8 = vmor %vm2914_vm7, %vm2915_vm2 }
0x13a3   : > { %v2910_v41 = vmul.f32 %v4000_v35, %v2909_v40  ;;  %v2907_v42 = vsel %vm2906_vm1, %v3998_v34, %v2903_v39 }
0x13a4   : > { %v2918_v50 = vmul.f32 %v2907_v42, %v2884_v8 }
0x13a5   : > { %v2911_v43 = vmul.f32 0.5, %v2910_v41 }
0x13a6   : > { %v2923_v54 = vmul.f32 %v3909_v45, %v2918_v50 }
0x13a7   : > { %v2912_v16 = vsub.f32 1.5, %v2911_v43 }
0x13a8   : > { %v2928_v49 = vadd.f32 %v3910_v53, %v2923_v54 }
0x13a9   : > { %v2913_v51 = vmul.f32 %v4000_v35, %v2912_v16 }
0x13ab   : > { %v2917_v19 = vsel %vm2916_vm8, %v4000_v35, %v2913_v51 }
0x13ac   : > { %v2919_v36 = vmul.f32 %v2917_v19, %v2885_v13 }
0x13ae   : > { %v2924_v55 = vmul.f32 %v3909_v45, %v2919_v36  ;;  %v3868_v36 = vld [vmem:[%s790_s4 + $0x14] sm:$0xf0] }
0x13b0   : > { %v2929_v56 = vadd.f32 %v3910_v53, %v2924_v55  ;;  %v3867_v55 = vld [vmem:[%s790_s4 + $0x14] sm:$0xf] }
0x13b2   : > { %v2937_v57 = vpack.c.bf16 %v2929_v56, %v2928_v49  ;;  %v3806_v56 = vld [vmem:[%s790_s4 + $0x18] sm:$0xf0] }
0x13b3   : > { %v3809_v59 = vor.u32 %v3867_v55, %v3806_v56 }
0x13b4   : > { %3744 = vmatmul.msk.bf16.vlgmr.msrb.gmra.mxu3 %vm1047_vm6, %v2937_v57 }
0x13b5   : > { %3179 = vmatpush.bf16.msra.mxu2 %v3809_v59 }
0x1437   : > { %v2965_v0 = vpop.f32.mrf.mxu3 }
0x1438   : > { %v2966_v2 = vadd.f32 %v3911_v3, %v2965_v0 }
0x143a   : > { %v2970_v61 = vmul.f32 %v2966_v2, %v2966_v2 }
0x143c   : > { %v2972_v4 = vmul.f32 %v2970_v61, %v2966_v2 }
0x143e   : > { %v2974_v7 = vmul.f32 0.044715, %v2972_v4 }
0x143f   : > { %v2967_v9 = vpop.f32.mrf.mxu3 }
0x1440   : > { %v2976_v10 = vadd.f32 %v2974_v7, %v2966_v2  ;;  %v2968_v8 = vadd.f32 %v3911_v3, %v2967_v9  ;;  %v3798_v3 = vld [vmem:[%s790_s4 + $0x8] sm:$0xf0] }
0x1441   : > { %v3801_v0 = vor.u32 %v3865_v62, %v3798_v3 }
0x1442   : > { %v2978_v11 = vmul.f32 0.7978846, %v2976_v10  ;;  %v2971_v14 = vmul.f32 %v2968_v8, %v2968_v8 }
0x1443   : > { %3180 = vmatpush.bf16.msra.mxu2 %v3801_v0 }
0x1444   : > { %v2973_v15 = vmul.f32 %v2971_v14, %v2968_v8  ;;  %4001 = vtanh.f32 %v2978_v11 }
0x1446   : > { %v2975_v58 = vmul.f32 0.044715, %v2973_v15 }
0x1448   : > { %v2977_v13 = vadd.f32 %v2975_v58, %v2968_v8 }
0x144a   : > { %v2979_v48 = vmul.f32 0.7978846, %v2977_v13  ;;  %v4002_v30 = vpop.eup %4001 }
0x144b   : > { %v2982_v52 = vadd.f32 1.0, %v4002_v30 }
0x144c   : > { %4003 = vtanh.f32 %v2979_v48 }
0x144d   : > { %v2984_v18 = vmul.f32 0.5, %v2982_v52 }
0x144f   : > { %v2986_v5 = vmul.f32 %v2984_v18, %v2966_v2 }
0x1452   : > { %v4004_v17 = vpop.eup %4003 }
0x1453   : > { %v2983_v32 = vadd.f32 1.0, %v4004_v17 }
0x1455   : > { %v2985_v12 = vmul.f32 0.5, %v2983_v32  ;;  %v3914_v32 = vld [vmem:[%s853_s24] ss:$0 sm:$0xff] }
0x1457   : > { %v2987_v23 = vmul.f32 %v2985_v12, %v2968_v8 }
0x1459   : > { %v3007_v34 = vpack.c.bf16 %v2987_v23, %v2986_v5 }
0x145b   : > { %3067 = vmatmul.bf16.vlgmr.msra.gmra.mxu0 %v3007_v34 }
0x14d8   : > { %v3068_v29 = vpop.f32.mrf.mxu0 }
0x14d9   : > { %v3069_v31 = vadd.f32 %v3912_v27, %v3068_v29 }
0x14db   : > { %v3073_v33 = vadd.f32 %v3069_v31, %v4734_v44 }
0x14dd   : > { %v3077_v47 = vsel %vm1047_vm6, %v3073_v33, 0.0 }
0x14de   : > { %3078 = vadd.xlane.f32.xlu0 %v3077_v47  ;;  %v3521_v47 = vsel %vm871_vm3, 1.0, %v4032_v24  ;;  %vm3243_vm3 = vcmask 0  }
0x14e0   : > { %v3070_v35 = vpop.f32.mrf.mxu0 }
0x14e1   : > { %v3071_v39 = vadd.f32 %v3912_v27, %v3070_v35 }
0x14e3   : > { %v3074_v40 = vadd.f32 %v3071_v39, %v4739_v6  ;;  %v3804_v6 = vld [vmem:[%s790_s4 + $0x10] sm:$0xf] }
0x14e4   : > { %v3805_v49 = vor.u32 %v3868_v36, %v3804_v6 }
0x14e5   : > { %v3080_v41 = vsel %vm1047_vm6, %v3074_v40, 0.0 }
0x14e6   : > { %3081 = vadd.xlane.f32.xlu1 %v3080_v41  ;;  %3165 = vmatpush.bf16.msrb.mxu1 %v3805_v49 }
0x14ea   : > { %3166 = vmatpush.bf16.msrb.mxu1 %v3797_v63 }
0x1551   : > { %v3079_v44 = vpop.xlane.xlu0 %3078 }
0x1552   : > { %v3083_v42 = vmul.f32 %v3079_v44, %v4223_v46 }
0x1554   : > { %v3085_v43 = vsub.f32 %v3073_v33, %v3083_v42  ;;  %v3520_v33 = vsel %vm870_vm0, 1.0, %v4032_v24 }
0x1556   : > { %v3087_v16 = vmul.f32 %v3085_v43, %v3085_v43 }
0x1558   : > { %v3089_v45 = vsel %vm1047_vm6, %v3087_v16, 0.0 }
0x1559   : > { %v3082_v50 = vpop.xlane.xlu1 %3081  ;;  %3090 = vadd.xlane.f32.xlu2 %v3089_v45 }
0x155a   : > { %v3084_v51 = vmul.f32 %v3082_v50, %v4223_v46 }
0x155c   : > { %v3086_v19 = vsub.f32 %v3074_v40, %v3084_v51 }
0x155e   : > { %v3088_v53 = vmul.f32 %v3086_v19, %v3086_v19 }
0x1560   : > { %v3092_v54 = vsel %vm1047_vm6, %v3088_v53, 0.0 }
0x1561   : > { %3093 = vadd.xlane.f32.xlu0 %v3092_v54 }
0x15cc   : > { %v3091_v57 = vpop.xlane.xlu2 %3090 }
0x15cd   : > { %v3095_v38 = vmul.f32 %v3091_v57, %v4223_v46 }
0x15cf   : > { %v3097_v37 = vadd.f32 1e-05, %v3095_v38  ;;  %v4049_v38 = vmov 8.0  }
0x15d1   : > { %4005 = vrsqrt.f32 %v3097_v37  ;;  %vm3105_vm9 = vweird.f32 %v3097_v37 }
0x15d4   : > { %v3094_v1 = vpop.xlane.xlu0 %3093 }
0x15d5   : > { %v3096_v2 = vmul.f32 %v3094_v1, %v4223_v46  ;;  %v3913_v46 = vld [vmem:[%s850_s8] ss:$0 sm:$0xff] }
0x15d7   : > { %v4006_v61 = vpop.eup %4005  ;;  %v3098_v4 = vadd.f32 1e-05, %v3096_v2 }
0x15d8   : > { %v3100_v7 = vmul.f32 %v4006_v61, %v3097_v37  ;;  %vm3106_vm15 = vweird.f32 %v4006_v61 }
0x15d9   : > { %4007 = vrsqrt.f32 %v3098_v4  ;;  %vm3107_vm10 = vmor %vm3105_vm9, %vm3106_vm15  ;;  %vm3115_vm12 = vweird.f32 %v3098_v4 }
0x15da   : > { %v3101_v9 = vmul.f32 %v4006_v61, %v3100_v7 }
0x15dc   : > { %v3102_v10 = vmul.f32 0.5, %v3101_v9 }
0x15de   : > { %v3103_v8 = vsub.f32 1.5, %v3102_v10 }
0x15df   : > { %v4008_v11 = vpop.eup %4007 }
0x15e0   : > { %v3104_v14 = vmul.f32 %v4006_v61, %v3103_v8  ;;  %v3110_v15 = vmul.f32 %v4008_v11, %v3098_v4  ;;  %vm3116_vm11 = vweird.f32 %v4008_v11 }
0x15e1   : > { %vm3117_vm4 = vmor %vm3115_vm12, %vm3116_vm11 }
0x15e2   : > { %v3111_v58 = vmul.f32 %v4008_v11, %v3110_v15  ;;  %v3108_v13 = vsel %vm3107_vm10, %v4006_v61, %v3104_v14 }
0x15e3   : > { %v3119_v52 = vmul.f32 %v3108_v13, %v3085_v43 }
0x15e4   : > { %v3112_v48 = vmul.f32 0.5, %v3111_v58 }
0x15e5   : > { %v3124_v12 = vmul.f32 %v3913_v46, %v3119_v52 }
0x15e6   : > { %v3113_v30 = vsub.f32 1.5, %v3112_v48 }
0x15e7   : > { %v3129_v34 = vadd.f32 %v3914_v32, %v3124_v12 }
0x15e8   : > { %v3114_v17 = vmul.f32 %v4008_v11, %v3113_v30 }
0x15ea   : > { %v3118_v18 = vsel %vm3117_vm4, %v4008_v11, %v3114_v17 }
0x15eb   : > { %v3120_v5 = vmul.f32 %v3118_v18, %v3086_v19 }
0x15ed   : > { %v3125_v23 = vmul.f32 %v3913_v46, %v3120_v5 }
0x15ef   : > { %v3130_v27 = vadd.f32 %v3914_v32, %v3125_v23 }
0x15f1   : > { %v3131_v29 = vpack.c.bf16 %v3130_v27, %v3129_v34 }
0x15f3   : > { %3810 = vmatmul.msk.bf16.vlgmr.msrb.gmra.mxu1 %vm1047_vm6, %v3131_v29  ;;  %3811 = vmatmul.msk.bf16.vlgmr.msra.gmra.mxu2 %vm1047_vm6, %v3131_v29 }
0x1670   : > { %v3168_v31 = vpop.f32.mrf.mxu1 }
0x1671   : > { %v3217_v40 = vmul.f32 %v3520_v33, %v3168_v31 }
0x1676   : > { %v3182_v35 = vpop.f32.mrf.mxu2 }
0x1677   : > { %v3187_v39 = vmax.f32 %v3168_v31, %v3182_v35  ;;  %v3218_v41 = vmul.f32 %v3521_v47, %v3182_v35 }
0x1678   : > { %v3170_v42 = vpop.f32.mrf.mxu1 }
0x1679   : > { %3188 = vmax.xlane.f32.xlu1 %v3187_v39  ;;  %v3221_v44 = vadd.f32 %v3218_v41, %v3217_v40  ;;  %v3219_v16 = vmul.f32 %v4203_v25, %v3170_v42 }
0x167e   : > { %v3184_v43 = vpop.f32.mrf.mxu2 }
0x167f   : > { %v3220_v45 = vmul.f32 %v4206_v26, %v3184_v43  ;;  %v3190_v50 = vmax.f32 %v3170_v42, %v3184_v43 }
0x1681   : > { %3191 = vmax.xlane.f32.xlu2 %v3190_v50  ;;  %v3224_v21 = vadd.f32 %v3220_v45, %v3219_v16 }
0x1689   : > { %3222 = vadd.xlane.f32.xlu2 %v3221_v44 }
0x16ec   : > { %v3189_v51 = vpop.xlane.xlu1 %3188 }
0x16ed   : > { %v3193_v19 = vsub.f32 %v3168_v31, %v3189_v51  ;;  %v3194_v20 = vsub.f32 %v3182_v35, %v3189_v51 }
0x16ef   : > { %v3197_v22 = vmul.f32 1.442695, %v3193_v19  ;;  %v3199_v24 = vmul.f32 1.442695, %v3194_v20 }
0x16f1   : > { %4009 = vpow2.f32 %v3197_v22 }
0x16f2   : > { %4011 = vpow2.f32 %v3199_v24 }
0x16f4   : > { %v3192_v53 = vpop.xlane.xlu2 %3191 }
0x16f5   : > { %v3195_v54 = vsub.f32 %v3170_v42, %v3192_v53  ;;  %v3196_v6 = vsub.f32 %v3184_v43, %v3192_v53 }
0x16f7   : > { %v4010_v36 = vpop.eup %4009  ;;  %v3201_v55 = vmul.f32 1.442695, %v3195_v54  ;;  %v3203_v49 = vmul.f32 1.442695, %v3196_v6 }
0x16f8   : > { %v4012_v25 = vpop.eup %4011 }
0x16f9   : > { %4013 = vpow2.f32 %v3201_v55  ;;  %v3205_v26 = vadd.f32 %v4012_v25, %v4010_v36 }
0x16fa   : > { %4015 = vpow2.f32 %v3203_v49 }
0x16fb   : > { %3206 = vadd.xlane.f32.xlu0 %v3205_v26  ;;  %4017 = vrcp.f32 %v4049_v38 }
0x16fc   : > { %v3223_v1 = vpop.xlane.xlu2 %3222 }
0x16ff   : > { %v4014_v56 = vpop.eup %4013 }
0x1700   : > { %v4016_v57 = vpop.eup %4015 }
0x1701   : > { %v3208_v59 = vadd.f32 %v4016_v57, %v4014_v56  ;;  %v4018_v28 = vpop.eup %4017 }
0x1702   : > { %v3236_v37 = vmul.f32 8.0, %v4018_v28  ;;  %vm3240_vm0 = vweird.f32 %v4018_v28 }
0x1703   : > { %3225 = vadd.xlane.f32.xlu0 %v3224_v21  ;;  %3209 = vadd.xlane.f32.xlu1 %v3208_v59 }
0x1704   : > { %v3237_v2 = vsub.f32 1.0, %v3236_v37 }
0x1706   : > { %v3238_v9 = vmul.f32 %v4018_v28, %v3237_v2 }
0x1708   : > { %v3239_v15 = vadd.f32 %v4018_v28, %v3238_v9 }
0x170a   : > { %v3241_v52 = vsel %vm3240_vm0, %v4018_v28, %v3239_v15 }
0x176e   : > { %v3207_v60 = vpop.xlane.xlu0 %3206 }
0x176f   : > { %4019 = vlog2.f32 %v3207_v60 }
0x1775   : > { %v4020_v62 = vpop.eup %4019 }
0x1776   : > { %v3212_v63 = vmul.f32 0.6931472, %v4020_v62  ;;  %v3210_v3 = vpop.xlane.xlu1 %3209  ;;  %v3226_v58 = vpop.xlane.xlu0 %3225 }
0x1777   : > { %4021 = vlog2.f32 %v3210_v3 }
0x1778   : > { %v3215_v0 = vadd.f32 %v3212_v63, %v3189_v51 }
0x177a   : > { %v3227_v61 = vsub.f32 %v3215_v0, %v3223_v1 }
0x177c   : > { %v3229_v4 = vrot.slane %v3227_v61, 4 }
0x177d   : > { %v4022_v7 = vpop.eup %4021 }
0x177e   : > { %v3230_v10 = vadd.f32 %v3229_v4, %v3227_v61  ;;  %v3214_v8 = vmul.f32 0.6931472, %v4022_v7 }
0x1780   : > { %v3231_v11 = vrot.slane %v3230_v10, 2  ;;  %v3216_v14 = vadd.f32 %v3214_v8, %v3192_v53 }
0x1782   : > { %v3232_v13 = vadd.f32 %v3231_v11, %v3230_v10  ;;  %v3228_v48 = vsub.f32 %v3216_v14, %v3226_v58 }
0x1784   : > { %v3233_v30 = vrot.slane %v3232_v13, 1  ;;  %v3245_v46 = vrot.slane %v3228_v48, 4 }
0x1786   : > { %v3234_v17 = vadd.f32 %v3233_v30, %v3232_v13  ;;  %v3246_v18 = vadd.f32 %v3245_v46, %v3228_v48 }
0x1788   : > { %v3242_v32 = vmul.f32 %v3241_v52, %v3234_v17  ;;  %v3247_v12 = vrot.slane %v3246_v18, 2 }
0x178a   : > { %3244 = vst.msk [vmem:[%s857_s6] sm:$0x1] %vm3243_vm3, %v3242_v32  ;;  %v3248_v5 = vadd.f32 %v3247_v12, %v3246_v18 }
0x178c   : > { %v3249_v23 = vrot.slane %v3248_v5, 1 }
0x178e   : > { %v3250_v34 = vadd.f32 %v3249_v23, %v3248_v5 }
0x1790   : > { %v3251_v27 = vmul.f32 %v3250_v34, %v3241_v52 }
0x1792   : > { %3252 = vst.msk [vmem:[%s857_s6 + $0x1] sm:$0x1] %vm3243_vm3, %v3251_v27 }
0x1793 PF: > { %s28_s27 = sadd.s32 1, %s4029_s27  }
0x1794   : > { %p25_p4 = scmp.ge.s32.totalorder %s28_s27, 4  }
0x1796   :  { %27 = sbr.rel (!%p25_p4) target bundleno = 10 (0xa), region = 182 }

</bundles_post_ra>
